<compile_context>
chip_gen: v5e
topology: v5e:2x2
jax: 0.10.0
libtpu: 0.0.40
codegen_flags: <defaults>
</compile_context>

<pallas_src>
import jax
import jax.numpy as jnp
from jax import lax
from jax.experimental import pallas as pl
from jax.experimental.pallas import tpu as pltpu

_LANE = 128
_BT_MAX = 2048                  # per-tile batch cap (VMEM + diminishing returns)
_SQRT1_2 = 0.7071067811865476   # 1/sqrt(2) for exact (erf) GELU
_HIGHEST = jax.lax.Precision.HIGHEST


def _round_up(x, m):
    return ((x + m - 1) // m) * m


def _choose_bt(batch):
    """Largest lane-aligned batch tile <= _BT_MAX that divides the padded batch,
    keeping >= 2 tiles when the batch allows (so v7x's two TensorCores both work)."""
    bp = _round_up(batch, _LANE)
    cap = min(_BT_MAX, bp // 2) if bp >= 2 * _LANE else bp
    cap = max(_LANE, (cap // _LANE) * _LANE)
    bt = cap
    while bp % bt:
        bt -= _LANE
    return bt, bp


def _critic_kernel(x_ref, mask_ref, expand_ref, w1b1_ref, w2b2_ref, out_ref):
    # x_ref      : [BT, N*D]    f32/bf16  flattened node embeddings per environment
    # mask_ref   : [BT, N]      f32       1.0 where env.state == 1 else 0.0
    # expand_ref : [N, N*D]     f32       one-hot node -> feature expansion matrix
    # w1b1_ref   : [N*D+1, HP]  f32       rows 0..N*D-1 = tile(W1,(N,1)), row N*D = b1
    # w2b2_ref   : [2, HP]      f32       row 0 = W2 as a row, row 1 col 0 = b2
    # out_ref    : [1, BT]      f32       lane-dense per-environment critic values
    mask = mask_ref[...]
    n_nodes = jnp.float32(mask.shape[1])
    nd = expand_ref.shape[1]

    # Per-node averaging weights; fallback = uniform mean when nothing is scheduled
    # (exact 0.0/1.0 mask => the == 0.0 compare is safe).
    cnt = jnp.sum(mask, axis=1, keepdims=True)              # [BT, 1]
    use_all = (cnt == 0.0).astype(jnp.float32)              # [BT, 1]
    eff = mask + use_all * (1.0 - mask)                     # [BT, N]
    denom = cnt + use_all * (n_nodes - cnt)                 # [BT, 1]  (always > 0)
    w = eff * pl.reciprocal(denom)                          # [BT, N]  rows sum to 1

    # Expand node weights across the feature axis (one-hot matmul; MXU is idle here).
    w_exp = jnp.dot(w, expand_ref[...],
                    preferred_element_type=jnp.float32, precision=_HIGHEST)   # [BT, N*D]

    # Weighted node embeddings; the masked mean is fused with Linear(D->H):
    #   pre[b,:] = sum_{n,d} (eff/denom)[b,n] * x[b,n,d] * W1[d,:]  ==  mean_emb @ W1
    gx = x_ref[...].astype(jnp.float32) * w_exp             # [BT, N*D] lane-dense
    w1 = w1b1_ref[:nd, :]                                   # [N*D, HP] = tile(W1,(N,1))
    b1 = w1b1_ref[nd:nd + 1, :]                             # [1, HP]
    pre = jnp.dot(gx, w1, preferred_element_type=jnp.float32,
                  precision=_HIGHEST) + b1                  # [BT, HP]

    # Exact (erf) GELU == torch nn.GELU default.
    # TODO(synk): approximate=True (tanh) would move this to the EUP but drifts ~1e-3 from torch.
    h = 0.5 * pre * (1.0 + lax.erf(pre * _SQRT1_2))         # [BT, HP]

    # Linear(H->1), emitted lane-dense as [1, BT] via an NT contraction.
    w2_row = w2b2_ref[0:1, :]                               # [1, HP]
    b2 = w2b2_ref[1:2, 0:1]                                 # [1, 1]
    v = lax.dot_general(w2_row, h, (((1,), (1,)), ((), ())),
                        preferred_element_type=jnp.float32, precision=_HIGHEST)  # [1, BT]
    out_ref[...] = v + b2


def pack_critic_params(w1, b1, w2, b2, n_nodes):
    """Pack the Critic parameters once per weight update (hoisted out of the step loop).

    w1: [D, H] (torch linear1.weight transposed), b1: [H],
    w2: [H] or [H, 1] (torch linear2.weight), b2: scalar/[1]."""
    w1 = jnp.asarray(w1, jnp.float32)
    b1 = jnp.asarray(b1, jnp.float32).reshape(-1)
    w2 = jnp.asarray(w2, jnp.float32).reshape(-1)
    b2 = jnp.asarray(b2, jnp.float32).reshape(())
    d, h = w1.shape
    hp = _round_up(h, _LANE)
    nd = n_nodes * d
    # One-hot expansion: expand[n, m*D + k] = 1 iff m == n.
    expand = jnp.repeat(jnp.eye(n_nodes, dtype=jnp.float32), d, axis=1)     # [N, N*D]
    # W1 tiled over nodes + b1 as the last row, zero-padded to HP lanes.
    w1b1 = jnp.zeros((nd + 1, hp), jnp.float32)
    w1b1 = w1b1.at[:nd, :h].set(jnp.tile(w1, (n_nodes, 1))).at[nd, :h].set(b1)
    w2b2 = jnp.zeros((2, hp), jnp.float32)
    w2b2 = w2b2.at[0, :h].set(w2).at[1, 0].set(b2)
    return expand, w1b1, w2b2


def critic_forward_batched(node_embeddings, states, packed_params):
    """node_embeddings: [B, N, D] (f32 or bf16); states: [B, N] ints; returns [B] values."""
    expand, w1b1, w2b2 = packed_params
    x = jnp.asarray(node_embeddings)                       # keep caller dtype (bf16 ok)
    B, N, D = x.shape
    nd = N * D
    hp = w1b1.shape[1]
    assert expand.shape == (N, nd) and w1b1.shape[0] == nd + 1

    mask = (jnp.asarray(states).reshape(B, N) == 1).astype(jnp.float32)
    x_flat = x.reshape(B, nd)                              # row-major flatten: free

    bt, bp = _choose_bt(B)
    if bp != B:
        # TODO(synk): handle the ragged batch tail with in-kernel bounds to avoid this pad copy.
        x_flat = jnp.pad(x_flat, ((0, bp - B), (0, 0)))
        mask = jnp.pad(mask, ((0, bp - B), (0, 0)))
    n_tiles = bp // bt

    itemsize = jnp.dtype(x_flat.dtype).itemsize
    ndp = _round_up(nd, _LANE)
    vmem_est = (2 * bt * ndp * itemsize                    # x blocks (double-buffered)
                + 2 * bt * _LANE * 4                       # mask blocks
                + 2 * ((nd + 9) * hp + N * ndp + 2 * _LANE) * 4   # resident weights
                + 2 * bt * 4                               # output blocks
                + 5 * bt * ndp * 4)                        # in-kernel f32 temporaries
    vmem_limit = int(min(56 << 20, max(32 << 20, vmem_est + (8 << 20))))

    flops = bp * (2 * N * nd + nd + 2 * nd * hp + 12 * hp + 2 * hp)
    bytes_accessed = (bp * nd * itemsize
                      + 4 * (bp * N + (nd + 1) * hp + N * nd + 2 * hp + bp))

    out = pl.pallas_call(
        _critic_kernel,
        out_shape=jax.ShapeDtypeStruct((1, bp), jnp.float32),
        grid_spec=pltpu.PrefetchScalarGridSpec(
            num_scalar_prefetch=0,
            grid=(n_tiles,),
            in_specs=[
                pl.BlockSpec((bt, nd), lambda i: (i, 0)),        # x: lane-dense stream
                pl.BlockSpec((bt, N), lambda i: (i, 0)),         # mask
                pl.BlockSpec((N, nd), lambda i: (0, 0)),         # weights: constant block
                pl.BlockSpec((nd + 1, hp), lambda i: (0, 0)),    #   index -> DMA'd once,
                pl.BlockSpec((2, hp), lambda i: (0, 0)),         #   stay VMEM-resident
            ],
            out_specs=pl.BlockSpec((1, bt), lambda i: (0, i)),   # lane-dense values
        ),
        compiler_params=pltpu.CompilerParams(
            dimension_semantics=("parallel",),                   # shards tiles over v7x's 2 TCs
            vmem_limit_bytes=vmem_limit),
        cost_estimate=pl.CostEstimate(
            flops=int(flops), transcendentals=int(bp * hp),
            bytes_accessed=int(bytes_accessed)),
    )(x_flat, mask, expand, w1b1, w2b2)
    return out[0, :B]


def critic_forward(node_embeddings, state, w1, b1, w2, b2):
    """Single-environment forward matching the torch module (returns a scalar)."""
    x = jnp.asarray(node_embeddings)
    packed = pack_critic_params(w1, b1, w2, b2, n_nodes=x.shape[0])
    vals = critic_forward_batched(x[None, ...], jnp.asarray(state).reshape(1, -1), packed)
    return vals[0]


def critic_ref(node_embeddings, state, w1, b1, w2, b2):
    """Pure-JAX reference mirroring the torch module (single environment, f32 math)."""
    x = jnp.asarray(node_embeddings, jnp.float32)
    mask = (jnp.asarray(state).reshape(-1) == 1).astype(jnp.float32)
    cnt = jnp.sum(mask)
    g_all = jnp.mean(x, axis=0)
    g_msk = jnp.sum(x * mask[:, None], axis=0) / jnp.maximum(cnt, 1.0)
    g = jnp.where(cnt == 0.0, g_all, g_msk)
    pre = jnp.dot(g, w1, precision=_HIGHEST) + b1
    h = jax.nn.gelu(pre, approximate=False)
    return jnp.dot(h, jnp.asarray(w2).reshape(-1), precision=_HIGHEST) + jnp.asarray(b2).reshape(())


if __name__ == "__main__":
    # Shapes implied by the module: N nodes, gnn_output_dim=D, hidden_dim=H (default 64),
    # batched over B environments (2 grid tiles at this size).
    B, N, D, H = 256, 8, 32, 64

    key = jax.random.PRNGKey(0)
    k_x, k_s, k_w1, k_b1, k_w2, k_b2 = jax.random.split(key, 6)

    x = jax.random.normal(k_x, (B, N, D), dtype=jnp.float32)
    states = (jax.random.uniform(k_s, (B, N)) > 0.5).astype(jnp.int32)
    # Force a couple of environments into the "nothing scheduled" fallback path.
    states = states.at[0].set(0).at[B // 2].set(0)

    # Torch Linear shapes [H,D]/[1,H], stored transposed here as [in, out].
    w1 = jax.random.normal(k_w1, (D, H), dtype=jnp.float32) * (1.0 / jnp.sqrt(D))
    b1 = jax.random.normal(k_b1, (H,), dtype=jnp.float32) * 0.01
    w2 = jax.random.normal(k_w2, (H, 1), dtype=jnp.float32) * (1.0 / jnp.sqrt(H))
    b2 = jax.random.normal(k_b2, (1,), dtype=jnp.float32) * 0.01

    # Pack once (hoisted out of the per-step path, as per the review).
    packed = pack_critic_params(w1, b1, w2, b2, n_nodes=N)

    # Batched kernel vs vmapped reference.  Tolerance sized for MXU default-precision
    # differences between the fused K=N*D contraction and the reference's two-step math.
    vals = jax.block_until_ready(critic_forward_batched(x, states, packed))
    ref_vals = jax.vmap(lambda xe, st: critic_ref(xe, st, w1, b1, w2, b2))(x, states)
    assert vals.shape == (B,)
    err = float(jnp.max(jnp.abs(vals - ref_vals)))
    assert jnp.allclose(vals, ref_vals, atol=3e-3, rtol=3e-3), err

    # bf16-streamed embeddings (halves HBM traffic on bandwidth-poor v5e); looser tolerance.
    vals_bf16 = jax.block_until_ready(
        critic_forward_batched(x.astype(jnp.bfloat16), states, packed))
    err_bf16 = float(jnp.max(jnp.abs(vals_bf16 - ref_vals)))
    assert jnp.allclose(vals_bf16, ref_vals, atol=3e-2, rtol=3e-2), err_bf16

    # Single-environment path (same signature semantics as the torch module).
    v1 = jax.block_until_ready(critic_forward(x[3], states[3], w1, b1, w2, b2))
    assert jnp.allclose(v1, ref_vals[3], atol=3e-3, rtol=3e-3), (float(v1), float(ref_vals[3]))

    print("KERNEL_OK")
</pallas_src>

<mosaic_0001>
module attributes {stable_mosaic.version = 11 : i64} {
  func.func @_critic_kernel(%arg0: i32, %arg1: memref<128x256xf32, #tpu.memory_space<vmem>>, %arg2: memref<128x8xf32, #tpu.memory_space<vmem>>, %arg3: memref<8x256xf32, #tpu.memory_space<vmem>>, %arg4: memref<257x128xf32, #tpu.memory_space<vmem>>, %arg5: memref<2x128xf32, #tpu.memory_space<vmem>>, %arg6: memref<1x128xf32, #tpu.memory_space<vmem>>) attributes {dimension_semantics = [#tpu.dimension_semantics<parallel>], iteration_bounds = array<i64: 2>, scalar_prefetch = 0 : i64, scratch_operands = 0 : i64, tpu.core_type = #tpu.core_type<tc>, window_params = [{transform_indices = @transform_0, window_bounds = array<i64: 128, 256>}, {transform_indices = @transform_1, window_bounds = array<i64: 128, 8>}, {pipeline_mode = #tpu.pipeline_mode<synchronous>, transform_indices = @transform_2, window_bounds = array<i64: 8, 256>}, {pipeline_mode = #tpu.pipeline_mode<synchronous>, transform_indices = @transform_3, window_bounds = array<i64: 257, 128>}, {pipeline_mode = #tpu.pipeline_mode<synchronous>, transform_indices = @transform_4, window_bounds = array<i64: 2, 128>}, {transform_indices = @transform_5, window_bounds = array<i64: 1, 128>}]} {
    %c0 = arith.constant 0 : index
    %c0_0 = arith.constant 0 : index
    %0 = vector.load %arg2[%c0, %c0_0] : memref<128x8xf32, #tpu.memory_space<vmem>>, vector<128x8xf32>
    %cst = arith.constant dense<0.000000e+00> : vector<128xf32>
    %1 = vector.multi_reduction <add>, %0, %cst [1] : vector<128x8xf32> to vector<128xf32>
    %2 = vector.shape_cast %1 : vector<128xf32> to vector<128x1xf32>
    %cst_1 = arith.constant 0.000000e+00 : f32
    %3 = vector.broadcast %cst_1 : f32 to vector<128x1xf32>
    %4 = arith.cmpf oeq, %2, %3 : vector<128x1xf32>
    %5 = arith.extui %4 : vector<128x1xi1> to vector<128x1xi32>
    %6 = arith.sitofp %5 : vector<128x1xi32> to vector<128x1xf32>
    %cst_2 = arith.constant 1.000000e+00 : f32
    %7 = vector.broadcast %cst_2 : f32 to vector<128x8xf32>
    %8 = arith.subf %7, %0 : vector<128x8xf32>
    %9 = vector.broadcast %6 : vector<128x1xf32> to vector<128x8xf32>
    %10 = arith.mulf %9, %8 : vector<128x8xf32>
    %11 = arith.addf %0, %10 : vector<128x8xf32>
    %cst_3 = arith.constant 8.000000e+00 : f32
    %12 = vector.broadcast %cst_3 : f32 to vector<128x1xf32>
    %13 = arith.subf %12, %2 : vector<128x1xf32>
    %14 = arith.mulf %6, %13 : vector<128x1xf32>
    %15 = arith.addf %2, %14 : vector<128x1xf32>
    %16 = tpu.reciprocal %15 : vector<128x1xf32> -> vector<128x1xf32>
    %17 = vector.broadcast %16 : vector<128x1xf32> to vector<128x8xf32>
    %18 = arith.mulf %11, %17 : vector<128x8xf32>
    %c0_4 = arith.constant 0 : index
    %c0_5 = arith.constant 0 : index
    %19 = vector.load %arg3[%c0_4, %c0_5] : memref<8x256xf32, #tpu.memory_space<vmem>>, vector<8x256xf32>
    %cst_6 = arith.constant dense<0.000000e+00> : vector<128x256xf32>
    %20 = tpu.matmul %18, %19, %cst_6 {dimension_numbers = #tpu.dot_dimension_numbers<[1], [0], [0], [1], [0, 0, 1, 1], [], []>, precision = #tpu.contract_precision<fp32>} : vector<128x8xf32>, vector<8x256xf32>, vector<128x256xf32> -> vector<128x256xf32>
    %c0_7 = arith.constant 0 : index
    %c0_8 = arith.constant 0 : index
    %21 = vector.load %arg1[%c0_7, %c0_8] : memref<128x256xf32, #tpu.memory_space<vmem>>, vector<128x256xf32>
    %22 = arith.mulf %21, %20 : vector<128x256xf32>
    %c0_9 = arith.constant 0 : index
    %c0_10 = arith.constant 0 : index
    %23 = vector.load %arg4[%c0_9, %c0_10] : memref<257x128xf32, #tpu.memory_space<vmem>>, vector<256x128xf32>
    %c256 = arith.constant 256 : index
    %c0_11 = arith.constant 0 : index
    %24 = vector.load %arg4[%c256, %c0_11] : memref<257x128xf32, #tpu.memory_space<vmem>>, vector<1x128xf32>
    %cst_12 = arith.constant dense<0.000000e+00> : vector<128x128xf32>
    %25 = tpu.matmul %22, %23, %cst_12 {dimension_numbers = #tpu.dot_dimension_numbers<[1], [0], [0], [1], [0, 0, 1, 1], [], []>, precision = #tpu.contract_precision<fp32>} : vector<128x256xf32>, vector<256x128xf32>, vector<128x128xf32> -> vector<128x128xf32>
    %26 = vector.broadcast %24 : vector<1x128xf32> to vector<128x128xf32>
    %27 = arith.addf %25, %26 : vector<128x128xf32>
    %cst_13 = arith.constant 5.000000e-01 : f32
    %28 = vector.broadcast %cst_13 : f32 to vector<128x128xf32>
    %29 = arith.mulf %28, %27 : vector<128x128xf32>
    %cst_14 = arith.constant 0.707106769 : f32
    %30 = vector.broadcast %cst_14 : f32 to vector<128x128xf32>
    %31 = arith.mulf %27, %30 : vector<128x128xf32>
    %32 = math.erf %31 : vector<128x128xf32>
    %cst_15 = arith.constant 1.000000e+00 : f32
    %33 = vector.broadcast %cst_15 : f32 to vector<128x128xf32>
    %34 = arith.addf %33, %32 : vector<128x128xf32>
    %35 = arith.mulf %29, %34 : vector<128x128xf32>
    %c0_16 = arith.constant 0 : index
    %c0_17 = arith.constant 0 : index
    %36 = vector.load %arg5[%c0_16, %c0_17] : memref<2x128xf32, #tpu.memory_space<vmem>>, vector<1x128xf32>
    %c1 = arith.constant 1 : index
    %c0_18 = arith.constant 0 : index
    %37 = vector.load %arg5[%c1, %c0_18] : memref<2x128xf32, #tpu.memory_space<vmem>>, vector<1x1xf32>
    %cst_19 = arith.constant dense<0.000000e+00> : vector<1x128xf32>
    %38 = tpu.matmul %36, %35, %cst_19 {dimension_numbers = #tpu.dot_dimension_numbers<[1], [1], [0], [0], [0, 0, 1, 0], [], []>, precision = #tpu.contract_precision<fp32>} : vector<1x128xf32>, vector<128x128xf32>, vector<1x128xf32> -> vector<1x128xf32>
    %39 = vector.broadcast %37 : vector<1x1xf32> to vector<1x128xf32>
    %40 = arith.addf %38, %39 : vector<1x128xf32>
    %c0_20 = arith.constant 0 : index
    %c0_21 = arith.constant 0 : index
    %41 = vector.load %arg6[%c0_20, %c0_21] : memref<1x128xf32, #tpu.memory_space<vmem>>, vector<1x128xf32>
    tpu.vector_store %arg6[%c0_20, %c0_21], %40 {strides = array<i32>} : memref<1x128xf32, #tpu.memory_space<vmem>>, vector<1x128xf32>,
    return
  }
  func.func @transform_0(%arg0: i32) -> (i32, i32) {
    %c0_i32 = arith.constant 0 : i32
    %c0_i32_0 = arith.constant 0 : i32
    return %arg0, %c0_i32 : i32, i32
  }
  func.func @transform_1(%arg0: i32) -> (i32, i32) {
    %c0_i32 = arith.constant 0 : i32
    %c0_i32_0 = arith.constant 0 : i32
    return %arg0, %c0_i32 : i32, i32
  }
  func.func @transform_2(%arg0: i32) -> (i32, i32) {
    %c0_i32 = arith.constant 0 : i32
    %c0_i32_0 = arith.constant 0 : i32
    %c0_i32_1 = arith.constant 0 : i32
    return %c0_i32, %c0_i32_0 : i32, i32
  }
  func.func @transform_3(%arg0: i32) -> (i32, i32) {
    %c0_i32 = arith.constant 0 : i32
    %c0_i32_0 = arith.constant 0 : i32
    %c0_i32_1 = arith.constant 0 : i32
    return %c0_i32, %c0_i32_0 : i32, i32
  }
  func.func @transform_4(%arg0: i32) -> (i32, i32) {
    %c0_i32 = arith.constant 0 : i32
    %c0_i32_0 = arith.constant 0 : i32
    %c0_i32_1 = arith.constant 0 : i32
    return %c0_i32, %c0_i32_0 : i32, i32
  }
  func.func @transform_5(%arg0: i32) -> (i32, i32) {
    %c0_i32 = arith.constant 0 : i32
    %c0_i32_0 = arith.constant 0 : i32
    return %c0_i32, %arg0 : i32, i32
  }
}

</mosaic_0001>

<bundles_post_ra>
// kernel: tpu_custom_call.1
= control target key start
LH: loop header
LB: loop body
LE: loop exit
PB: predicated region body
PF: predicated region fallthrough
CT: control target
= control target key end

     0   :  { %s9035_s0 = inlined_call_operand.hbm [shape: f32[256,256], index: 0, kind: input, shape index: {}]   ;;  %s9036_s1 = inlined_call_operand.vmem [shape: f32[256,8], index: 1, kind: input, shape index: {}]   ;;  %s9037_s2 = inlined_call_operand.hbm [shape: f32[8,256], index: 2, kind: input, shape index: {}]   ;;  %s9038_s3 = inlined_call_operand.vmem [shape: f32[257,128], index: 3, kind: input, shape index: {}]   ;;  %s9039_s4 = inlined_call_operand.vmem [shape: f32[2,128], index: 4, kind: input, shape index: {}]   ;;  %s9040_s5 = inlined_call_operand.hbm [shape: f32[1,256], index: 5, kind: output, shape index: {}]  }
   0x1   :  { %9196 = sst [smem:[#allocation62_spill]] %s9037_s2 }
   0x2   :  { %10 = vsyncpa [#allocation3], 0 }
   0x3   :  { %12 = vsyncpa [#allocation3 + $0x1], 0 }
   0x4   :  { %13 = vsyncpa [#allocation6], 0 }
   0x5   :  { %14 = vsyncpa [#allocation4], 0 }
   0x6   :  { %16 = vsyncpa [#allocation4 + $0x1], 0  ;;  %s5215_s18 = smov 0   ;;  %s5217_s19 = smov 0  }
   0x7   :  { %s5219_s20 = smov 0   ;;  %s5221_s21 = smov 0  }
   0x8 LB: > { %s5236_s22 = sadd.s32 4294967295, %s5178_s21   ;;  %s4868_s23 = sadd.s32 4294967294, %s5178_s21   ;;  %s5178_s21 = sphi %s5221_s21, %s9707_s21   ;;  %s5174_s20 = sphi %s5219_s20, %s9706_s20   ;;  %s5170_s19 = sphi %s5217_s19, %s9705_s19   ;;  %s5166_s18 = sphi %s5215_s18, %s9704_s18  }
   0x9   : > { %s5240_s24 = sadd.s32 1, %s5178_s21   ;;  %s29_s25 = sadd.s32 1, %s5174_s20 }
   0xa   : > { %s26_s26 = ssub.s32 %s5178_s21, %s5240_s24  ;;  %p36_p0 = scmp.ne.s32.totalorder %s5174_s20, %s5170_s19 }
   0xb   : > { %p27_p1 = scmp.eq.s32.totalorder %s26_s26, 0  ;;  %p37_p2 = scmp.eq.s32.totalorder %s5178_s21, 0 }
   0xc   : > { %p42_p3 = scmp.ne.s32.totalorder %s5170_s19, %s5166_s18  ;;  %p43_p4 = scmp.eq.s32.totalorder %s5236_s22, 0 }
   0xd   : > { %s5252_s27 = scalar_select %p27_p1, %s5174_s20, %s29_s25  }
   0xe   : > { %p5254_p5 = por %p37_p2, %p36_p0  ;;  %p5260_p6 = por %p43_p4, %p42_p3 }
   0xf   : > { %9197 = sst [smem:[#allocation11_spill]] %s5252_s27  ;;  %p155_p7 = scmp.eq.s32.totalorder %s5236_s22, 1 }
  0x10   : > { %p161_p8 = scmp.eq.s32.totalorder %s4868_s23, 1  ;;  %p4869_p9 = scmp.ge.s32.totalorder %s5178_s21, 1 }
  0x11   : > { %p168_p10 = scmp.lt.s32.totalorder %s5178_s21, 3  ;;  %p5267_p11 = por %p155_p7, %p36_p0 }
  0x12   : > { %p5271_p12 = por %p161_p8, %p42_p3  ;;  %s9203_s2 = sld [smem:[#allocation62_spill]] }
  0x13   : > { %p5275_p13 = pnand %p4869_p9, %p168_p10  ;;  %s5180_s11 = smov [#allocation5]  }
  0x14   : > { %s182_s12 = sshll.u32 %s5180_s11, 4  ;;  %p4940_p3 = scmp.lt.s32.totalorder %s5178_s21, 2  ;;  %s183_s12 = int_to_ptr.vmem [resolvable:$true] %s182_s12 }
  0x15   : > { %p4927_p1 = pneg %p5275_p13  ;;  %s199_s13 = sand.u32 1, %s5174_s20  }
  0x16   : > { %p5291_p7 = pnand %p4940_p3, %p5254_p5  ;;  %s4872_s15 = sshll.u32 %s199_s13, 8 }
  0x17   : > { %p4928_p2 = pnand %p4927_p1, %p43_p4  ;;  %s4916_s16 = sshll.u32 %s5178_s21, 8 }
  0x18   : > { %s180_s10 = sshll.u32 %s9203_s2, 4  ;;  %s209_s25 = scalar_lea.hbm %s9035_s0, %s4916_s16  ;;  %s181_s10 = int_to_ptr.hbm [resolvable:$true] %s180_s10 }
  0x19   : > { %4930 = dma.hbm_to_vmem [thread:$0]  (!%p4928_p2), %s181_s10, 256, %s183_s12, [#allocation6]  }
  0x1a   : > { %s210_s26 = sshll.u32 %s209_s25, 4  ;;  %s203_s8 = scalar_lea.vmem [#allocation2], %s4872_s15  ;;  %s211_s26 = int_to_ptr.hbm [resolvable:$true] %s210_s26 }
  0x1b   : > { %s212_s9 = sshll.u32 %s203_s8, 4  ;;  %s200_s11 = scalar_lea.sflag [#allocation3], %s199_s13  ;;  %s213_s9 = int_to_ptr.vmem [resolvable:$true] %s212_s9 }
  0x1c   : > { %s5078_s2 = sshra.s32 %s211_s26, 4  ;;  %p5082_p8 = pneg %p5291_p7  ;;  %s5079_s2 = int_to_ptr.hbm [resolvable:$true] %s5078_s2 }
  0x1d   : > { %s5080_s28 = scalar_lea.hbm %s5079_s2, 256  ;;  %s5085_s27 = scalar_lea.hbm %s9035_s0, 512 }
  0x1e   : > { %p5081_p5 = scmp.ne.s32.totalorder %s5079_s2, %s5080_s28  ;;  %p5086_p1 = scmp.lt.s32.totalorder %s5079_s2, %s9035_s0 }
  0x1f   : > { %p5087_p2 = scmp.lt.s32.totalorder %s5085_s27, %s5080_s28 }
  0x20   : > { %p5083_p9 = pnand %p5082_p8, %p5081_p5 }
  0x21   : > { %p5088_p3 = por %p5087_p2, %p5086_p1 }
  0x22   : > { %p5084_p10 = pneg %p5083_p9 }
  0x24   : > { %p5089_p0 = pnand %p5088_p3, %p5084_p10 }
  0x26   : > { %5092 = shalt.err (!%p5089_p0)
}
  0x27   : > { %s5181_s13 = smov 256   ;;  %s5182_s15 = smov 16  }
  0x28   : > { %4934 = dma.hbm_to_vmem [thread:$0]  (!%p5291_p7), %s211_s26, 4096, %s213_s9, %s200_s11, %s5181_s13, %s5181_s13, %s5182_s15  }
  0x29   : > { %233 = sbr.rel (%p5275_p13) target bundleno = 1510 (0x5e6), region = 40 }
  0x2e   : > { %s5312_s23 = sand.u32 1, %s5170_s19  }
  0x2f   : > { %s4877_s25 = sshll.u32 %s5312_s23, 8  ;;  %s236_s2 = scalar_lea.sflag [#allocation3], %s5312_s23 }
  0x30   : > { %s5316_s27 = scalar_lea.vmem [#allocation2], %s4877_s25 }
  0x31   : > { %5153 = dma.done.wait (%p5260_p6), %s236_s2, 4096  }
  0x32   : > { %5155 = vsyncadd (%p5260_p6), %s236_s2, 4294963200 }
  0x33   : > { %5157 = dma.done.wait (%p43_p4), [#allocation6], 256  }
  0x34   : > { %5159 = vsyncadd (%p43_p4), [#allocation6], 4294967040  ;;  %s4879_s7 = sshll.u32 %s5236_s22, 4  ;;  %vm299_vm0 = vcmask 64512   ;;  %v732_v32 = vld [vmem:[#allocation5] sm:$0xff]  ;;  %v9046_v40 = vmov 0.0   ;;  %s4776_s13 = scalar_lea.hbm %s9040_s5, %s5236_s22 }
  0x35   : > { %p278_p13 = scmp.lt.s32.totalorder %s4879_s7, 31  ;;  %v5413_v36 = vand.u32 4294901760, %v732_v32  ;;  %s275_s15 = scalar_lea.vmem [#allocation7], %s5312_s23 }
  0x36   : > { %s4778_s25 = sshll.u32 %s275_s15, 4  ;;  %s4780_s2 = sshll.u32 %s4776_s13, 4  ;;  %s4779_s25 = int_to_ptr.vmem [resolvable:$true] %s4778_s25  ;;  %s4781_s2 = int_to_ptr.hbm [resolvable:$true] %s4780_s2 }
  0x37   : > { %s9709_s7 = smov (!%p278_p13, %s4879_s7), 31  ;;  %798 = vmatpush.msra.mxu0 %v5413_v36  ;;  %4917 = vmatpush.msra.mxu2 %v5413_v36  ;;  %v5423_v49 = vsub.f32 %v732_v32, %v5413_v36  ;;  %s5128_s22 = scalar_lea.hbm %s9040_s5, 2 }
  0x38   : > { %s4880_s14 = sshll.u32 %s9709_s7, 3  ;;  %s4768_s7 = scalar_lea.sflag [#allocation4], %s5312_s23 }
  0x39   : > { %s5330_s9 = scalar_lea.vmem %s9036_s1, %s4880_s14  ;;  %v945_v57 = vand.u32 4294901760, %v5423_v49  ;;  %1031 = vmatpush.msrb.mxu2 %v5423_v49  ;;  %s5122_s14 = sshra.s32 %s4781_s2, 4  ;;  %s5123_s14 = int_to_ptr.hbm [resolvable:$true] %s5122_s14 }
  0x3a   : > { %v5333_v0 = vld [vmem:[%s5330_s9 + $0x70] sm:$0xff]  ;;  %v5336_v1 = vld [vmem:[%s5330_s9 + $0x60] sm:$0xff]  ;;  %v5348_v6 = vld [vmem:[%s5330_s9 + $0x78] sm:$0xff]  ;;  %s5124_s26 = scalar_lea.hbm %s5123_s14, 1  ;;  %p5129_p7 = scmp.lt.s32.totalorder %s5123_s14, %s9040_s5 }
  0x3b   : > { %v5339_v2 = vld [vmem:[%s5330_s9] sm:$0xff]  ;;  %v342_v3 = vsel %vm299_vm0, %v5333_v0, 0.0  ;;  %v336_v4 = vsel %vm299_vm0, %v5336_v1, 0.0  ;;  %v5351_v7 = vld [vmem:[%s5330_s9 + $0x68] sm:$0xff]  ;;  %v345_v9 = vsel %vm299_vm0, %v5348_v6, 0.0  ;;  %v5363_v12 = vld [vmem:[%s5330_s9 + $0x10] sm:$0xff]  ;;  %1245 = vmatpush.msrb.mxu0 %v945_v57  ;;  %p5125_p4 = scmp.ne.s32.totalorder %s5123_s14, %s5124_s26  ;;  %p5130_p5 = scmp.lt.s32.totalorder %s5128_s22, %s5124_s26 }
  0x3c   : > { %343 = vadd.xlane.f32.xlu1 %v342_v3  ;;  %337 = vadd.xlane.f32.xlu0 %v336_v4  ;;  %v300_v5 = vsel %vm299_vm0, %v5339_v2, 0.0  ;;  %v5354_v8 = vld [vmem:[%s5330_s9 + $0x8] sm:$0xff]  ;;  %v339_v10 = vsel %vm299_vm0, %v5351_v7, 0.0  ;;  %v5366_v13 = vld [vmem:[%s5330_s9 + $0x18] sm:$0xff]  ;;  %v5369_v14 = vld [vmem:[%s5330_s9 + $0x20] sm:$0xff]  ;;  %v306_v15 = vsel %vm299_vm0, %v5363_v12, 0.0 }
  0x3d   : > { %301 = vadd.xlane.f32.xlu2 %v300_v5  ;;  %v303_v11 = vsel %vm299_vm0, %v5354_v8, 0.0  ;;  %v309_v16 = vsel %vm299_vm0, %v5366_v13, 0.0  ;;  %v312_v17 = vsel %vm299_vm0, %v5369_v14, 0.0  ;;  %v5378_v18 = vld [vmem:[%s5330_s9 + $0x28] sm:$0xff]  ;;  %v5381_v19 = vld [vmem:[%s5330_s9 + $0x30] sm:$0xff]  ;;  %v5384_v20 = vld [vmem:[%s5330_s9 + $0x38] sm:$0xff]  ;;  %p5126_p6 = pnand %p5125_p4, %p5267_p11  ;;  %p5131_p8 = por %p5130_p5, %p5129_p7 }
  0x3e   : > { %v315_v21 = vsel %vm299_vm0, %v5378_v18, 0.0  ;;  %v318_v22 = vsel %vm299_vm0, %v5381_v19, 0.0  ;;  %v321_v23 = vsel %vm299_vm0, %v5384_v20, 0.0  ;;  %v5393_v24 = vld [vmem:[%s5330_s9 + $0x40] sm:$0xff]  ;;  %v5396_v25 = vld [vmem:[%s5330_s9 + $0x48] sm:$0xff]  ;;  %v5399_v26 = vld [vmem:[%s5330_s9 + $0x50] sm:$0xff] }
  0x3f   : > { %v324_v27 = vsel %vm299_vm0, %v5393_v24, 0.0  ;;  %v327_v28 = vsel %vm299_vm0, %v5396_v25, 0.0  ;;  %v330_v29 = vsel %vm299_vm0, %v5399_v26, 0.0  ;;  %v5408_v30 = vld [vmem:[%s5330_s9 + $0x58] sm:$0xff]  ;;  %v410_v33 = vsub.f32 1.0, %v5333_v0  ;;  %p5127_p0 = pneg %p5126_p6 }
  0x40   : > { %v333_v31 = vsel %vm299_vm0, %v5408_v30, 0.0  ;;  %v408_v44 = vsub.f32 1.0, %v5336_v1  ;;  %v396_v47 = vsub.f32 1.0, %v5339_v2  ;;  %v411_v50 = vsub.f32 1.0, %v5348_v6 }
  0x41   : > { %v409_v54 = vsub.f32 1.0, %v5351_v7  ;;  %v397_v55 = vsub.f32 1.0, %v5354_v8  ;;  %v398_v58 = vsub.f32 1.0, %v5363_v12  ;;  %v399_v59 = vsub.f32 1.0, %v5366_v13  ;;  %p5132_p9 = pnand %p5131_p8, %p5127_p0 }
  0x42   : > { %v400_v61 = vsub.f32 1.0, %v5369_v14  ;;  %v401_v62 = vsub.f32 1.0, %v5378_v18  ;;  %v402_v4 = vsub.f32 1.0, %v5381_v19 }
  0x44   : > { %346 = vadd.xlane.f32.xlu1 %v345_v9  ;;  %340 = vadd.xlane.f32.xlu0 %v339_v10 }
  0x45   : > { %304 = vadd.xlane.f32.xlu2 %v303_v11 }
  0x4c   : > { %307 = vadd.xlane.f32.xlu0 %v306_v15  ;;  %310 = vadd.xlane.f32.xlu1 %v309_v16 }
  0x4d   : > { %313 = vadd.xlane.f32.xlu2 %v312_v17 }
  0x54   : > { %316 = vadd.xlane.f32.xlu0 %v315_v21  ;;  %319 = vadd.xlane.f32.xlu1 %v318_v22 }
  0x55   : > { %322 = vadd.xlane.f32.xlu2 %v321_v23 }
  0x5c   : > { %325 = vadd.xlane.f32.xlu0 %v324_v27  ;;  %328 = vadd.xlane.f32.xlu1 %v327_v28 }
  0x5d   : > { %331 = vadd.xlane.f32.xlu2 %v330_v29 }
  0x64   : > { %334 = vadd.xlane.f32.xlu0 %v333_v31 }
  0xaf   : > { %v344_v34 = vpop.xlane.xlu1 %343  ;;  %v338_v35 = vpop.xlane.xlu0 %337 }
  0xb0   : > { %vm362_vm1 = vcmp.eq.f32.partialorder %v344_v34, 0.0  ;;  %v458_v37 = vsub.f32 8.0, %v344_v34  ;;  %vm360_vm2 = vcmp.eq.f32.partialorder %v338_v35, 0.0  ;;  %v456_v38 = vsub.f32 8.0, %v338_v35  ;;  %v302_v39 = vpop.xlane.xlu2 %301 }
  0xb1   : > { %v4895_v41 = vsel %vm362_vm1, 1.0, %v9046_v40  ;;  %v4893_v42 = vsel %vm360_vm2, 1.0, %v9046_v40  ;;  %vm348_vm3 = vcmp.eq.f32.partialorder %v302_v39, 0.0  ;;  %v444_v43 = vsub.f32 8.0, %v302_v39 }
  0xb2   : > { %v474_v45 = vmul.f32 %v4895_v41, %v458_v37  ;;  %v472_v46 = vmul.f32 %v4893_v42, %v456_v38  ;;  %v4881_v48 = vsel %vm348_vm3, 1.0, %v9046_v40  ;;  %v426_v51 = vmul.f32 %v4895_v41, %v410_v33 }
  0xb3   : > { %v460_v56 = vmul.f32 %v4881_v48, %v444_v43  ;;  %v424_v60 = vmul.f32 %v4893_v42, %v408_v44  ;;  %v412_v16 = vmul.f32 %v4881_v48, %v396_v47 }
  0xb4   : > { %v5426_v52 = vadd.f32 %v474_v45, %v344_v34  ;;  %v5428_v53 = vadd.f32 %v472_v46, %v338_v35  ;;  %v5445_v5 = vadd.f32 %v426_v51, %v5333_v0 }
  0xb5   : > { %v5448_v10 = vadd.f32 %v460_v56, %v302_v39  ;;  %v5453_v21 = vadd.f32 %v424_v60, %v5336_v1  ;;  %v5469_v38 = vadd.f32 %v412_v16, %v5339_v2 }
  0xb6   : > { %4983 = vrcp.f32 %v5426_v52  ;;  %v697_v63 = vand.u32 2147483647, %v5426_v52  ;;  %v699_v9 = vand.u32 2147483648, %v5426_v52  ;;  %v671_v15 = vand.u32 2147483648, %v5428_v53 }
  0xb7   : > { %4985 = vrcp.f32 %v5428_v53  ;;  %v347_v3 = vpop.xlane.xlu1 %346  ;;  %v341_v11 = vpop.xlane.xlu0 %340  ;;  %vm693_vm5 = vweird.f32 %v5426_v52  ;;  %v669_v22 = vand.u32 2147483647, %v5428_v53  ;;  %vm665_vm8 = vweird.f32 %v5428_v53 }
  0xb8   : > { %vm363_vm4 = vcmp.eq.f32.partialorder %v347_v3, 0.0  ;;  %v459_v17 = vsub.f32 8.0, %v347_v3  ;;  %4987 = vrcp.f32 %v5448_v10  ;;  %vm5457_vm6 = vcmp.eq.f32.partialorder %v697_v63, 8.507059e+37  ;;  %v5462_v28 = vpop.xlane.xlu2 %304 }
  0xb9   : > { %v4896_v23 = vsel %vm363_vm4, 1.0, %v9046_v40  ;;  %vm361_vm7 = vcmp.eq.f32.partialorder %v341_v11, 0.0  ;;  %v457_v27 = vsub.f32 8.0, %v341_v11  ;;  %v700_v31 = vor.u32 1.1754944e-38, %v699_v9 }
  0xba   : > { %v501_v1 = vand.u32 2147483647, %v5448_v10  ;;  %v503_v32 = vand.u32 2147483648, %v5448_v10  ;;  %v475_v33 = vmul.f32 %v4896_v23, %v459_v17  ;;  %v672_v37 = vor.u32 1.1754944e-38, %v671_v15 }
  0xbb   : > { %v4894_v39 = vsel %vm361_vm7, 1.0, %v9046_v40  ;;  %vm5473_vm9 = vcmp.eq.f32.partialorder %v669_v22, 8.507059e+37  ;;  %vm497_vm10 = vweird.f32 %v5448_v10  ;;  %vm349_vm11 = vcmp.eq.f32.partialorder %v5462_v28, 0.0 }
  0xbc   : > { %v4984_v29 = vpop.eup %4983  ;;  %v491_v43 = vadd.f32 %v475_v33, %v347_v3  ;;  %v427_v45 = vmul.f32 %v4896_v23, %v411_v50  ;;  %v473_v46 = vmul.f32 %v4894_v39, %v457_v27  ;;  %vm5479_vm13 = vcmp.eq.f32.partialorder %v501_v1, 8.507059e+37 }
  0xbd   : > { %v4986_v34 = vpop.eup %4985  ;;  %v689_v35 = vmul.f32 %v4984_v29, %v5426_v52  ;;  %vm694_vm12 = vweird.f32 %v4984_v29  ;;  %v504_v51 = vor.u32 1.1754944e-38, %v503_v32  ;;  %v4882_v63 = vsel %vm349_vm11, 1.0, %v9046_v40 }
  0xbe   : > { %v661_v41 = vmul.f32 %v4986_v34, %v5428_v53  ;;  %v4988_v47 = vpop.eup %4987  ;;  %4989 = vrcp.f32 %v491_v43  ;;  %vm666_vm14 = vweird.f32 %v4986_v34  ;;  %vm5487_vm15 = vmor %vm693_vm5, %vm694_vm12  ;;  %v711_v9 = vand.u32 2147483647, %v491_v43 }
  0xbf   : > { %v690_v44 = vsub.f32 1.0, %v689_v35  ;;  %v493_v60 = vmul.f32 %v4988_v47, %v5448_v10  ;;  %v425_v15 = vmul.f32 %v4894_v39, %v409_v54  ;;  %v5493_v16 = vadd.f32 %v473_v46, %v341_v11  ;;  %vm667_vm2 = vmor %vm665_vm8, %vm666_vm14 }
  0xc0   : > { %v662_v2 = vsub.f32 1.0, %v661_v41  ;;  %vm498_vm1 = vweird.f32 %v4988_v47  ;;  %v443_v23 = vadd.f32 %v427_v45, %v5348_v6  ;;  %v713_v1 = vand.u32 2147483648, %v491_v43  ;;  %v308_v41 = vpop.xlane.xlu0 %307 }
  0xc1   : > { %v691_v56 = vmul.f32 %v4984_v29, %v690_v44  ;;  %v494_v22 = vsub.f32 1.0, %v493_v60  ;;  %4991 = vrcp.f32 %v5493_v16  ;;  %v413_v52 = vmul.f32 %v4882_v63, %v397_v55  ;;  %vm5509_vm4 = vmor %vm497_vm10, %vm498_vm1 }
  0xc2   : > { %v663_v50 = vmul.f32 %v4986_v34, %v662_v2  ;;  %vm707_vm3 = vweird.f32 %v491_v43  ;;  %v445_v11 = vsub.f32 8.0, %v5462_v28  ;;  %vm5513_vm5 = vcmp.eq.f32.partialorder %v711_v9, 8.507059e+37 }
  0xc3   : > { %v692_v17 = vadd.f32 %v4984_v29, %v691_v56  ;;  %v495_v54 = vmul.f32 %v4988_v47, %v494_v22  ;;  %v5518_v53 = vadd.f32 %v425_v15, %v5351_v7  ;;  %v714_v44 = vor.u32 1.1754944e-38, %v713_v1 }
  0xc4   : > { %v664_v27 = vadd.f32 %v4986_v34, %v663_v50  ;;  %v4990_v33 = vpop.eup %4989  ;;  %v683_v45 = vand.u32 2147483647, %v5493_v16  ;;  %v461_v46 = vmul.f32 %v4882_v63, %v445_v11  ;;  %v685_v7 = vand.u32 2147483648, %v5493_v16 }
  0xc5   : > { %v696_v32 = vsel %vm5487_vm15, %v4984_v29, %v692_v17  ;;  %vm350_vm7 = vcmp.eq.f32.partialorder %v308_v41, 0.0  ;;  %v446_v1 = vsub.f32 8.0, %v308_v41 }
  0xc6   : > { %v701_v6 = vsel %vm5457_vm6, %v700_v31, %v696_v32  ;;  %v668_v35 = vsel %vm667_vm2, %v4986_v34, %v664_v27  ;;  %v496_v31 = vadd.f32 %v4988_v47, %v495_v54  ;;  %v703_v34 = vmul.f32 %v4990_v33, %v491_v43  ;;  %v311_v43 = vpop.xlane.xlu1 %310 }
  0xc7   : > { %v730_v39 = vmul.f32 %v701_v6, %v5445_v5  ;;  %v673_v0 = vsel %vm5473_vm9, %v672_v37, %v668_v35  ;;  %vm708_vm6 = vweird.f32 %v4990_v33  ;;  %v4992_v5 = vpop.eup %4991  ;;  %vm679_vm9 = vweird.f32 %v5493_v16  ;;  %v314_v6 = vpop.xlane.xlu2 %313 }
  0xc8   : > { %v728_v10 = vmul.f32 %v673_v0, %v5453_v21  ;;  %v500_v2 = vsel %vm5509_vm4, %v4988_v47, %v496_v31  ;;  %v704_v56 = vsub.f32 1.0, %v703_v34  ;;  %v477_v21 = vadd.f32 %v461_v46, %v5462_v28  ;;  %vm5540_vm8 = vmor %vm707_vm3, %vm708_vm6 }
  0xc9   : > { %v5529_v42 = vsel %vm299_vm0, %v730_v39, 0  ;;  %v505_v37 = vsel %vm5479_vm13, %v504_v51, %v500_v2  ;;  %v675_v3 = vmul.f32 %v4992_v5, %v5493_v16  ;;  %vm5545_vm10 = vcmp.eq.f32.partialorder %v683_v45, 8.507059e+37 }
  0xca   : > { %v5535_v60 = vsel %vm299_vm0, %v728_v10, 0  ;;  %v716_v63 = vmul.f32 %v505_v37, %v5469_v38  ;;  %v705_v47 = vmul.f32 %v4990_v33, %v704_v56  ;;  %v5550_v28 = vadd.f32 %v413_v52, %v5354_v8 }
  0xcb   : > { %4993 = vrcp.f32 %v477_v21  ;;  %v676_v38 = vsub.f32 1.0, %v675_v3  ;;  %v686_v9 = vor.u32 1.1754944e-38, %v685_v7  ;;  %v4883_v15 = vsel %vm350_vm7, 1.0, %v9046_v40 }
  0xcc   : > { %v706_v51 = vadd.f32 %v4990_v33, %v705_v47  ;;  %v5554_v17 = vand.u32 4294901760, %v5529_v42  ;;  %v5557_v22 = vand.u32 4294901760, %v5535_v60  ;;  %v735_v27 = vsel %vm299_vm0, %v716_v63, 0 }
  0xcd   : > { %v677_v52 = vmul.f32 %v4992_v5, %v676_v38  ;;  %vm680_vm11 = vweird.f32 %v4992_v5  ;;  %vm511_vm12 = vweird.f32 %v477_v21  ;;  %v515_v54 = vand.u32 2147483647, %v477_v21 }
  0xce   : > { %9221 = vst [vmem:[#allocation12_spill] sm:$0xff] %v5554_v17  ;;  %v710_v8 = vsel %vm5540_vm8, %v4990_v33, %v706_v51  ;;  %v462_v11 = vmul.f32 %v4883_v15, %v446_v1  ;;  %vm351_vm13 = vcmp.eq.f32.partialorder %v311_v43, 0.0  ;;  %v5564_v35 = vand.u32 4294901760, %v735_v27  ;;  %vm681_vm14 = vmor %vm679_vm9, %vm680_vm11  ;;  %v320_v63 = vpop.xlane.xlu1 %319 }
  0xcf   : > { %9222 = vst [vmem:[#allocation13_spill] sm:$0xff] %v5557_v22  ;;  %v715_v32 = vsel %vm5513_vm5, %v714_v44, %v710_v8  ;;  %v678_v39 = vadd.f32 %v4992_v5, %v677_v52  ;;  %v517_v0 = vand.u32 2147483648, %v477_v21  ;;  %v414_v33 = vmul.f32 %v4883_v15, %v398_v58 }
  0xd0   : > { %v731_v55 = vmul.f32 %v715_v32, %v443_v23  ;;  %v5570_v34 = vadd.f32 %v462_v11, %v308_v41  ;;  %v447_v29 = vsub.f32 8.0, %v311_v43  ;;  %v946_v10 = vsub.f32 %v5423_v49, %v945_v57  ;;  %v317_v32 = vpop.xlane.xlu0 %316 }
  0xd1   : > { %v4994_v31 = vpop.eup %4993  ;;  %v682_v44 = vsel %vm681_vm14, %v4992_v5, %v678_v39  ;;  %v4884_v23 = vsel %vm351_vm13, 1.0, %v9046_v40  ;;  %vm352_vm15 = vcmp.eq.f32.partialorder %v314_v6, 0.0  ;;  %v448_v16 = vsub.f32 8.0, %v314_v6 }
  0xd2   : > { %v507_v45 = vmul.f32 %v4994_v31, %v477_v21  ;;  %v687_v46 = vsel %vm5545_vm10, %v686_v9, %v682_v44  ;;  %4995 = vrcp.f32 %v5570_v34  ;;  %v415_v58 = vmul.f32 %v4884_v23, %v399_v59 }
  0xd3   : > { %v5582_v41 = vsel %vm299_vm0, %v731_v55, 0  ;;  %v729_v2 = vmul.f32 %v687_v46, %v5518_v53  ;;  %vm512_vm1 = vweird.f32 %v4994_v31  ;;  %v529_v57 = vand.u32 2147483647, %v5570_v34 }
  0xd4   : > { %v508_v49 = vsub.f32 1.0, %v507_v45  ;;  %v463_v56 = vmul.f32 %v4884_v23, %v447_v29  ;;  %v947_v7 = vand.u32 4294901760, %v946_v10  ;;  %v4885_v5 = vsel %vm352_vm15, 1.0, %v9046_v40  ;;  %vm5599_vm3 = vmor %vm511_vm12, %vm512_vm1 }
  0xd5   : > { %vm5587_vm2 = vcmp.eq.f32.partialorder %v515_v54, 8.507059e+37  ;;  %v518_v59 = vor.u32 1.1754944e-38, %v517_v0  ;;  %v5592_v47 = vadd.f32 %v414_v33, %v5363_v12  ;;  %v5595_v3 = vand.u32 4294901760, %v5582_v41 }
  0xd6   : > { %v509_v37 = vmul.f32 %v4994_v31, %v508_v49  ;;  %v774_v53 = vsel %vm299_vm0, %v729_v2, 0  ;;  %v5603_v48 = vadd.f32 %v463_v56, %v311_v43  ;;  %948 = vmatpush.msra.mxu1 %v947_v7  ;;  %4918 = vmatpush.msra.mxu3 %v947_v7  ;;  %v464_v51 = vmul.f32 %v4885_v5, %v448_v16 }
  0xd7   : > { %9225 = vst [vmem:[#allocation14_spill] sm:$0xff] %v5595_v3  ;;  %vm525_vm4 = vweird.f32 %v5570_v34  ;;  %950 = vmatmul.f32.vlgmr.msra.gmra.mxu1 %v5564_v35  ;;  %998 = vmatmul.f32.vlgmr.msra.gmra.mxu3 %v5557_v22  ;;  %v5609_v12 = vsub.f32 %v735_v27, %v5564_v35  ;;  %v5613_v21 = vsub.f32 %v5535_v60, %v5557_v22  ;;  %vm5615_vm5 = vcmp.eq.f32.partialorder %v529_v57, 8.507059e+37 }
  0xd8   : > { %v510_v38 = vadd.f32 %v4994_v31, %v509_v37  ;;  %v4996_v9 = vpop.eup %4995  ;;  %v531_v43 = vand.u32 2147483648, %v5570_v34  ;;  %v5621_v1 = vadd.f32 %v415_v58, %v5366_v13  ;;  %4997 = vrcp.f32 %v5603_v48  ;;  %1129 = vmatpush.msrb.mxu3 %v5413_v36  ;;  %1327 = vmatpush.msrb.mxu1 %v5413_v36 }
  0xd9   : > { %9228 = vst [vmem:[#allocation15_spill] sm:$0xff] %v5609_v12  ;;  %v5626_v27 = vand.u32 4294901760, %v774_v53  ;;  %v521_v8 = vmul.f32 %v4996_v9, %v5570_v34  ;;  %v543_v52 = vand.u32 2147483647, %v5603_v48  ;;  %vm526_vm6 = vweird.f32 %v4996_v9 }
  0xda   : > { %9229 = vst [vmem:[#allocation16_spill] sm:$0xff] %v5613_v21  ;;  %v514_v60 = vsel %vm5599_vm3, %v4994_v31, %v510_v38  ;;  %v545_v54 = vand.u32 2147483648, %v5603_v48  ;;  %v5635_v11 = vadd.f32 %v464_v51, %v314_v6  ;;  %v5639_v39 = vand.u32 4294901760, %v5609_v12  ;;  %vm5657_vm8 = vmor %vm525_vm4, %vm526_vm6 }
  0xdb   : > { %9232 = vst [vmem:[#allocation17_spill] sm:$0xff] %v5626_v27  ;;  %v519_v13 = vsel %vm5587_vm2, %v518_v59, %v514_v60  ;;  %v522_v55 = vsub.f32 1.0, %v521_v8  ;;  %v5642_v0 = vand.u32 4294901760, %v5613_v21  ;;  %v532_v31 = vor.u32 1.1754944e-38, %v531_v43 }
  0xdc   : > { %v717_v36 = vmul.f32 %v519_v13, %v5550_v28  ;;  %9233 = vst [vmem:[#allocation18_spill] sm:$0xff] %v5639_v39  ;;  %v416_v33 = vmul.f32 %v4885_v5, %v400_v61  ;;  %4999 = vrcp.f32 %v5635_v11  ;;  %vm353_vm7 = vcmp.eq.f32.partialorder %v317_v32, 0.0 }
  0xdd   : > { %9234 = vst [vmem:[#allocation19_spill] sm:$0xff] %v5642_v0  ;;  %v523_v6 = vmul.f32 %v4996_v9, %v522_v55  ;;  %v802_v28 = vsub.f32 %v5609_v12, %v5639_v39  ;;  %v898_v10 = vsub.f32 %v5613_v21, %v5642_v0  ;;  %vm539_vm9 = vweird.f32 %v5603_v48 }
  0xde   : > { %v738_v29 = vsel %vm299_vm0, %v717_v36, 0  ;;  %v4998_v44 = vpop.eup %4997  ;;  %vm5662_vm10 = vcmp.eq.f32.partialorder %v543_v52, 8.507059e+37  ;;  %v546_v46 = vor.u32 1.1754944e-38, %v545_v54  ;;  %v4886_v34 = vsel %vm353_vm7, 1.0, %v9046_v40 }
  0xdf   : > { %v5652_v45 = vand.u32 4294901760, %v738_v29  ;;  %v524_v58 = vadd.f32 %v4996_v9, %v523_v6  ;;  %v535_v16 = vmul.f32 %v4998_v44, %v5603_v48  ;;  %v5667_v2 = vand.u32 4294901760, %v802_v28  ;;  %1002 = vmatmul.f32.gmra.mxu3 %v5626_v27 }
  0xe0   : > { %vm553_vm11 = vweird.f32 %v5635_v11  ;;  %v5672_v49 = vand.u32 4294901760, %v898_v10  ;;  %v449_v57 = vsub.f32 8.0, %v317_v32  ;;  %vm540_vm12 = vweird.f32 %v4998_v44 }
  0xe1   : > { %954 = vmatmul.f32.gmra.mxu1 %v5652_v45  ;;  %v5676_v56 = vsub.f32 %v738_v29, %v5652_v45  ;;  %v528_v7 = vsel %vm5657_vm8, %v4996_v9, %v524_v58  ;;  %v536_v5 = vsub.f32 1.0, %v535_v16  ;;  %804 = vmatmul.f32.vlgmr.msra.gmra.mxu0 %v5667_v2  ;;  %v5682_v37 = vsub.f32 %v774_v53, %v5626_v27  ;;  %vm5696_vm13 = vmor %vm539_vm9, %vm540_vm12  ;;  %v323_v16 = vpop.xlane.xlu2 %322 }
  0xe2   : > { %9239 = vst [vmem:[#allocation20_spill] sm:$0xff] %v5672_v49  ;;  %v5000_v59 = vpop.eup %4999  ;;  %v533_v50 = vsel %vm5615_vm5, %v532_v31, %v528_v7  ;;  %v557_v51 = vand.u32 2147483647, %v5635_v11  ;;  %900 = vmatmul.f32.vlgmr.msra.gmra.mxu2 %v5672_v49  ;;  %v465_v38 = vmul.f32 %v4886_v34, %v449_v57  ;;  %v559_v53 = vand.u32 2147483648, %v5635_v11 }
  0xe3   : > { %9240 = vst [vmem:[#allocation21_spill] sm:$0xff] %v5682_v37  ;;  %v5689_v43 = vand.u32 4294901760, %v5676_v56  ;;  %v718_v9 = vmul.f32 %v533_v50, %v5592_v47  ;;  %v537_v60 = vmul.f32 %v4998_v44, %v536_v5  ;;  %v549_v8 = vmul.f32 %v5000_v59, %v5635_v11 }
  0xe4   : > { %v5700_v52 = vadd.f32 %v465_v38, %v317_v32  ;;  %v5705_v54 = vand.u32 4294901760, %v5682_v37  ;;  %vm354_vm14 = vcmp.eq.f32.partialorder %v320_v63, 0.0  ;;  %vm554_vm15 = vweird.f32 %v5000_v59 }
  0xe5   : > { %9241 = vst [vmem:[#allocation22_spill] sm:$0xff] %v5689_v43  ;;  %v810_v13 = vsub.f32 %v5676_v56, %v5689_v43  ;;  %v741_v47 = vsel %vm299_vm0, %v718_v9, 0  ;;  %v538_v36 = vadd.f32 %v4998_v44, %v537_v60  ;;  %v550_v55 = vsub.f32 1.0, %v549_v8  ;;  %vm5725_vm2 = vmor %vm553_vm11, %vm554_vm15 }
  0xe6   : > { %9244 = vst [vmem:[#allocation23_spill] sm:$0xff] %v5705_v54  ;;  %v5708_v31 = vand.u32 4294901760, %v741_v47  ;;  %v432_v48 = vadd.f32 %v416_v33, %v5369_v14  ;;  %vm5711_vm1 = vcmp.eq.f32.partialorder %v557_v51, 8.507059e+37  ;;  %5001 = vrcp.f32 %v5700_v52 }
  0xe7   : > { %v542_v32 = vsel %vm5696_vm13, %v4998_v44, %v538_v36  ;;  %v551_v6 = vmul.f32 %v5000_v59, %v550_v55  ;;  %v560_v28 = vor.u32 1.1754944e-38, %v559_v53  ;;  %v5718_v10 = vand.u32 4294901760, %v810_v13  ;;  %1006 = vmatmul.f32.gmra.mxu3 %v5554_v17 }
  0xe8   : > { %v547_v61 = vsel %vm5662_vm10, %v546_v46, %v542_v32  ;;  %v417_v33 = vmul.f32 %v4886_v34, %v401_v62  ;;  %v906_v44 = vsub.f32 %v5682_v37, %v5705_v54  ;;  %v4887_v58 = vsel %vm354_vm14, 1.0, %v9046_v40 }
  0xe9   : > { %958 = vmatmul.f32.gmra.mxu1 %v5708_v31  ;;  %v719_v23 = vmul.f32 %v547_v61, %v5621_v1  ;;  %v552_v46 = vadd.f32 %v5000_v59, %v551_v6  ;;  %vm567_vm3 = vweird.f32 %v5700_v52  ;;  %812 = vmatmul.f32.gmra.mxu0 %v5718_v10  ;;  %v450_v11 = vsub.f32 8.0, %v320_v63 }
  0xea   : > { %v571_v57 = vand.u32 2147483647, %v5700_v52  ;;  %v5740_v62 = vand.u32 4294901760, %v906_v44  ;;  %v5743_v34 = vsub.f32 %v741_v47, %v5708_v31  ;;  %v5747_v7 = vsub.f32 %v5529_v42, %v5554_v17 }
  0xeb   : > { %v744_v5 = vsel %vm299_vm0, %v719_v23, 0  ;;  %v556_v1 = vsel %vm5725_vm2, %v5000_v59, %v552_v46  ;;  %v466_v50 = vmul.f32 %v4887_v58, %v450_v11  ;;  %vm355_vm4 = vcmp.eq.f32.partialorder %v323_v16, 0.0 }
  0xec   : > { %9249 = vst [vmem:[#allocation24_spill] sm:$0xff] %v5740_v62  ;;  %v5002_v51 = vpop.eup %5001  ;;  %v5752_v38 = vand.u32 4294901760, %v744_v5  ;;  %v561_v9 = vsel %vm5711_vm1, %v560_v28, %v556_v1  ;;  %908 = vmatmul.f32.gmra.mxu2 %v5740_v62  ;;  %v5758_v60 = vand.u32 4294901760, %v5743_v34  ;;  %v5761_v42 = vand.u32 4294901760, %v5747_v7  ;;  %v326_v28 = vpop.xlane.xlu0 %325 }
  0xed   : > { %9250 = vst [vmem:[#allocation25_spill] sm:$0xff] %v5747_v7  ;;  %v720_v8 = vmul.f32 %v561_v9, %v432_v48  ;;  %v563_v53 = vmul.f32 %v5002_v51, %v5700_v52  ;;  %v573_v59 = vand.u32 2147483648, %v5700_v52  ;;  %v5765_v15 = vadd.f32 %v466_v50, %v320_v63 }
  0xee   : > { %9251 = vst [vmem:[#allocation26_spill] sm:$0xff] %v5758_v60  ;;  %v818_v13 = vsub.f32 %v5743_v34, %v5758_v60  ;;  %v914_v47 = vsub.f32 %v5747_v7, %v5761_v42  ;;  %v4888_v36 = vsel %vm355_vm4, 1.0, %v9046_v40  ;;  %v451_v55 = vsub.f32 8.0, %v323_v16 }
  0xef   : > { %9252 = vst [vmem:[#allocation27_spill] sm:$0xff] %v5761_v42  ;;  %v747_v29 = vsel %vm299_vm0, %v720_v8, 0  ;;  %v564_v32 = vsub.f32 1.0, %v563_v53  ;;  %vm568_vm5 = vweird.f32 %v5002_v51  ;;  %5003 = vrcp.f32 %v5765_v15  ;;  %1010 = vmatmul.f32.gmra.mxu3 %v5595_v3 }
  0xf0   : > { %v403_v63 = vsub.f32 1.0, %v5384_v20  ;;  %v433_v48 = vadd.f32 %v417_v33, %v5378_v18  ;;  %v5777_v6 = vand.u32 4294901760, %v818_v13  ;;  %v5780_v61 = vand.u32 4294901760, %v747_v29  ;;  %vm5786_vm6 = vmor %vm567_vm3, %vm568_vm5 }
  0xf1   : > { %962 = vmatmul.f32.gmra.mxu1 %v5752_v38  ;;  %v565_v14 = vmul.f32 %v5002_v51, %v564_v32  ;;  %v418_v44 = vmul.f32 %v4887_v58, %v402_v4  ;;  %v467_v23 = vmul.f32 %v4888_v36, %v451_v55  ;;  %v574_v11 = vor.u32 1.1754944e-38, %v573_v59 }
  0xf2   : > { %820 = vmatmul.f32.gmra.mxu0 %v5777_v6  ;;  %v5791_v18 = vand.u32 4294901760, %v914_v47  ;;  %v5794_v33 = vsub.f32 %v744_v5, %v5752_v38  ;;  %v5798_v1 = vsub.f32 %v5582_v41, %v5595_v3  ;;  %vm572_vm7 = vcmp.eq.f32.partialorder %v571_v57, 8.507059e+37 }
  0xf3   : > { %v566_v4 = vadd.f32 %v5002_v51, %v565_v14  ;;  %v5800_v58 = vadd.f32 %v467_v23, %v323_v16  ;;  %vm356_vm8 = vcmp.eq.f32.partialorder %v326_v28, 0.0  ;;  %v452_v5 = vsub.f32 8.0, %v326_v28 }
  0xf4   : > { %9255 = vst [vmem:[#allocation28_spill] sm:$0xff] %v5791_v18  ;;  %916 = vmatmul.f32.gmra.mxu2 %v5791_v18  ;;  %v5805_v50 = vand.u32 4294901760, %v5794_v33  ;;  %v5808_v9 = vand.u32 4294901760, %v5798_v1  ;;  %v4889_v16 = vsel %vm356_vm8, 1.0, %v9046_v40  ;;  %v5815_v57 = vsub.f32 %v747_v29, %v5780_v61 }
  0xf5   : > { %9256 = vst [vmem:[#allocation29_spill] sm:$0xff] %v5798_v1  ;;  %v5004_v8 = vpop.eup %5003  ;;  %v570_v41 = vsel %vm5786_vm6, %v5002_v51, %v566_v4  ;;  %5005 = vrcp.f32 %v5800_v58  ;;  %v434_v59 = vadd.f32 %v418_v44, %v5381_v19  ;;  %v585_v47 = vand.u32 2147483647, %v5765_v15  ;;  %v329_v44 = vpop.xlane.xlu1 %328 }
  0xf6   : > { %9257 = vst [vmem:[#allocation30_spill] sm:$0xff] %v5808_v9  ;;  %v575_v53 = vsel %vm572_vm7, %v574_v11, %v570_v41  ;;  %v577_v13 = vmul.f32 %v5004_v8, %v5765_v15  ;;  %v587_v32 = vand.u32 2147483648, %v5765_v15  ;;  %v826_v51 = vsub.f32 %v5794_v33, %v5805_v50 }
  0xf7   : > { %v721_v55 = vmul.f32 %v575_v53, %v433_v48  ;;  %v922_v14 = vsub.f32 %v5798_v1, %v5808_v9  ;;  %1133 = vmatmul.f32.vlgmr.msrb.gmra.mxu3 %v5639_v39  ;;  %vm581_vm9 = vweird.f32 %v5765_v15  ;;  %vm582_vm10 = vweird.f32 %v5004_v8 }
  0xf8   : > { %v578_v29 = vsub.f32 1.0, %v577_v13  ;;  %v468_v19 = vmul.f32 %v4889_v16, %v452_v5  ;;  %v419_v23 = vmul.f32 %v4888_v36, %v403_v63  ;;  %v5829_v46 = vand.u32 4294901760, %v826_v51  ;;  %vm5840_vm11 = vmor %vm581_vm9, %vm582_vm10 }
  0xf9   : > { %966 = vmatmul.f32.gmra.mxu1 %v5780_v61  ;;  %v750_v48 = vsel %vm299_vm0, %v721_v55, 0  ;;  %v5832_v11 = vand.u32 4294901760, %v5815_v57  ;;  %v5836_v53 = vand.u32 4294901760, %v922_v14  ;;  %vm5844_vm12 = vcmp.eq.f32.partialorder %v585_v47, 8.507059e+37  ;;  %v332_v14 = vpop.xlane.xlu2 %331 }
  0xfa   : > { %v5834_v4 = vand.u32 4294901760, %v750_v48  ;;  %v579_v41 = vmul.f32 %v5004_v8, %v578_v29  ;;  %v5838_v13 = vadd.f32 %v468_v19, %v326_v28  ;;  %v588_v36 = vor.u32 1.1754944e-38, %v587_v32  ;;  %828 = vmatmul.f32.gmra.mxu0 %v5829_v46 }
  0xfb   : > { %9258 = vst [vmem:[#allocation31_spill] sm:$0xff] %v5836_v53  ;;  %v5006_v15 = vpop.eup %5005  ;;  %v834_v63 = vsub.f32 %v5815_v57, %v5832_v11  ;;  %vm357_vm13 = vcmp.eq.f32.partialorder %v329_v44, 0.0  ;;  %v453_v51 = vsub.f32 8.0, %v329_v44  ;;  %vm595_vm14 = vweird.f32 %v5800_v58 }
  0xfc   : > { %v580_v55 = vadd.f32 %v5004_v8, %v579_v41  ;;  %v591_v28 = vmul.f32 %v5006_v15, %v5800_v58  ;;  %924 = vmatmul.f32.gmra.mxu2 %v5836_v53  ;;  %5007 = vrcp.f32 %v5838_v13  ;;  %vm596_vm15 = vweird.f32 %v5006_v15 }
  0xfd   : > { %v599_v47 = vand.u32 2147483647, %v5800_v58  ;;  %v601_v32 = vand.u32 2147483648, %v5800_v58  ;;  %v4890_v41 = vsel %vm357_vm13, 1.0, %v9046_v40  ;;  %v5861_v18 = vsub.f32 %v750_v48, %v5834_v4  ;;  %vm5876_vm2 = vmor %vm595_vm14, %vm596_vm15 }
  0xfe   : > { %v584_v29 = vsel %vm5840_vm11, %v5004_v8, %v580_v55  ;;  %v592_v19 = vsub.f32 1.0, %v591_v28  ;;  %v5865_v62 = vand.u32 4294901760, %v834_v63  ;;  %vm358_vm1 = vcmp.eq.f32.partialorder %v332_v14, 0.0 }
  0xff   : > { %v589_v53 = vsel %vm5844_vm12, %v588_v36, %v584_v29  ;;  %1139 = vmatmul.f32.gmra.mxu3 %v5689_v43  ;;  %v469_v52 = vmul.f32 %v4890_v41, %v453_v51  ;;  %v5870_v8 = vand.u32 4294901760, %v5861_v18  ;;  %v435_v55 = vadd.f32 %v419_v23, %v5384_v20 }
 0x100   : > { %v722_v49 = vmul.f32 %v589_v53, %v434_v59  ;;  %v593_v39 = vmul.f32 %v5006_v15, %v592_v19  ;;  %vm5880_vm3 = vcmp.eq.f32.partialorder %v599_v47, 8.507059e+37  ;;  %v602_v59 = vor.u32 1.1754944e-38, %v601_v32 }
 0x101   : > { %970 = vmatmul.f32.gmra.mxu1 %v5834_v4  ;;  %v9267_v53 = vsub.f32 1.0, %v5393_v24  ;;  %v5887_v20 = vadd.f32 %v469_v52, %v329_v44  ;;  %v454_v23 = vsub.f32 8.0, %v332_v14  ;;  %v842_v47 = vsub.f32 %v5861_v18, %v5870_v8 }
 0x102   : > { %v5008_v63 = vpop.eup %5007  ;;  %v753_v28 = vsel %vm299_vm0, %v722_v49, 0  ;;  %v594_v51 = vadd.f32 %v5006_v15, %v593_v39  ;;  %836 = vmatmul.f32.gmra.mxu0 %v5865_v62  ;;  %v4891_v32 = vsel %vm358_vm1, 1.0, %v9046_v40  ;;  %vm609_vm4 = vweird.f32 %v5838_v13  ;;  %v335_v49 = vpop.xlane.xlu0 %334 }
 0x103   : > { %v420_v36 = vmul.f32 %v4889_v16, %v9267_v53  ;;  %v5889_v58 = vand.u32 4294901760, %v753_v28  ;;  %v605_v29 = vmul.f32 %v5008_v63, %v5838_v13  ;;  %v615_v39 = vand.u32 2147483648, %v5838_v13 }
 0x104   : > { %v598_v16 = vsel %vm5876_vm2, %v5006_v15, %v594_v51  ;;  %1034 = vmatmul.f32.vlgmr.msrb.gmra.mxu2 %v5609_v12  ;;  %5009 = vrcp.f32 %v5887_v20  ;;  %vm610_vm5 = vweird.f32 %v5008_v63  ;;  %v613_v52 = vand.u32 2147483647, %v5838_v13 }
 0x105   : > { %v603_v44 = vsel %vm5880_vm3, %v602_v59, %v598_v16  ;;  %v606_v19 = vsub.f32 1.0, %v605_v29  ;;  %v405_v53 = vsub.f32 1.0, %v5396_v25  ;;  %v470_v15 = vmul.f32 %v4891_v32, %v454_v23  ;;  %vm5917_vm7 = vmor %vm609_vm4, %vm610_vm5 }
 0x106   : > { %v723_v48 = vmul.f32 %v603_v44, %v435_v55  ;;  %v5907_v40 = vand.u32 4294901760, %v842_v47  ;;  %v5911_v12 = vsub.f32 %v753_v28, %v5889_v58  ;;  %vm359_vm6 = vcmp.eq.f32.partialorder %v335_v49, 0.0 }
 0x107   : > { %v607_v51 = vmul.f32 %v5008_v63, %v606_v19  ;;  %1145 = vmatmul.f32.gmra.mxu3 %v5758_v60  ;;  %v436_v59 = vadd.f32 %v420_v36, %v5393_v24  ;;  %v616_v55 = vor.u32 1.1754944e-38, %v615_v39  ;;  %v486_v23 = vadd.f32 %v470_v15, %v332_v14 }
 0x108   : > { %9268 = vst [vmem:[#allocation32_spill] sm:$0xff] %v5907_v40  ;;  %v756_v5 = vsel %vm299_vm0, %v723_v48, 0  ;;  %vm614_vm8 = vcmp.eq.f32.partialorder %v613_v52, 8.507059e+37  ;;  %v5923_v28 = vand.u32 4294901760, %v5911_v12  ;;  %v455_v16 = vsub.f32 8.0, %v335_v49 }
 0x109   : > { %974 = vmatmul.f32.gmra.mxu1 %v5889_v58  ;;  %v608_v47 = vadd.f32 %v5008_v63, %v607_v51  ;;  %v5925_v19 = vand.u32 4294901760, %v756_v5  ;;  %v421_v24 = vmul.f32 %v4890_v41, %v405_v53  ;;  %5011 = vrcp.f32 %v486_v23 }
 0x10a   : > { %v5010_v44 = vpop.eup %5009  ;;  %v9271_v13 = vmov 0.0   ;;  %v406_v48 = vsub.f32 1.0, %v5399_v26  ;;  %844 = vmatmul.f32.gmra.mxu0 %v5907_v40  ;;  %v850_v52 = vsub.f32 %v5911_v12, %v5923_v28  ;;  %vm623_vm9 = vweird.f32 %v5887_v20 }
 0x10b   : > { %v4892_v36 = vsel %vm359_vm6, 1.0, %v9271_v13  ;;  %v612_v39 = vsel %vm5917_vm7, %v5008_v63, %v608_v47  ;;  %v619_v14 = vmul.f32 %v5010_v44, %v5887_v20  ;;  %v627_v41 = vand.u32 2147483647, %v5887_v20 }
 0x10c   : > { %v617_v15 = vsel %vm614_vm8, %v616_v55, %v612_v39  ;;  %v629_v53 = vand.u32 2147483648, %v5887_v20  ;;  %1039 = vmatmul.f32.gmra.mxu2 %v5676_v56  ;;  %vm624_vm10 = vweird.f32 %v5010_v44  ;;  %v471_v63 = vmul.f32 %v4892_v36, %v455_v16 }
 0x10d   : > { %v724_v51 = vmul.f32 %v617_v15, %v436_v59  ;;  %v620_v13 = vsub.f32 1.0, %v619_v14  ;;  %v437_v29 = vadd.f32 %v421_v24, %v5396_v25  ;;  %v5941_v47 = vsub.f32 %v756_v5, %v5925_v19  ;;  %vm5951_vm11 = vmor %vm623_vm9, %vm624_vm10 }
 0x10e   : > { %v5944_v39 = vand.u32 4294901760, %v850_v52  ;;  %v487_v43 = vadd.f32 %v471_v63, %v335_v49  ;;  %v630_v25 = vor.u32 1.1754944e-38, %v629_v53  ;;  %v422_v5 = vmul.f32 %v4891_v32, %v406_v48 }
 0x10f   : > { %v759_v60 = vsel %vm299_vm0, %v724_v51, 0  ;;  %v621_v55 = vmul.f32 %v5010_v44, %v620_v13  ;;  %1151 = vmatmul.f32.gmra.mxu3 %v5805_v50  ;;  %v5012_v3 = vpop.eup %5011  ;;  %v5957_v16 = vand.u32 4294901760, %v5941_v47  ;;  %vm628_vm12 = vcmp.eq.f32.partialorder %v627_v41, 8.507059e+37 }
 0x110   : > { %v5947_v40 = vand.u32 4294901760, %v759_v60  ;;  %v633_v14 = vmul.f32 %v5012_v3, %v486_v23  ;;  %5013 = vrcp.f32 %v487_v43  ;;  %vm637_vm13 = vweird.f32 %v486_v23 }
 0x111   : > { %978 = vmatmul.f32.gmra.mxu1 %v5925_v19  ;;  %v622_v24 = vadd.f32 %v5010_v44, %v621_v55  ;;  %vm638_vm14 = vweird.f32 %v5012_v3  ;;  %v641_v49 = vand.u32 2147483647, %v486_v23  ;;  %v643_v52 = vand.u32 2147483648, %v486_v23 }
 0x112   : > { %v634_v15 = vsub.f32 1.0, %v633_v14  ;;  %852 = vmatmul.f32.gmra.mxu0 %v5944_v39  ;;  %v858_v32 = vsub.f32 %v5941_v47, %v5957_v16  ;;  %v5965_v48 = vsub.f32 %v759_v60, %v5947_v40  ;;  %v407_v41 = vsub.f32 1.0, %v5408_v30  ;;  %vm5971_vm15 = vmor %vm637_vm13, %vm638_vm14 }
 0x113   : > { %v626_v20 = vsel %vm5951_vm11, %v5010_v44, %v622_v24  ;;  %v438_v63 = vadd.f32 %v422_v5, %v5399_v26  ;;  %vm642_vm1 = vcmp.eq.f32.partialorder %v641_v49, 8.507059e+37  ;;  %v644_v55 = vor.u32 1.1754944e-38, %v643_v52 }
 0x114   : > { %9274 = vst [vmem:[#allocation33_spill] sm:$0xff] %v5965_v48  ;;  %v631_v53 = vsel %vm628_vm12, %v630_v25, %v626_v20  ;;  %1044 = vmatmul.f32.gmra.mxu2 %v5743_v34  ;;  %v635_v13 = vmul.f32 %v5012_v3, %v634_v15  ;;  %v5976_v25 = vand.u32 4294901760, %v858_v32  ;;  %v5980_v30 = vand.u32 4294901760, %v5965_v48 }
 0x115   : > { %v725_v51 = vmul.f32 %v631_v53, %v437_v29  ;;  %v423_v5 = vmul.f32 %v4892_v36, %v407_v41  ;;  %vm651_vm2 = vweird.f32 %v487_v43  ;;  %v657_v14 = vand.u32 2147483648, %v487_v43  ;;  %v5047_v41 = vld [vmem:[%s5330_s9 + $0x58] sm:$0xff] }
 0x116   : > { %v5014_v59 = vpop.eup %5013  ;;  %v636_v24 = vadd.f32 %v5012_v3, %v635_v13  ;;  %v655_v20 = vand.u32 2147483647, %v487_v43  ;;  %v866_v32 = vsub.f32 %v5965_v48, %v5980_v30 }
 0x117   : > { %v762_v60 = vsel %vm299_vm0, %v725_v51, 0  ;;  %1157 = vmatmul.f32.gmra.mxu3 %v5832_v11  ;;  %v647_v26 = vmul.f32 %v5014_v59, %v487_v43  ;;  %vm652_vm3 = vweird.f32 %v5014_v59  ;;  %v658_v36 = vor.u32 1.1754944e-38, %v657_v14 }
 0x118   : > { %v5982_v29 = vand.u32 4294901760, %v762_v60  ;;  %v640_v23 = vsel %vm5971_vm15, %v5012_v3, %v636_v24  ;;  %vm653_vm4 = vmor %vm651_vm2, %vm652_vm3  ;;  %v439_v13 = vadd.f32 %v5047_v41, %v423_v5  ;;  %vm656_vm5 = vcmp.eq.f32.partialorder %v655_v20, 8.507059e+37 }
 0x119   : > { %982 = vmatmul.f32.gmra.mxu1 %v5947_v40  ;;  %v645_v49 = vsel %vm642_vm1, %v644_v55, %v640_v23  ;;  %v648_v52 = vsub.f32 1.0, %v647_v26 }
 0x11a   : > { %v726_v15 = vmul.f32 %v645_v49, %v438_v63  ;;  %860 = vmatmul.f32.gmra.mxu0 %v5976_v25  ;;  %v5991_v53 = vsub.f32 %v762_v60, %v5982_v29  ;;  %v5998_v63 = vand.u32 4294901760, %v866_v32  ;;  %v733_v49 = vld [vmem:[#allocation5 + $0x8] sm:$0xff] }
 0x11b   : > { %v649_v51 = vmul.f32 %v5014_v59, %v648_v52  ;;  %v1408_v52 = vand.u32 4294901760, %v733_v49 }
 0x11c   : > { %9277 = vst [vmem:[#allocation34_spill] sm:$0xff] %v5991_v53  ;;  %1049 = vmatmul.f32.gmra.mxu2 %v5794_v33  ;;  %v765_v3 = vsel %vm299_vm0, %v726_v15, 0  ;;  %v6002_v55 = vand.u32 4294901760, %v5991_v53 }
 0x11d   : > { %v650_v44 = vadd.f32 %v5014_v59, %v649_v51  ;;  %v5996_v43 = vand.u32 4294901760, %v765_v3  ;;  %1409 = vmatpush.msra.mxu2 %v1408_v52  ;;  %v1555_v32 = vsub.f32 %v733_v49, %v1408_v52  ;;  %1740 = vmatpush.msra.mxu1 %v1408_v52 }
 0x11e   : > { %9279 = vst [vmem:[#allocation36_spill] sm:$0xff] %v6002_v55  ;;  %v874_v23 = vsub.f32 %v5991_v53, %v6002_v55 }
 0x11f   : > { %9278 = vst [vmem:[#allocation35_spill] sm:$0xff] %v5996_v43  ;;  %1163 = vmatmul.f32.gmra.mxu3 %v5870_v8  ;;  %v654_v60 = vsel %vm653_vm4, %v5014_v59, %v650_v44  ;;  %v6009_v5 = vsub.f32 %v765_v3, %v5996_v43  ;;  %v1556_v51 = vand.u32 4294901760, %v1555_v32  ;;  %1642 = vmatpush.msra.mxu0 %v1555_v32 }
 0x120   : > { %v659_v24 = vsel %vm656_vm5, %v658_v36, %v654_v60  ;;  %v6015_v59 = vand.u32 4294901760, %v874_v23 }
 0x121   : > { %986 = vmatmul.f32.gmra.mxu1 %v5982_v29  ;;  %v727_v26 = vmul.f32 %v659_v24, %v439_v13  ;;  %9280 = vst [vmem:[#allocation37_spill] sm:$0xff] %v6009_v5  ;;  %v6019_v15 = vand.u32 4294901760, %v6009_v5  ;;  %v1557_v41 = vsub.f32 %v1555_v32, %v1556_v51  ;;  %1856 = vmatpush.msrb.mxu2 %v1556_v51 }
 0x122   : > { %868 = vmatmul.f32.gmra.mxu0 %v5998_v63 }
 0x123   : > { %v768_v14 = vsel %vm299_vm0, %v727_v26, 0  ;;  %9282 = vst [vmem:[#allocation39_spill] sm:$0xff] %v6019_v15  ;;  %v882_v3 = vsub.f32 %v6009_v5, %v6019_v15  ;;  %v1558_v13 = vand.u32 4294901760, %v1557_v41 }
 0x124   : > { %1054 = vmatmul.f32.gmra.mxu2 %v5815_v57  ;;  %v6013_v20 = vand.u32 4294901760, %v768_v14 }
 0x125   : > { %v6029_v44 = vand.u32 4294901760, %v882_v3  ;;  %1559 = vmatpush.msra.mxu3 %v1558_v13 }
 0x126   : > { %9281 = vst [vmem:[#allocation38_spill] sm:$0xff] %v6013_v20  ;;  %v6026_v36 = vsub.f32 %v768_v14, %v6013_v20 }
 0x127   : > { %1169 = vmatmul.f32.gmra.mxu3 %v5923_v28 }
 0x128   : > { %9283 = vst [vmem:[#allocation40_spill] sm:$0xff] %v6026_v36  ;;  %v6033_v60 = vand.u32 4294901760, %v6026_v36  ;;  %1938 = vmatpush.msrb.mxu3 %v1408_v52 }
 0x129   : > { %990 = vmatmul.f32.gmra.mxu1 %v5996_v43 }
 0x12a   : > { %876 = vmatmul.f32.gmra.mxu0 %v6015_v59  ;;  %9284 = vst [vmem:[#allocation41_spill] sm:$0xff] %v6033_v60  ;;  %v890_v24 = vsub.f32 %v6026_v36, %v6033_v60 }
 0x12c   : > { %1059 = vmatmul.f32.gmra.mxu2 %v5861_v18  ;;  %v6040_v26 = vand.u32 4294901760, %v890_v24 }
 0x12f   : > { %1175 = vmatmul.f32.gmra.mxu3 %v5957_v16 }
 0x131   : > { %994 = vmatmul.f32.gmra.mxu1 %v6013_v20 }
 0x132   : > { %884 = vmatmul.f32.gmra.mxu0 %v6029_v44 }
 0x134   : > { %1064 = vmatmul.f32.gmra.mxu2 %v5911_v12 }
 0x137   : > { %1181 = vmatmul.f32.gmra.mxu3 %v5980_v30 }
 0x139   : > { %1329 = vmatmul.f32.vlgmr.msrb.gmra.mxu1 %v5564_v35 }
 0x13a   : > { %892 = vmatmul.f32.gmra.mxu0 %v6040_v26 }
 0x13c   : > { %1069 = vmatmul.f32.gmra.mxu2 %v5941_v47 }
 0x13f   : > { %1187 = vmatmul.f32.gmra.mxu3 %v6002_v55 }
 0x141   : > { %1333 = vmatmul.f32.gmra.mxu1 %v5652_v45 }
 0x142   : > { %1247 = vmatmul.f32.vlgmr.msrb.gmra.mxu0 %v5564_v35 }
 0x144   : > { %1074 = vmatmul.f32.gmra.mxu2 %v5965_v48 }
 0x147   : > { %1193 = vmatmul.f32.gmra.mxu3 %v6019_v15 }
 0x149   : > { %1337 = vmatmul.f32.gmra.mxu1 %v5708_v31 }
 0x14a   : > { %1251 = vmatmul.f32.gmra.mxu0 %v5652_v45 }
 0x14c   : > { %1079 = vmatmul.f32.gmra.mxu2 %v5991_v53 }
 0x14f   : > { %1199 = vmatmul.f32.gmra.mxu3 %v6033_v60 }
 0x151   : > { %1341 = vmatmul.f32.gmra.mxu1 %v5752_v38 }
 0x152   : > { %1255 = vmatmul.f32.gmra.mxu0 %v5708_v31 }
 0x154   : > { %1084 = vmatmul.f32.gmra.mxu2 %v6009_v5  ;;  %v951_v23 = vpop.f32.mrf.mxu1 }
 0x157   : > { %1205 = vmatmul.f32.gmra.mxu3 %v5642_v0 }
 0x159   : > { %1345 = vmatmul.f32.gmra.mxu1 %v5780_v61 }
 0x15a   : > { %v999_v14 = vpop.f32.mrf.mxu3  ;;  %1259 = vmatmul.f32.gmra.mxu0 %v5752_v38 }
 0x15c   : > { %1089 = vmatmul.f32.gmra.mxu2 %v6026_v36 }
 0x15e   : > { %v955_v49 = vpop.f32.mrf.mxu1  ;;  %v805_v52 = vpop.f32.mrf.mxu0 }
 0x15f   : > { %1211 = vmatmul.f32.gmra.mxu3 %v5705_v54  ;;  %v952_v53 = vadd.f32 %v951_v23, %v805_v52 }
 0x161   : > { %1349 = vmatmul.f32.gmra.mxu1 %v5834_v4 }
 0x162   : > { %v1003_v32 = vpop.f32.mrf.mxu3  ;;  %1263 = vmatmul.f32.gmra.mxu0 %v5780_v61 }
 0x164   : > { %1094 = vmatmul.f32.gmra.mxu2 %v5613_v21 }
 0x165   : > { %v901_v51 = vpop.f32.mrf.mxu2 }
 0x166   : > { %v959_v3 = vpop.f32.mrf.mxu1  ;;  %v6066_v41 = vadd.f32 %v999_v14, %v901_v51  ;;  %v813_v13 = vpop.f32.mrf.mxu0 }
 0x167   : > { %1217 = vmatmul.f32.gmra.mxu3 %v5761_v42 }
 0x169   : > { %1353 = vmatmul.f32.gmra.mxu1 %v5889_v58 }
 0x16a   : > { %v1007_v24 = vpop.f32.mrf.mxu3  ;;  %1267 = vmatmul.f32.gmra.mxu0 %v5834_v4 }
 0x16c   : > { %1099 = vmatmul.f32.gmra.mxu2 %v5682_v37 }
 0x16e   : > { %v963_v54 = vpop.f32.mrf.mxu1 }
 0x16f   : > { %v909_v36 = vpop.f32.mrf.mxu2  ;;  %v821_v0 = vpop.f32.mrf.mxu0  ;;  %1223 = vmatmul.f32.gmra.mxu3 %v5808_v9 }
 0x170   : > { %v6073_v21 = vadd.f32 %v1003_v32, %v909_v36 }
 0x171   : > { %1357 = vmatmul.f32.gmra.mxu1 %v5925_v19 }
 0x172   : > { %v1011_v14 = vpop.f32.mrf.mxu3  ;;  %1271 = vmatmul.f32.gmra.mxu0 %v5889_v58 }
 0x174   : > { %1104 = vmatmul.f32.gmra.mxu2 %v5747_v7 }
 0x176   : > { %v6078_v51 = vpop.f32.mrf.mxu1 }
 0x177   : > { %v917_v42 = vpop.f32.mrf.mxu2  ;;  %1561 = vmatmul.f32.vlgmr.msra.gmra.mxu3 %v5564_v35  ;;  %v829_v5 = vpop.f32.mrf.mxu0 }
 0x178   : > { %v6081_v37 = vadd.f32 %v1007_v24, %v917_v42 }
 0x179   : > { %1361 = vmatmul.f32.gmra.mxu1 %v5947_v40 }
 0x17a   : > { %v1134_v9 = vpop.f32.mrf.mxu3  ;;  %1275 = vmatmul.f32.gmra.mxu0 %v5925_v19 }
 0x17c   : > { %1109 = vmatmul.f32.gmra.mxu2 %v5798_v1 }
 0x17e   : > { %v6086_v36 = vpop.f32.mrf.mxu1 }
 0x17f   : > { %v925_v32 = vpop.f32.mrf.mxu2  ;;  %1565 = vmatmul.f32.gmra.mxu3 %v5652_v45  ;;  %v837_v60 = vpop.f32.mrf.mxu0 }
 0x180   : > { %v6089_v7 = vadd.f32 %v1011_v14, %v925_v32 }
 0x181   : > { %1365 = vmatmul.f32.gmra.mxu1 %v5982_v29 }
 0x182   : > { %9285 = vst [vmem:[#allocation42_spill] sm:$0xff] %v6089_v7  ;;  %v1140_v42 = vpop.f32.mrf.mxu3  ;;  %1279 = vmatmul.f32.gmra.mxu0 %v5947_v40 }
 0x184   : > { %1415 = vmatmul.f32.vlgmr.msra.gmra.mxu2 %v5667_v2  ;;  %v956_v2 = vadd.f32 %v955_v49, %v813_v13 }
 0x186   : > { %v6094_v24 = vpop.f32.mrf.mxu1 }
 0x187   : > { %v1035_v15 = vpop.f32.mrf.mxu2  ;;  %1569 = vmatmul.f32.gmra.mxu3 %v5708_v31  ;;  %v845_v48 = vpop.f32.mrf.mxu0 }
 0x188   : > { %v1036_v1 = vadd.f32 %v1035_v15, %v952_v53 }
 0x189   : > { %1369 = vmatmul.f32.gmra.mxu1 %v5996_v43 }
 0x18a   : > { %v1146_v14 = vpop.f32.mrf.mxu3  ;;  %v6098_v32 = vadd.f32 %v1134_v9, %v1036_v1  ;;  %1283 = vmatmul.f32.gmra.mxu0 %v5982_v29 }
 0x18c   : > { %1423 = vmatmul.f32.gmra.mxu2 %v5718_v10  ;;  %v960_v10 = vadd.f32 %v959_v3, %v821_v0 }
 0x18e   : > { %v6102_v55 = vpop.f32.mrf.mxu1 }
 0x18f   : > { %v1040_v7 = vpop.f32.mrf.mxu2  ;;  %1573 = vmatmul.f32.gmra.mxu3 %v5752_v38  ;;  %v853_v52 = vpop.f32.mrf.mxu0 }
 0x190   : > { %v1041_v23 = vadd.f32 %v1040_v7, %v956_v2 }
 0x191   : > { %1373 = vmatmul.f32.gmra.mxu1 %v6013_v20 }
 0x192   : > { %v1152_v53 = vpop.f32.mrf.mxu3  ;;  %v6106_v15 = vadd.f32 %v1140_v42, %v1041_v23  ;;  %1287 = vmatmul.f32.gmra.mxu0 %v5996_v43 }
 0x194   : > { %1431 = vmatmul.f32.gmra.mxu2 %v5777_v6  ;;  %v964_v6 = vadd.f32 %v963_v54, %v829_v5 }
 0x196   : > { %v6110_v1 = vpop.f32.mrf.mxu1 }
 0x197   : > { %v1045_v9 = vpop.f32.mrf.mxu2  ;;  %1577 = vmatmul.f32.gmra.mxu3 %v5780_v61  ;;  %v861_v13 = vpop.f32.mrf.mxu0 }
 0x198   : > { %v1046_v49 = vadd.f32 %v1045_v9, %v960_v10 }
 0x199   : > { %1377 = vmatmul.f32.gmra.mxu1 %v5557_v22 }
 0x19a   : > { %v1158_v7 = vpop.f32.mrf.mxu3  ;;  %v6114_v2 = vadd.f32 %v1146_v14, %v1046_v49  ;;  %1291 = vmatmul.f32.gmra.mxu0 %v6013_v20 }
 0x19c   : > { %9286 = vst [vmem:[#allocation43_spill] sm:$0xff] %v6114_v2  ;;  %1439 = vmatmul.f32.gmra.mxu2 %v5829_v46  ;;  %v968_v46 = vadd.f32 %v6078_v51, %v837_v60 }
 0x19e   : > { %v6118_v42 = vpop.f32.mrf.mxu1 }
 0x19f   : > { %v1050_v23 = vpop.f32.mrf.mxu2  ;;  %1581 = vmatmul.f32.gmra.mxu3 %v5834_v4  ;;  %v869_v3 = vpop.f32.mrf.mxu0 }
 0x1a0   : > { %v1051_v0 = vadd.f32 %v1050_v23, %v964_v6 }
 0x1a1   : > { %1381 = vmatmul.f32.gmra.mxu1 %v5626_v27 }
 0x1a2   : > { %v1164_v10 = vpop.f32.mrf.mxu3  ;;  %v6122_v9 = vadd.f32 %v1152_v53, %v1051_v0  ;;  %1295 = vmatmul.f32.gmra.mxu0 %v5557_v22  ;;  %v9289_v53 = vld [vmem:[#allocation32_spill] sm:$0xff] }
 0x1a4   : > { %9287 = vst [vmem:[#allocation44_spill] sm:$0xff] %v6122_v9  ;;  %1447 = vmatmul.f32.gmra.mxu2 %v5865_v62  ;;  %v972_v62 = vadd.f32 %v6086_v36, %v845_v48 }
 0x1a6   : > { %v6126_v14 = vpop.f32.mrf.mxu1 }
 0x1a7   : > { %v1055_v49 = vpop.f32.mrf.mxu2  ;;  %1585 = vmatmul.f32.gmra.mxu3 %v5889_v58  ;;  %v877_v5 = vpop.f32.mrf.mxu0 }
 0x1a8   : > { %v1056_v54 = vadd.f32 %v1055_v49, %v968_v46  ;;  %v9290_v46 = vld [vmem:[#allocation14_spill] sm:$0xff] }
 0x1a9   : > { %1385 = vmatmul.f32.gmra.mxu1 %v5554_v17 }
 0x1aa   : > { %v1170_v6 = vpop.f32.mrf.mxu3  ;;  %v6131_v23 = vadd.f32 %v1158_v7, %v1056_v54  ;;  %1299 = vmatmul.f32.gmra.mxu0 %v5626_v27  ;;  %v976_v54 = vadd.f32 %v6094_v24, %v853_v52 }
 0x1ac   : > { %9288 = vst [vmem:[#allocation45_spill] sm:$0xff] %v6131_v23  ;;  %1455 = vmatmul.f32.gmra.mxu2 %v9289_v53 }
 0x1ae   : > { %v6135_v0 = vpop.f32.mrf.mxu1 }
 0x1af   : > { %v1060_v9 = vpop.f32.mrf.mxu2  ;;  %1589 = vmatmul.f32.gmra.mxu3 %v5925_v19  ;;  %v885_v51 = vpop.f32.mrf.mxu0 }
 0x1b0   : > { %v1061_v60 = vadd.f32 %v1060_v9, %v972_v62  ;;  %v9292_v9 = vld [vmem:[#allocation18_spill] sm:$0xff] }
 0x1b1   : > { %1389 = vmatmul.f32.gmra.mxu1 %v9290_v46 }
 0x1b2   : > { %v1176_v49 = vpop.f32.mrf.mxu3  ;;  %v6140_v2 = vadd.f32 %v1164_v10, %v1061_v60  ;;  %1303 = vmatmul.f32.gmra.mxu0 %v5554_v17 }
 0x1b4   : > { %9291 = vst [vmem:[#allocation32_spill] sm:$0xff] %v6140_v2  ;;  %1463 = vmatmul.f32.gmra.mxu2 %v5944_v39  ;;  %v980_v39 = vadd.f32 %v6102_v55, %v861_v13 }
 0x1b6   : > { %v6144_v7 = vpop.f32.mrf.mxu1 }
 0x1b7   : > { %v1065_v53 = vpop.f32.mrf.mxu2  ;;  %1593 = vmatmul.f32.gmra.mxu3 %v5947_v40  ;;  %v893_v36 = vpop.f32.mrf.mxu0 }
 0x1b8   : > { %v1066_v48 = vadd.f32 %v1065_v53, %v976_v54  ;;  %v9294_v54 = vld [vmem:[#allocation22_spill] sm:$0xff] }
 0x1b9   : > { %1744 = vmatmul.f32.vlgmr.msra.gmra.mxu1 %v9292_v9 }
 0x1ba   : > { %v1182_v62 = vpop.f32.mrf.mxu3  ;;  %v6149_v23 = vadd.f32 %v1170_v6, %v1066_v48  ;;  %1307 = vmatmul.f32.gmra.mxu0 %v9290_v46  ;;  %v9296_v6 = vld [vmem:[#allocation15_spill] sm:$0xff]  ;;  %v984_v48 = vadd.f32 %v6110_v1, %v869_v3 }
 0x1bc   : > { %9293 = vst [vmem:[#allocation18_spill] sm:$0xff] %v6149_v23  ;;  %1471 = vmatmul.f32.gmra.mxu2 %v5976_v25 }
 0x1be   : > { %v6153_v10 = vpop.f32.mrf.mxu1 }
 0x1bf   : > { %v1070_v60 = vpop.f32.mrf.mxu2  ;;  %1597 = vmatmul.f32.gmra.mxu3 %v5982_v29  ;;  %v6157_v52 = vpop.f32.mrf.mxu0 }
 0x1c0   : > { %v1071_v24 = vadd.f32 %v1070_v60, %v980_v39  ;;  %v9297_v60 = vld [vmem:[#allocation26_spill] sm:$0xff] }
 0x1c1   : > { %1750 = vmatmul.f32.gmra.mxu1 %v9294_v54 }
 0x1c2   : > { %v1188_v53 = vpop.f32.mrf.mxu3  ;;  %v6160_v9 = vadd.f32 %v1176_v49, %v1071_v24  ;;  %1645 = vmatmul.f32.vlgmr.msra.gmra.mxu0 %v9296_v6  ;;  %v988_v49 = vadd.f32 %v6118_v42, %v877_v5 }
 0x1c4   : > { %9295 = vst [vmem:[#allocation22_spill] sm:$0xff] %v6160_v9  ;;  %1479 = vmatmul.f32.gmra.mxu2 %v5998_v63 }
 0x1c6   : > { %v6164_v25 = vpop.f32.mrf.mxu1 }
 0x1c7   : > { %v1075_v55 = vpop.f32.mrf.mxu2  ;;  %1601 = vmatmul.f32.gmra.mxu3 %v5996_v43  ;;  %v6168_v39 = vpop.f32.mrf.mxu0 }
 0x1c8   : > { %v1076_v13 = vadd.f32 %v1075_v55, %v984_v48 }
 0x1c9   : > { %1756 = vmatmul.f32.gmra.mxu1 %v9297_v60 }
 0x1ca   : > { %v1194_v54 = vpop.f32.mrf.mxu3  ;;  %v6171_v23 = vadd.f32 %v1182_v62, %v1076_v13  ;;  %1650 = vmatmul.f32.gmra.mxu0 %v5676_v56 }
 0x1cc   : > { %9298 = vst [vmem:[#allocation15_spill] sm:$0xff] %v6171_v23  ;;  %1487 = vmatmul.f32.gmra.mxu2 %v6015_v59  ;;  %v992_v59 = vadd.f32 %v6126_v14, %v885_v51 }
 0x1ce   : > { %v6175_v63 = vpop.f32.mrf.mxu1 }
 0x1cf   : > { %v1080_v1 = vpop.f32.mrf.mxu2  ;;  %1605 = vmatmul.f32.gmra.mxu3 %v6013_v20  ;;  %v6179_v24 = vpop.f32.mrf.mxu0 }
 0x1d0   : > { %v1081_v3 = vadd.f32 %v1080_v1, %v988_v49  ;;  %v9309_v49 = vld [vmem:[#allocation24_spill] sm:$0xff] }
 0x1d1   : > { %1762 = vmatmul.f32.gmra.mxu1 %v5805_v50 }
 0x1d2   : > { %v1200_v6 = vpop.f32.mrf.mxu3  ;;  %v6182_v48 = vadd.f32 %v1188_v53, %v1081_v3  ;;  %1655 = vmatmul.f32.gmra.mxu0 %v5743_v34 }
 0x1d4   : > { %9299 = vst [vmem:[#allocation26_spill] sm:$0xff] %v6182_v48  ;;  %1495 = vmatmul.f32.gmra.mxu2 %v6029_v44  ;;  %v996_v44 = vadd.f32 %v6135_v0, %v893_v36 }
 0x1d6   : > { %v6186_v56 = vpop.f32.mrf.mxu1 }
 0x1d7   : > { %9300 = vst [vmem:[#allocation46_spill] sm:$0xff] %v6186_v56  ;;  %v1085_v42 = vpop.f32.mrf.mxu2  ;;  %1609 = vmatmul.f32.gmra.mxu3 %v5557_v22  ;;  %v6190_v62 = vpop.f32.mrf.mxu0  ;;  %v9343_v56 = vld [vmem:[#allocation23_spill] sm:$0xff] }
 0x1d8   : > { %v1086_v5 = vadd.f32 %v1085_v42, %v992_v59  ;;  %v9313_v59 = vld [vmem:[#allocation28_spill] sm:$0xff] }
 0x1d9   : > { %1768 = vmatmul.f32.gmra.mxu1 %v5832_v11 }
 0x1da   : > { %v1206_v50 = vpop.f32.mrf.mxu3  ;;  %v6193_v55 = vadd.f32 %v1194_v54, %v1086_v5  ;;  %1660 = vmatmul.f32.gmra.mxu0 %v5794_v33  ;;  %v9305_v33 = vld [vmem:[#allocation20_spill] sm:$0xff] }
 0x1dc   : > { %9301 = vst [vmem:[#allocation47_spill] sm:$0xff] %v6193_v55  ;;  %1503 = vmatmul.f32.gmra.mxu2 %v6040_v26 }
 0x1de   : > { %v6197_v34 = vpop.f32.mrf.mxu1 }
 0x1df   : > { %9302 = vst [vmem:[#allocation48_spill] sm:$0xff] %v6197_v34  ;;  %v1090_v14 = vpop.f32.mrf.mxu2  ;;  %1613 = vmatmul.f32.gmra.mxu3 %v5626_v27  ;;  %v6201_v53 = vpop.f32.mrf.mxu0 }
 0x1e0   : > { %v1091_v51 = vadd.f32 %v1090_v14, %v996_v44  ;;  %9303 = vst [vmem:[#allocation49_spill] sm:$0xff] %v6201_v53  ;;  %v9317_v44 = vld [vmem:[#allocation31_spill] sm:$0xff]  ;;  %v2083_v14 = vld [vmem:[%s9038_s3 + $0x78] sm:$0xff] }
 0x1e1   : > { %1774 = vmatmul.f32.gmra.mxu1 %v5870_v8 }
 0x1e2   : > { %v1212_v11 = vpop.f32.mrf.mxu3  ;;  %v6204_v13 = vadd.f32 %v1200_v6, %v1091_v51  ;;  %1665 = vmatmul.f32.gmra.mxu0 %v5815_v57  ;;  %v6246_v51 = vand.u32 4294901760, %v2083_v14 }
 0x1e4   : > { %9304 = vst [vmem:[#allocation50_spill] sm:$0xff] %v6204_v13  ;;  %1511 = vmatmul.f32.gmra.mxu2 %v9305_v33  ;;  %2103 = vmatpush.msrb.mxu0 %v6246_v51 }
 0x1e5   : > { %2554 = vmatpush.msra.mxu3 %v6246_v51 }
 0x1e6   : > { %v6208_v26 = vpop.f32.mrf.mxu1 }
 0x1e7   : > { %9306 = vst [vmem:[#allocation20_spill] sm:$0xff] %v6208_v26  ;;  %v1095_v60 = vpop.f32.mrf.mxu2  ;;  %1617 = vmatmul.f32.gmra.mxu3 %v5554_v17  ;;  %v6212_v36 = vpop.f32.mrf.mxu0 }
 0x1e8   : > { %v1096_v0 = vadd.f32 %v1095_v60, %v6066_v41  ;;  %9307 = vst [vmem:[#allocation51_spill] sm:$0xff] %v6212_v36  ;;  %v9321_v60 = vld [vmem:[#allocation36_spill] sm:$0xff] }
 0x1e9   : > { %1780 = vmatmul.f32.gmra.mxu1 %v5923_v28 }
 0x1ea   : > { %v1218_v54 = vpop.f32.mrf.mxu3  ;;  %v6215_v8 = vadd.f32 %v1206_v50, %v1096_v0  ;;  %1670 = vmatmul.f32.gmra.mxu0 %v5861_v18  ;;  %v2082_v0 = vld [vmem:[%s9038_s3 + $0x70] sm:$0xff] }
 0x1ec   : > { %9308 = vst [vmem:[#allocation52_spill] sm:$0xff] %v6215_v8  ;;  %1519 = vmatmul.f32.gmra.mxu2 %v9309_v49 }
 0x1ee   : > { %v6219_v57 = vpop.f32.mrf.mxu1 }
 0x1ef   : > { %9310 = vst [vmem:[#allocation24_spill] sm:$0xff] %v6219_v57  ;;  %v1100_v1 = vpop.f32.mrf.mxu2  ;;  %1621 = vmatmul.f32.gmra.mxu3 %v9290_v46  ;;  %v6223_v6 = vpop.f32.mrf.mxu0 }
 0x1f0   : > { %v1101_v3 = vadd.f32 %v1100_v1, %v6073_v21  ;;  %9311 = vst [vmem:[#allocation53_spill] sm:$0xff] %v6223_v6 }
 0x1f1   : > { %1786 = vmatmul.f32.gmra.mxu1 %v5957_v16 }
 0x1f2   : > { %v1224_v41 = vpop.f32.mrf.mxu3  ;;  %v6226_v28 = vadd.f32 %v1212_v11, %v1101_v3  ;;  %1675 = vmatmul.f32.gmra.mxu0 %v5911_v12  ;;  %v9319_v11 = vld [vmem:[#allocation42_spill] sm:$0xff] }
 0x1f4   : > { %9312 = vst [vmem:[#allocation54_spill] sm:$0xff] %v6226_v28  ;;  %1527 = vmatmul.f32.gmra.mxu2 %v9313_v59  ;;  %v9323_v59 = vld [vmem:[#allocation33_spill] sm:$0xff]  ;;  %v9326_v28 = vld [vmem:[#allocation39_spill] sm:$0xff] }
 0x1f6   : > { %v6230_v18 = vpop.f32.mrf.mxu1 }
 0x1f7   : > { %9314 = vst [vmem:[#allocation28_spill] sm:$0xff] %v6230_v18  ;;  %v1105_v42 = vpop.f32.mrf.mxu2  ;;  %1940 = vmatmul.f32.vlgmr.msrb.gmra.mxu3 %v5564_v35  ;;  %v6234_v50 = vpop.f32.mrf.mxu0 }
 0x1f8   : > { %v1106_v5 = vadd.f32 %v1105_v42, %v6081_v37  ;;  %9315 = vst [vmem:[#allocation55_spill] sm:$0xff] %v6234_v50 }
 0x1f9   : > { %1792 = vmatmul.f32.gmra.mxu1 %v5980_v30 }
 0x1fa   : > { %v1562_v21 = vpop.f32.mrf.mxu3  ;;  %v6237_v16 = vadd.f32 %v1218_v54, %v1106_v5  ;;  %1680 = vmatmul.f32.gmra.mxu0 %v5941_v47  ;;  %v6254_v47 = vsub.f32 %v2083_v14, %v6246_v51  ;;  %v6260_v54 = vand.u32 4294901760, %v2082_v0  ;;  %v2081_v14 = vld [vmem:[%s9038_s3 + $0x68] sm:$0xff] }
 0x1fc   : > { %9316 = vst [vmem:[#allocation56_spill] sm:$0xff] %v6237_v16  ;;  %1535 = vmatmul.f32.gmra.mxu2 %v9317_v44  ;;  %v9068_v1 = vand.u32 4294901760, %v6254_v47  ;;  %v6271_v42 = vsub.f32 %v2082_v0, %v6260_v54  ;;  %2556 = vmatpush.msra.mxu3 %v6260_v54 }
 0x1fd   : > { %2426 = vmatpush.msra.mxu2 %v6254_v47  ;;  %2105 = vmatpush.msrb.mxu0 %v6260_v54 }
 0x1fe   : > { %v6241_v12 = vpop.f32.mrf.mxu1  ;;  %v2266_v5 = vsub.f32 %v6254_v47, %v9068_v1 }
 0x1ff   : > { %9318 = vst [vmem:[#allocation31_spill] sm:$0xff] %v6241_v12  ;;  %v1110_v37 = vpop.f32.mrf.mxu2  ;;  %1944 = vmatmul.f32.gmra.mxu3 %v5652_v45  ;;  %v6250_v33 = vpop.f32.mrf.mxu0  ;;  %2429 = vmatpush.msra.mxu2 %v6271_v42 }
 0x200   : > { %v1111_v30 = vadd.f32 %v1110_v37, %v9319_v11  ;;  %9320 = vst [vmem:[#allocation42_spill] sm:$0xff] %v6250_v33  ;;  %v2080_v37 = vld [vmem:[%s9038_s3 + $0x60] sm:$0xff]  ;;  %v2267_v11 = vand.u32 4294901760, %v2266_v5 }
 0x201   : > { %1798 = vmatmul.f32.gmra.mxu1 %v9321_v60  ;;  %v6294_v60 = vand.u32 4294901760, %v2080_v37  ;;  %v9333_v33 = vld [vmem:[#allocation41_spill] sm:$0xff] }
 0x202   : > { %v6263_v49 = vpop.f32.mrf.mxu3  ;;  %v6266_v3 = vadd.f32 %v1224_v41, %v1111_v30  ;;  %1685 = vmatmul.f32.gmra.mxu0 %v9323_v59  ;;  %v9069_v41 = vand.u32 4294901760, %v6271_v42  ;;  %v6292_v30 = vand.u32 4294901760, %v2081_v14  ;;  %2268 = vmatpush.msrb.mxu1 %v2267_v11 }
 0x203   : > { %v6311_v8 = vsub.f32 %v2080_v37, %v6294_v60 }
 0x204   : > { %9322 = vst [vmem:[#allocation36_spill] sm:$0xff] %v6266_v3  ;;  %1858 = vmatmul.f32.vlgmr.msrb.gmra.mxu2 %v5564_v35  ;;  %v2079_v35 = vld [vmem:[%s9038_s3 + $0x58] sm:$0xff]  ;;  %v2272_v1 = vsub.f32 %v6271_v42, %v9069_v41  ;;  %v6308_v5 = vsub.f32 %v2081_v14, %v6292_v30  ;;  %2107 = vmatpush.msrb.mxu0 %v6292_v30 }
 0x205   : > { %v6296_v0 = vand.u32 4294901760, %v2079_v35  ;;  %v9071_v37 = vand.u32 4294901760, %v6311_v8  ;;  %2558 = vmatpush.msra.mxu3 %v6292_v30 }
 0x206   : > { %v6279_v44 = vpop.f32.mrf.mxu1  ;;  %v9070_v14 = vand.u32 4294901760, %v6308_v5  ;;  %2432 = vmatpush.msra.mxu2 %v6308_v5  ;;  %2109 = vmatpush.msrb.mxu0 %v6294_v60 }
 0x207   : > { %9324 = vst [vmem:[#allocation33_spill] sm:$0xff] %v6279_v44  ;;  %v1416_v59 = vpop.f32.mrf.mxu2  ;;  %1948 = vmatmul.f32.gmra.mxu3 %v5708_v31  ;;  %v6304_v16 = vpop.f32.mrf.mxu0  ;;  %v6314_v13 = vsub.f32 %v2079_v35, %v6296_v0  ;;  %v2078_v44 = vld [vmem:[%s9038_s3 + $0x50] sm:$0xff]  ;;  %v9327_v35 = vld [vmem:[#allocation34_spill] sm:$0xff]  ;;  %v2284_v41 = vsub.f32 %v6311_v8, %v9071_v37  ;;  %v2075_v37 = vld [vmem:[%s9038_s3 + $0x38] sm:$0xff] }
 0x208   : > { %v6302_v3 = vadd.f32 %v1562_v21, %v1416_v59  ;;  %9325 = vst [vmem:[#allocation57_spill] sm:$0xff] %v6304_v16  ;;  %v2273_v21 = vand.u32 4294901760, %v2272_v1  ;;  %v6319_v59 = vand.u32 4294901760, %v2078_v44  ;;  %v2278_v11 = vsub.f32 %v6308_v5, %v9070_v14  ;;  %v2076_v14 = vld [vmem:[%s9038_s3 + $0x40] sm:$0xff]  ;;  %2435 = vmatpush.msra.mxu2 %v6311_v8  ;;  %2560 = vmatpush.msra.mxu3 %v6294_v60 }
 0x209   : > { %1804 = vmatmul.f32.gmra.mxu1 %v9326_v28  ;;  %2111 = vmatpush.msrb.mxu0 %v6296_v0  ;;  %v2285_v12 = vand.u32 4294901760, %v2284_v41  ;;  %v6365_v48 = vand.u32 4294901760, %v2076_v14  ;;  %v6367_v18 = vand.u32 4294901760, %v2075_v37 }
 0x20a   : > { %v6322_v28 = vpop.f32.mrf.mxu3  ;;  %1690 = vmatmul.f32.gmra.mxu0 %v9327_v35  ;;  %2274 = vmatpush.msrb.mxu1 %v2273_v21  ;;  %v6331_v1 = vsub.f32 %v2078_v44, %v6319_v59  ;;  %v9329_v35 = vand.u32 4294901760, %v6314_v13 }
 0x20b   : > { %2438 = vmatpush.msra.mxu2 %v6314_v13  ;;  %2113 = vmatpush.msrb.mxu0 %v6319_v59  ;;  %v6384_v57 = vsub.f32 %v2076_v14, %v6365_v48 }
 0x20c   : > { %1862 = vmatmul.f32.gmra.mxu2 %v5652_v45  ;;  %v2290_v21 = vsub.f32 %v6314_v13, %v9329_v35  ;;  %v2077_v45 = vld [vmem:[%s9038_s3 + $0x48] sm:$0xff]  ;;  %v9330_v46 = vand.u32 4294901760, %v6331_v1  ;;  %2562 = vmatpush.msra.mxu3 %v6296_v0 }
 0x20d   : > { %v6358_v35 = vand.u32 4294901760, %v2077_v45  ;;  %2441 = vmatpush.msra.mxu2 %v6331_v1 }
 0x20e   : > { %v6341_v55 = vpop.f32.mrf.mxu1  ;;  %v2296_v16 = vsub.f32 %v6331_v1, %v9330_v46  ;;  %v2074_v46 = vld [vmem:[%s9038_s3 + $0x30] sm:$0xff]  ;;  %v2291_v41 = vand.u32 4294901760, %v2290_v21  ;;  %v9077_v21 = vand.u32 4294901760, %v6384_v57  ;;  %2564 = vmatpush.msra.mxu3 %v6319_v59 }
 0x20f   : > { %9328 = vst [vmem:[#allocation39_spill] sm:$0xff] %v6341_v55  ;;  %v2279_v55 = vand.u32 4294901760, %v2278_v11  ;;  %v1424_v44 = vpop.f32.mrf.mxu2  ;;  %1952 = vmatmul.f32.gmra.mxu3 %v5752_v38  ;;  %v6373_v17 = vpop.f32.mrf.mxu0  ;;  %v6377_v23 = vsub.f32 %v2077_v45, %v6358_v35  ;;  %v6393_v45 = vand.u32 4294901760, %v2074_v46  ;;  %2115 = vmatpush.msrb.mxu0 %v6358_v35 }
 0x210   : > { %v6371_v11 = vadd.f32 %v6263_v49, %v1424_v44  ;;  %9332 = vst [vmem:[#allocation58_spill] sm:$0xff] %v6373_v17  ;;  %v6387_v49 = vsub.f32 %v2075_v37, %v6367_v18  ;;  %v2297_v14 = vand.u32 4294901760, %v2296_v16  ;;  %v2308_v16 = vsub.f32 %v6384_v57, %v9077_v21  ;;  %v9338_v21 = vld [vmem:[#allocation19_spill] sm:$0xff]  ;;  %2566 = vmatpush.msra.mxu3 %v6358_v35 }
 0x211   : > { %1810 = vmatmul.f32.gmra.mxu1 %v9333_v33  ;;  %v9078_v44 = vand.u32 4294901760, %v6377_v23  ;;  %v6405_v27 = vsub.f32 %v2074_v46, %v6393_v45  ;;  %2117 = vmatpush.msrb.mxu0 %v6365_v48  ;;  %v2072_v46 = vld [vmem:[%s9038_s3 + $0x20] sm:$0xff] }
 0x212   : > { %9331 = vst [vmem:[#allocation34_spill] sm:$0xff] %v6371_v11  ;;  %2280 = vmatpush.msrb.mxu1 %v2279_v55  ;;  %v6390_v33 = vpop.f32.mrf.mxu3  ;;  %v9334_v55 = vld [vmem:[#allocation37_spill] sm:$0xff]  ;;  %v9079_v37 = vand.u32 4294901760, %v6387_v49  ;;  %2444 = vmatpush.msra.mxu2 %v6377_v23  ;;  %v2309_v9 = vand.u32 4294901760, %v2308_v16 }
 0x213   : > { %1695 = vmatmul.f32.gmra.mxu0 %v9334_v55  ;;  %v2302_v17 = vsub.f32 %v6377_v23, %v9078_v44  ;;  %v9339_v6 = vand.u32 4294901760, %v6405_v27  ;;  %2568 = vmatpush.msra.mxu3 %v6365_v48 }
 0x214   : > { %2286 = vmatpush.msrb.mxu1 %v2285_v12  ;;  %1866 = vmatmul.f32.gmra.mxu2 %v5708_v31  ;;  %v2314_v31 = vsub.f32 %v6387_v49, %v9079_v37  ;;  %v2073_v12 = vld [vmem:[%s9038_s3 + $0x28] sm:$0xff]  ;;  %v6429_v37 = vand.u32 4294901760, %v2072_v46 }
 0x215   : > { %v2303_v55 = vand.u32 4294901760, %v2302_v17  ;;  %v6427_v44 = vand.u32 4294901760, %v2073_v12  ;;  %2119 = vmatpush.msrb.mxu0 %v6367_v18  ;;  %v2320_v34 = vsub.f32 %v6405_v27, %v9339_v6  ;;  %2447 = vmatpush.msra.mxu2 %v6384_v57 }
 0x216   : > { %v6408_v50 = vpop.f32.mrf.mxu1  ;;  %2292 = vmatpush.msrb.mxu1 %v2291_v41  ;;  %v2071_v41 = vld [vmem:[%s9038_s3 + $0x18] sm:$0xff]  ;;  %v6449_v36 = vsub.f32 %v2072_v46, %v6429_v37  ;;  %2570 = vmatpush.msra.mxu3 %v6367_v18 }
 0x217   : > { %9335 = vst [vmem:[#allocation41_spill] sm:$0xff] %v6408_v50  ;;  %v1432_v50 = vpop.f32.mrf.mxu2  ;;  %1956 = vmatmul.f32.gmra.mxu3 %v5780_v61  ;;  %v6434_v26 = vand.u32 4294901760, %v2071_v41  ;;  %v6439_v17 = vpop.f32.mrf.mxu0  ;;  %v6446_v20 = vsub.f32 %v2073_v12, %v6427_v44  ;;  %2121 = vmatpush.msrb.mxu0 %v6393_v45  ;;  %v9340_v46 = vld [vmem:[#allocation40_spill] sm:$0xff] }
 0x218   : > { %2298 = vmatpush.msrb.mxu1 %v2297_v14  ;;  %v6437_v22 = vadd.f32 %v6322_v28, %v1432_v50  ;;  %9337 = vst [vmem:[#allocation59_spill] sm:$0xff] %v6439_v17  ;;  %v2070_v14 = vld [vmem:[%s9038_s3 + $0x10] sm:$0xff]  ;;  %v2315_v50 = vand.u32 4294901760, %v2314_v31  ;;  %v9084_v12 = vand.u32 4294901760, %v6449_v36  ;;  %v2321_v31 = vand.u32 4294901760, %v2320_v34  ;;  %2450 = vmatpush.msra.mxu2 %v6387_v49 }
 0x219   : > { %1816 = vmatmul.f32.gmra.mxu1 %v9338_v21  ;;  %v6455_v28 = vsub.f32 %v2071_v41, %v6434_v26  ;;  %v6458_v21 = vand.u32 4294901760, %v2070_v14  ;;  %v9085_v16 = vand.u32 4294901760, %v6446_v20  ;;  %2123 = vmatpush.msrb.mxu0 %v6427_v44 }
 0x21a   : > { %9336 = vst [vmem:[#allocation37_spill] sm:$0xff] %v6437_v22  ;;  %2304 = vmatpush.msrb.mxu1 %v2303_v55  ;;  %v6460_v6 = vpop.f32.mrf.mxu3  ;;  %v2332_v22 = vsub.f32 %v6449_v36, %v9084_v12  ;;  %2453 = vmatpush.msra.mxu2 %v6405_v27 }
 0x21b   : > { %1700 = vmatmul.f32.gmra.mxu0 %v9340_v46  ;;  %v9086_v41 = vand.u32 4294901760, %v6455_v28  ;;  %v6469_v55 = vsub.f32 %v2070_v14, %v6458_v21  ;;  %v2326_v17 = vsub.f32 %v6446_v20, %v9085_v16  ;;  %v2068_v14 = vld [vmem:[%s9038_s3] sm:$0xff]  ;;  %2572 = vmatpush.msra.mxu3 %v6393_v45 }
 0x21c   : > { %2310 = vmatpush.msrb.mxu1 %v2309_v9  ;;  %1870 = vmatmul.f32.gmra.mxu2 %v5752_v38  ;;  %v2069_v38 = vld [vmem:[%s9038_s3 + $0x8] sm:$0xff]  ;;  %v2333_v34 = vand.u32 4294901760, %v2332_v22 }
 0x21d   : > { %v2338_v9 = vsub.f32 %v6455_v28, %v9086_v41  ;;  %v2327_v12 = vand.u32 4294901760, %v2326_v17  ;;  %v6492_v16 = vand.u32 4294901760, %v2069_v38  ;;  %2125 = vmatpush.msrb.mxu0 %v6429_v37  ;;  %2456 = vmatpush.msra.mxu2 %v6446_v20 }
 0x21e   : > { %v6479_v46 = vpop.f32.mrf.mxu1  ;;  %2316 = vmatpush.msrb.mxu1 %v2315_v50  ;;  %v6495_v50 = vand.u32 4294901760, %v2068_v14  ;;  %2574 = vmatpush.msra.mxu3 %v6427_v44 }
 0x21f   : > { %9341 = vst [vmem:[#allocation19_spill] sm:$0xff] %v6479_v46  ;;  %v1440_v41 = vpop.f32.mrf.mxu2  ;;  %1960 = vmatmul.f32.gmra.mxu3 %v5834_v4  ;;  %v9342_v46 = vand.u32 4294901760, %v6469_v55  ;;  %v6505_v17 = vpop.f32.mrf.mxu0  ;;  %v6509_v43 = vsub.f32 %v2069_v38, %v6492_v16  ;;  %2127 = vmatpush.msrb.mxu0 %v6434_v26  ;;  %v2339_v22 = vand.u32 4294901760, %v2338_v9  ;;  %v1249_v38 = vadd.f32 %v6157_v52, %v6098_v32 }
 0x220   : > { %2322 = vmatpush.msrb.mxu1 %v2321_v31  ;;  %v6503_v11 = vadd.f32 %v6390_v33, %v1440_v41  ;;  %v6512_v53 = vsub.f32 %v2068_v14, %v6495_v50  ;;  %2459 = vmatpush.msra.mxu2 %v6449_v36 }
 0x221   : > { %v2344_v2 = vsub.f32 %v6469_v55, %v9342_v46  ;;  %1822 = vmatmul.f32.gmra.mxu1 %v9343_v56  ;;  %v2349_v33 = vand.u32 4294901760, %v6509_v43  ;;  %2129 = vmatpush.msrb.mxu0 %v6458_v21  ;;  %v9344_v56 = vld [vmem:[#allocation16_spill] sm:$0xff]  ;;  %v1331_v52 = vadd.f32 %v6144_v7, %v1249_v38  ;;  %v9347_v7 = vld [vmem:[#allocation21_spill] sm:$0xff]  ;;  %v1253_v38 = vadd.f32 %v6168_v39, %v6106_v15 }
 0x222   : > { %2328 = vmatpush.msrb.mxu1 %v2327_v12  ;;  %v1582_v31 = vpop.f32.mrf.mxu3  ;;  %v9089_v41 = vand.u32 4294901760, %v6512_v53  ;;  %2576 = vmatpush.msra.mxu3 %v6429_v37 }
 0x223   : > { %1705 = vmatmul.f32.gmra.mxu0 %v9344_v56  ;;  %v2345_v46 = vand.u32 4294901760, %v2344_v2  ;;  %v2350_v12 = vsub.f32 %v6509_v43, %v2349_v33  ;;  %2462 = vmatpush.msra.mxu2 %v6455_v28 }
 0x224   : > { %2334 = vmatpush.msrb.mxu1 %v2333_v34  ;;  %1874 = vmatmul.f32.gmra.mxu2 %v5780_v61  ;;  %v2356_v9 = vsub.f32 %v6512_v53, %v9089_v41 }
 0x225   : > { %2131 = vmatpush.msrb.mxu0 %v6492_v16  ;;  %v2351_v2 = vand.u32 4294901760, %v2350_v12  ;;  %v2004_v12 = vld [vmem:[%s5316_s27] sm:$0xff]  ;;  %2578 = vmatpush.msra.mxu3 %v6434_v26 }
 0x226   : > { %v6531_v14 = vpop.f32.mrf.mxu1  ;;  %2340 = vmatpush.msrb.mxu1 %v2339_v22  ;;  %v2357_v32 = vand.u32 4294901760, %v2356_v9  ;;  %v9345_v22 = vld [vmem:[#allocation27_spill] sm:$0xff]  ;;  %2465 = vmatpush.msra.mxu2 %v6469_v55 }
 0x227   : > { %2133 = vmatpush.msrb.mxu0 %v6495_v50  ;;  %v1448_v61 = vpop.f32.mrf.mxu2  ;;  %1964 = vmatmul.f32.gmra.mxu3 %v5889_v58  ;;  %v6541_v56 = vpop.f32.mrf.mxu0 }
 0x228   : > { %2346 = vmatpush.msrb.mxu1 %v2345_v46  ;;  %v6539_v34 = vadd.f32 %v6460_v6, %v1448_v61  ;;  %v9346_v46 = vand.u32 4294901760, %v6254_v47  ;;  %v2036_v6 = vmul.f32 %v2004_v12, %v1331_v52  ;;  %2580 = vmatpush.msra.mxu3 %v6458_v21  ;;  %v9348_v47 = vand.u32 4294901760, %v6271_v42  ;;  %v9349_v61 = vld [vmem:[#allocation30_spill] sm:$0xff]  ;;  %v2006_v42 = vld [vmem:[%s5316_s27 + $0x10] sm:$0xff] }
 0x229   : > { %1828 = vmatmul.f32.gmra.mxu1 %v9345_v22  ;;  %2468 = vmatpush.msra.mxu2 %v6509_v43  ;;  %v9350_v52 = vand.u32 4294901760, %v6308_v5  ;;  %v9353_v5 = vand.u32 4294901760, %v6311_v8  ;;  %v9374_v43 = vld [vmem:[#allocation38_spill] sm:$0xff] }
 0x22a   : > { %2352 = vmatpush.msrb.mxu1 %v2351_v2  ;;  %v1586_v41 = vpop.f32.mrf.mxu3  ;;  %2685 = vmatpush.msra.mxu0 %v9346_v46 }
 0x22b   : > { %1710 = vmatmul.f32.gmra.mxu0 %v9347_v7  ;;  %2582 = vmatpush.msra.mxu3 %v6492_v16 }
 0x22c   : > { %2358 = vmatpush.msrb.mxu1 %v2357_v32  ;;  %1878 = vmatmul.f32.gmra.mxu2 %v5834_v4  ;;  %v6564_v4 = vand.u32 4294901760, %v2036_v6 }
 0x22d   : > { %2689 = vmatpush.msra.mxu0 %v9348_v47  ;;  %2584 = vmatpush.msra.mxu3 %v6495_v50  ;;  %v2008_v47 = vld [vmem:[%s5316_s27 + $0x20] sm:$0xff] }
 0x22e   : > { %v6555_v9 = vpop.f32.mrf.mxu1  ;;  %2812 = vmatpush.msra.mxu1 %v6246_v51  ;;  %v1335_v51 = vadd.f32 %v6153_v10, %v1253_v38  ;;  %2471 = vmatpush.msra.mxu2 %v6512_v53  ;;  %v6582_v22 = vsub.f32 %v2036_v6, %v6564_v4  ;;  %v9354_v6 = vand.u32 4294901760, %v6314_v13 }
 0x22f   : > { %v1456_v2 = vpop.f32.mrf.mxu2  ;;  %1968 = vmatmul.f32.gmra.mxu3 %v5925_v19  ;;  %v6568_v39 = vpop.f32.mrf.mxu0  ;;  %2693 = vmatpush.msra.mxu0 %v9350_v52 }
 0x230   : > { %v6566_v15 = vadd.f32 %v1582_v31, %v1456_v2  ;;  %2814 = vmatpush.msra.mxu1 %v6260_v54  ;;  %v9351_v31 = vld [vmem:[#allocation25_spill] sm:$0xff]  ;;  %v2038_v10 = vmul.f32 %v2006_v42, %v1335_v51  ;;  %v9352_v54 = vld [vmem:[#allocation43_spill] sm:$0xff] }
 0x231   : > { %1834 = vmatmul.f32.gmra.mxu1 %v9349_v61  ;;  %v1257_v12 = vadd.f32 %v6179_v24, %v9352_v54  ;;  %2697 = vmatpush.msra.mxu0 %v9353_v5  ;;  %v9356_v2 = vld [vmem:[#allocation29_spill] sm:$0xff] }
 0x232   : > { %v1590_v32 = vpop.f32.mrf.mxu3  ;;  %2816 = vmatpush.msra.mxu1 %v6292_v30  ;;  %v6601_v8 = vand.u32 4294901760, %v2038_v10 }
 0x233   : > { %1715 = vmatmul.f32.gmra.mxu0 %v9351_v31  ;;  %v1339_v24 = vadd.f32 %v6164_v25, %v1257_v12  ;;  %v9357_v25 = vand.u32 4294901760, %v6377_v23  ;;  %v9361_v12 = vand.u32 4294901760, %v6405_v27 }
 0x234   : > { %1882 = vmatmul.f32.gmra.mxu2 %v5889_v58  ;;  %2818 = vmatpush.msra.mxu1 %v6294_v60  ;;  %v2136_v58 = vand.u32 4294901760, %v6582_v22  ;;  %v9355_v60 = vand.u32 4294901760, %v6331_v1  ;;  %v6618_v42 = vsub.f32 %v2038_v10, %v6601_v8 }
 0x235   : > { %2701 = vmatpush.msra.mxu0 %v9354_v6  ;;  %v2040_v61 = vmul.f32 %v2008_v47, %v1339_v24 }
 0x236   : > { %v1745_v46 = vpop.f32.mrf.mxu1  ;;  %2820 = vmatpush.msra.mxu1 %v6296_v0  ;;  %v9358_v0 = vld [vmem:[#allocation44_spill] sm:$0xff] }
 0x237   : > { %v1464_v7 = vpop.f32.mrf.mxu2  ;;  %1972 = vmatmul.f32.gmra.mxu3 %v5947_v40  ;;  %v6597_v38 = vpop.f32.mrf.mxu0  ;;  %2705 = vmatpush.msra.mxu0 %v9355_v60  ;;  %v1261_v1 = vadd.f32 %v6190_v62, %v9358_v0  ;;  %v9360_v62 = vand.u32 4294901760, %v6387_v49  ;;  %v6633_v54 = vand.u32 4294901760, %v2040_v61  ;;  %v9362_v49 = vld [vmem:[#allocation45_spill] sm:$0xff] }
 0x238   : > { %v6595_v30 = vadd.f32 %v1586_v41, %v1464_v7  ;;  %2822 = vmatpush.msra.mxu1 %v6319_v59  ;;  %v2137_v41 = vsub.f32 %v6582_v22, %v2136_v58  ;;  %v9359_v59 = vand.u32 4294901760, %v6384_v57  ;;  %v2144_v57 = vand.u32 4294901760, %v6618_v42 }
 0x239   : > { %2360 = vmatmul.f32.vlgmr.msrb.gmra.mxu1 %v6564_v4  ;;  %2709 = vmatpush.msra.mxu0 %v9357_v25  ;;  %v1343_v10 = vadd.f32 %v6175_v63, %v1261_v1  ;;  %v9363_v63 = vld [vmem:[#allocation49_spill] sm:$0xff] }
 0x23a   : > { %v1594_v13 = vpop.f32.mrf.mxu3  ;;  %2824 = vmatpush.msra.mxu1 %v6358_v35  ;;  %v2138_v31 = vand.u32 4294901760, %v2137_v41  ;;  %v1265_v7 = vadd.f32 %v9363_v63, %v9362_v49  ;;  %v2145_v27 = vsub.f32 %v6618_v42, %v2144_v57  ;;  %v9368_v41 = vand.u32 4294901760, %v6455_v28  ;;  %v2012_v25 = vld [vmem:[%s5316_s27 + $0x40] sm:$0xff]  ;;  %v2014_v63 = vld [vmem:[%s5316_s27 + $0x50] sm:$0xff] }
 0x23b   : > { %1720 = vmatmul.f32.gmra.mxu0 %v9356_v2 }
 0x23c   : > { %1886 = vmatmul.f32.gmra.mxu2 %v5925_v19  ;;  %2713 = vmatpush.msra.mxu0 %v9359_v59 }
 0x23d   : > { %2826 = vmatpush.msra.mxu1 %v6365_v48  ;;  %v2010_v48 = vld [vmem:[%s5316_s27 + $0x30] sm:$0xff] }
 0x23e   : > { %v1751_v51 = vpop.f32.mrf.mxu1  ;;  %2717 = vmatpush.msra.mxu0 %v9360_v62 }
 0x23f   : > { %v1472_v52 = vpop.f32.mrf.mxu2  ;;  %1976 = vmatmul.f32.gmra.mxu3 %v5982_v29  ;;  %v1646_v23 = vpop.f32.mrf.mxu0  ;;  %2828 = vmatpush.msra.mxu1 %v6367_v18  ;;  %v2042_v18 = vmul.f32 %v2010_v48, %v1343_v10 }
 0x240   : > { %v6625_v19 = vadd.f32 %v1590_v32, %v1472_v52  ;;  %v1647_v35 = vadd.f32 %v1646_v23, %v6302_v3  ;;  %2721 = vmatpush.msra.mxu0 %v9361_v12  ;;  %v9364_v3 = vand.u32 4294901760, %v6446_v20  ;;  %v9367_v20 = vld [vmem:[#allocation46_spill] sm:$0xff]  ;;  %v9371_v52 = vld [vmem:[#allocation32_spill] sm:$0xff]  ;;  %v9372_v23 = vld [vmem:[#allocation51_spill] sm:$0xff] }
 0x241   : > { %2364 = vmatmul.f32.gmra.mxu1 %v6601_v8  ;;  %v1347_v60 = vadd.f32 %v9367_v20, %v1265_v7  ;;  %v6667_v1 = vand.u32 4294901760, %v2042_v18  ;;  %v9376_v12 = vld [vmem:[#allocation37_spill] sm:$0xff] }
 0x242   : > { %v1598_v32 = vpop.f32.mrf.mxu3  ;;  %v6639_v5 = vadd.f32 %v1745_v46, %v1647_v35  ;;  %2830 = vmatpush.msra.mxu1 %v6393_v45  ;;  %2725 = vmatpush.msra.mxu0 %v9364_v3  ;;  %v6651_v46 = vsub.f32 %v2040_v61, %v6633_v54  ;;  %v9365_v45 = vand.u32 4294901760, %v6449_v36  ;;  %v2146_v36 = vand.u32 4294901760, %v2145_v27  ;;  %v9375_v35 = vld [vmem:[#allocation48_spill] sm:$0xff]  ;;  %v9378_v27 = vld [vmem:[#allocation53_spill] sm:$0xff] }
 0x243   : > { %2139 = vmatmul.f32.vlgmr.msrb.gmra.mxu0 %v2138_v31  ;;  %v2044_v28 = vmul.f32 %v2012_v25, %v1347_v60  ;;  %v1269_v31 = vadd.f32 %v9372_v23, %v9371_v52  ;;  %v9380_v25 = vld [vmem:[#allocation20_spill] sm:$0xff] }
 0x244   : > { %1890 = vmatmul.f32.gmra.mxu2 %v5947_v40  ;;  %2832 = vmatpush.msra.mxu1 %v6427_v44  ;;  %v9366_v40 = vld [vmem:[#allocation35_spill] sm:$0xff]  ;;  %v9369_v44 = vld [vmem:[#allocation34_spill] sm:$0xff]  ;;  %v2152_v0 = vand.u32 4294901760, %v6651_v46 }
 0x245   : > { %2729 = vmatpush.msra.mxu0 %v9365_v45  ;;  %v6694_v10 = vand.u32 4294901760, %v2044_v28  ;;  %v1351_v48 = vadd.f32 %v9375_v35, %v1269_v31 }
 0x246   : > { %v1757_v6 = vpop.f32.mrf.mxu1  ;;  %2834 = vmatpush.msra.mxu1 %v6429_v37 }
 0x247   : > { %v1480_v24 = vpop.f32.mrf.mxu2  ;;  %1980 = vmatmul.f32.gmra.mxu3 %v9366_v40  ;;  %v1651_v2 = vpop.f32.mrf.mxu0  ;;  %2733 = vmatpush.msra.mxu0 %v9368_v41 }
 0x248   : > { %v6659_v47 = vadd.f32 %v1594_v13, %v1480_v24  ;;  %v1652_v61 = vadd.f32 %v1651_v2, %v9369_v44  ;;  %2836 = vmatpush.msra.mxu1 %v6434_v26  ;;  %v9370_v13 = vand.u32 4294901760, %v6469_v55  ;;  %v2153_v26 = vsub.f32 %v6651_v46, %v2152_v0  ;;  %v9379_v2 = vld [vmem:[#allocation13_spill] sm:$0xff] }
 0x249   : > { %2368 = vmatmul.f32.gmra.mxu1 %v6633_v54  ;;  %v6684_v55 = vsub.f32 %v2042_v18, %v6667_v1  ;;  %v9377_v18 = vld [vmem:[#allocation18_spill] sm:$0xff] }
 0x24a   : > { %v1602_v37 = vpop.f32.mrf.mxu3  ;;  %2737 = vmatpush.msra.mxu0 %v9370_v13  ;;  %v6672_v59 = vadd.f32 %v1751_v51, %v1652_v61  ;;  %2838 = vmatpush.msra.mxu1 %v6458_v21  ;;  %v9373_v21 = vand.u32 4294901760, %v6512_v53  ;;  %v1273_v45 = vadd.f32 %v9378_v27, %v9377_v18 }
 0x24b   : > { %2147 = vmatmul.f32.gmra.mxu0 %v2146_v36  ;;  %v2160_v53 = vand.u32 4294901760, %v6684_v55 }
 0x24c   : > { %1894 = vmatmul.f32.gmra.mxu2 %v5982_v29  ;;  %2741 = vmatpush.msra.mxu0 %v2349_v33  ;;  %v1355_v44 = vadd.f32 %v9380_v25, %v1273_v45  ;;  %v2018_v45 = vld [vmem:[%s5316_s27 + $0x70] sm:$0xff] }
 0x24d   : > { %2840 = vmatpush.msra.mxu1 %v6492_v16  ;;  %v2154_v16 = vand.u32 4294901760, %v2153_v26  ;;  %v2161_v20 = vsub.f32 %v6684_v55, %v2160_v53  ;;  %v9381_v26 = vld [vmem:[#allocation22_spill] sm:$0xff] }
 0x24e   : > { %v1763_v62 = vpop.f32.mrf.mxu1  ;;  %2745 = vmatpush.msra.mxu0 %v9373_v21  ;;  %v9382_v21 = vld [vmem:[#allocation55_spill] sm:$0xff] }
 0x24f   : > { %v1488_v29 = vpop.f32.mrf.mxu2  ;;  %1984 = vmatmul.f32.gmra.mxu3 %v9374_v43  ;;  %2842 = vmatpush.msra.mxu1 %v6495_v50  ;;  %v1656_v51 = vpop.f32.mrf.mxu0  ;;  %v6704_v50 = vsub.f32 %v2044_v28, %v6694_v10  ;;  %v2162_v36 = vand.u32 4294901760, %v2161_v20  ;;  %v2016_v28 = vld [vmem:[%s5316_s27 + $0x60] sm:$0xff] }
 0x250   : > { %v6691_v33 = vadd.f32 %v1598_v32, %v1488_v29  ;;  %v1657_v49 = vadd.f32 %v1656_v51, %v9376_v12  ;;  %v2046_v32 = vmul.f32 %v2014_v63, %v1351_v48  ;;  %v2048_v31 = vmul.f32 %v2016_v28, %v1355_v44  ;;  %v9383_v48 = vld [vmem:[#allocation17_spill] sm:$0xff]  ;;  %v9388_v28 = vld [vmem:[#allocation12_spill] sm:$0xff] }
 0x251   : > { %2372 = vmatmul.f32.gmra.mxu1 %v6667_v1  ;;  %v1277_v29 = vadd.f32 %v9382_v21, %v9381_v26 }
 0x252   : > { %v1606_v7 = vpop.f32.mrf.mxu3  ;;  %v6700_v3 = vadd.f32 %v1757_v6, %v1657_v49  ;;  %v6718_v13 = vand.u32 4294901760, %v2046_v32  ;;  %v9384_v49 = vld [vmem:[#allocation24_spill] sm:$0xff]  ;;  %v6739_v27 = vand.u32 4294901760, %v2048_v31 }
 0x253   : > { %2155 = vmatmul.f32.gmra.mxu0 %v2154_v16  ;;  %v1359_v16 = vadd.f32 %v9384_v49, %v1277_v29 }
 0x254   : > { %1898 = vmatmul.f32.gmra.mxu2 %v9366_v40  ;;  %v9096_v40 = vand.u32 4294901760, %v6704_v50  ;;  %v6730_v51 = vsub.f32 %v2046_v32, %v6718_v13 }
 0x255   : > { %v2050_v25 = vmul.f32 %v2018_v45, %v1359_v16 }
 0x256   : > { %v1769_v24 = vpop.f32.mrf.mxu1  ;;  %v9094_v18 = vand.u32 4294901760, %v6730_v51 }
 0x257   : > { %v1496_v60 = vpop.f32.mrf.mxu2  ;;  %1988 = vmatmul.f32.gmra.mxu3 %v9379_v2  ;;  %v1661_v41 = vpop.f32.mrf.mxu0 }
 0x258   : > { %v6712_v6 = vadd.f32 %v1602_v37, %v1496_v60  ;;  %v1662_v61 = vadd.f32 %v1661_v41, %v6503_v11  ;;  %v2169_v37 = vsub.f32 %v6704_v50, %v9096_v40  ;;  %v9387_v60 = vld [vmem:[#allocation42_spill] sm:$0xff] }
 0x259   : > { %2376 = vmatmul.f32.gmra.mxu1 %v6694_v10 }
 0x25a   : > { %v1610_v52 = vpop.f32.mrf.mxu3  ;;  %v6721_v23 = vadd.f32 %v1763_v62, %v1662_v61  ;;  %v6751_v61 = vsub.f32 %v2048_v31, %v6739_v27 }
 0x25b   : > { %2163 = vmatmul.f32.gmra.mxu0 %v2162_v36 }
 0x25c   : > { %1902 = vmatmul.f32.gmra.mxu2 %v9374_v43  ;;  %v2170_v43 = vand.u32 4294901760, %v2169_v37  ;;  %v9389_v37 = vld [vmem:[#allocation28_spill] sm:$0xff] }
 0x25e   : > { %v1775_v11 = vpop.f32.mrf.mxu1 }
 0x25f   : > { %v1504_v35 = vpop.f32.mrf.mxu2  ;;  %1992 = vmatmul.f32.gmra.mxu3 %v9383_v48  ;;  %v1666_v12 = vpop.f32.mrf.mxu0 }
 0x260   : > { %v6733_v62 = vadd.f32 %v1606_v7, %v1504_v35  ;;  %v1667_v63 = vadd.f32 %v1666_v12, %v6539_v34  ;;  %v9386_v7 = vld [vmem:[#allocation15_spill] sm:$0xff]  ;;  %v2177_v34 = vsub.f32 %v6730_v51, %v9094_v18  ;;  %v9090_v12 = vand.u32 4294901760, %v6751_v61 }
 0x261   : > { %2380 = vmatmul.f32.gmra.mxu1 %v6718_v13  ;;  %v1281_v41 = vadd.f32 %v9387_v60, %v9386_v7 }
 0x262   : > { %v1614_v32 = vpop.f32.mrf.mxu3  ;;  %v6742_v20 = vadd.f32 %v1769_v24, %v1667_v63  ;;  %v2178_v35 = vand.u32 4294901760, %v2177_v34  ;;  %v9392_v63 = vld [vmem:[#allocation57_spill] sm:$0xff]  ;;  %v9393_v34 = vld [vmem:[#allocation14_spill] sm:$0xff] }
 0x263   : > { %2171 = vmatmul.f32.gmra.mxu0 %v2170_v43  ;;  %v1363_v24 = vadd.f32 %v9389_v37, %v1281_v41  ;;  %v6761_v43 = vand.u32 4294901760, %v2050_v25  ;;  %v9394_v37 = vld [vmem:[#allocation31_spill] sm:$0xff] }
 0x264   : > { %9385 = vst [vmem:[#allocation40_spill] sm:$0xff] %v6742_v20  ;;  %1906 = vmatmul.f32.gmra.mxu2 %v9379_v2  ;;  %v2020_v2 = vld [vmem:[%s5316_s27 + $0x80] sm:$0xff] }
 0x265   : > { %v2052_v16 = vmul.f32 %v2020_v2, %v1363_v24  ;;  %v6772_v60 = vsub.f32 %v2050_v25, %v6761_v43 }
 0x266   : > { %v1781_v44 = vpop.f32.mrf.mxu1 }
 0x267   : > { %v1512_v36 = vpop.f32.mrf.mxu2  ;;  %1996 = vmatmul.f32.gmra.mxu3 %v9388_v28  ;;  %v1671_v21 = vpop.f32.mrf.mxu0 }
 0x268   : > { %v6755_v26 = vadd.f32 %v1610_v52, %v1512_v36  ;;  %v1672_v29 = vadd.f32 %v1671_v21, %v6566_v15  ;;  %v9391_v52 = vld [vmem:[#allocation26_spill] sm:$0xff]  ;;  %v2185_v15 = vsub.f32 %v6751_v61, %v9090_v12 }
 0x269   : > { %2384 = vmatmul.f32.gmra.mxu1 %v6739_v27  ;;  %v1285_v45 = vadd.f32 %v9392_v63, %v9391_v52  ;;  %v9397_v12 = vld [vmem:[#allocation58_spill] sm:$0xff] }
 0x26a   : > { %v1618_v31 = vpop.f32.mrf.mxu3  ;;  %v6763_v49 = vadd.f32 %v1775_v11, %v1672_v29  ;;  %v2186_v2 = vand.u32 4294901760, %v2185_v15  ;;  %v9091_v29 = vand.u32 4294901760, %v6772_v60 }
 0x26b   : > { %2179 = vmatmul.f32.gmra.mxu0 %v2178_v35  ;;  %v1367_v24 = vadd.f32 %v9394_v37, %v1285_v45  ;;  %v2022_v35 = vld [vmem:[%s5316_s27 + $0x90] sm:$0xff] }
 0x26c   : > { %9390 = vst [vmem:[#allocation23_spill] sm:$0xff] %v6763_v49  ;;  %1910 = vmatmul.f32.gmra.mxu2 %v9383_v48  ;;  %v6778_v48 = vand.u32 4294901760, %v2052_v16 }
 0x26d   : > { %v2054_v63 = vmul.f32 %v2022_v35, %v1367_v24  ;;  %v2024_v35 = vld [vmem:[%s5316_s27 + $0xa0] sm:$0xff] }
 0x26e   : > { %v1787_v7 = vpop.f32.mrf.mxu1 }
 0x26f   : > { %v1520_v41 = vpop.f32.mrf.mxu2  ;;  %2000 = vmatmul.f32.gmra.mxu3 %v9393_v34  ;;  %v1676_v36 = vpop.f32.mrf.mxu0 }
 0x270   : > { %v6775_v11 = vadd.f32 %v1614_v32, %v1520_v41  ;;  %v1677_v21 = vadd.f32 %v1676_v36, %v6595_v30  ;;  %v6788_v32 = vsub.f32 %v2052_v16, %v6778_v48  ;;  %v9396_v41 = vld [vmem:[#allocation47_spill] sm:$0xff]  ;;  %v2193_v30 = vsub.f32 %v6772_v60, %v9091_v29  ;;  %v9398_v36 = vld [vmem:[#allocation33_spill] sm:$0xff] }
 0x271   : > { %2388 = vmatmul.f32.gmra.mxu1 %v6761_v43  ;;  %v1289_v45 = vadd.f32 %v9397_v12, %v9396_v41 }
 0x272   : > { %v1622_v25 = vpop.f32.mrf.mxu3  ;;  %v6784_v52 = vadd.f32 %v1781_v44, %v1677_v21  ;;  %v9092_v16 = vand.u32 4294901760, %v6788_v32  ;;  %v2194_v21 = vand.u32 4294901760, %v2193_v30 }
 0x273   : > { %2187 = vmatmul.f32.gmra.mxu0 %v2186_v2  ;;  %v1371_v24 = vadd.f32 %v9398_v36, %v1289_v45  ;;  %v6803_v2 = vand.u32 4294901760, %v2054_v63  ;;  %v9400_v45 = vld [vmem:[#allocation50_spill] sm:$0xff] }
 0x274   : > { %9395 = vst [vmem:[#allocation16_spill] sm:$0xff] %v6784_v52  ;;  %1914 = vmatmul.f32.gmra.mxu2 %v9388_v28 }
 0x276   : > { %v1793_v37 = vpop.f32.mrf.mxu1 }
 0x277   : > { %v1528_v15 = vpop.f32.mrf.mxu2  ;;  %2588 = vmatmul.f32.vlgmr.msra.gmra.mxu3 %v2136_v58  ;;  %v1681_v28 = vpop.f32.mrf.mxu0  ;;  %v2201_v58 = vsub.f32 %v6788_v32, %v9092_v16 }
 0x278   : > { %v6797_v44 = vadd.f32 %v1618_v31, %v1528_v15  ;;  %v1682_v12 = vadd.f32 %v1681_v28, %v6625_v19  ;;  %v2056_v31 = vmul.f32 %v2024_v35, %v1371_v24  ;;  %v9401_v15 = vld [vmem:[#allocation59_spill] sm:$0xff]  ;;  %v6817_v28 = vsub.f32 %v2054_v63, %v6803_v2 }
 0x279   : > { %2392 = vmatmul.f32.gmra.mxu1 %v6778_v48  ;;  %v1293_v19 = vadd.f32 %v9401_v15, %v9400_v45  ;;  %v2026_v63 = vld [vmem:[%s5316_s27 + $0xb0] sm:$0xff] }
 0x27a   : > { %v6806_v41 = vpop.f32.mrf.mxu3  ;;  %v6808_v29 = vadd.f32 %v1787_v7, %v1682_v12  ;;  %v2202_v12 = vand.u32 4294901760, %v2201_v58  ;;  %v9093_v35 = vand.u32 4294901760, %v6817_v28  ;;  %v6827_v45 = vand.u32 4294901760, %v2056_v31 }
 0x27b   : > { %2195 = vmatmul.f32.gmra.mxu0 %v2194_v21  ;;  %v9402_v21 = vld [vmem:[#allocation39_spill] sm:$0xff] }
 0x27c   : > { %9399 = vst [vmem:[#allocation27_spill] sm:$0xff] %v6808_v29  ;;  %1918 = vmatmul.f32.gmra.mxu2 %v9393_v34  ;;  %v1375_v16 = vadd.f32 %v9402_v21, %v1293_v19 }
 0x27d   : > { %9403 = vst [vmem:[#allocation21_spill] sm:$0xff] %v6827_v45 }
 0x27e   : > { %v1799_v30 = vpop.f32.mrf.mxu1 }
 0x27f   : > { %v1536_v36 = vpop.f32.mrf.mxu2  ;;  %2594 = vmatmul.f32.gmra.mxu3 %v2144_v57  ;;  %v1686_v34 = vpop.f32.mrf.mxu0 }
 0x280   : > { %v6821_v7 = vadd.f32 %v1622_v25, %v1536_v36  ;;  %v1687_v24 = vadd.f32 %v1686_v34, %v6659_v47  ;;  %v9405_v25 = vld [vmem:[#allocation52_spill] sm:$0xff]  ;;  %v2058_v36 = vmul.f32 %v2026_v63, %v1375_v16  ;;  %v2209_v47 = vsub.f32 %v6817_v28, %v9093_v35 }
 0x281   : > { %2396 = vmatmul.f32.gmra.mxu1 %v6803_v2  ;;  %v1297_v58 = vadd.f32 %v6505_v17, %v9405_v25  ;;  %v6841_v34 = vsub.f32 %v2056_v31, %v6827_v45  ;;  %v2028_v17 = vld [vmem:[%s5316_s27 + $0xc0] sm:$0xff] }
 0x282   : > { %v6830_v15 = vpop.f32.mrf.mxu3  ;;  %v6832_v57 = vadd.f32 %v1793_v37, %v1687_v24  ;;  %v9406_v37 = vld [vmem:[#allocation41_spill] sm:$0xff]  ;;  %v2210_v16 = vand.u32 4294901760, %v2209_v47  ;;  %v6852_v25 = vand.u32 4294901760, %v2058_v36 }
 0x283   : > { %2203 = vmatmul.f32.gmra.mxu0 %v2202_v12  ;;  %v1379_v12 = vadd.f32 %v9406_v37, %v1297_v58  ;;  %v9095_v63 = vand.u32 4294901760, %v6841_v34  ;;  %v9409_v58 = vld [vmem:[#allocation54_spill] sm:$0xff] }
 0x284   : > { %9404 = vst [vmem:[#allocation30_spill] sm:$0xff] %v6832_v57  ;;  %2474 = vmatmul.f32.vlgmr.msra.gmra.mxu2 %v6582_v22  ;;  %v1301_v37 = vadd.f32 %v6541_v56, %v9409_v58  ;;  %v6865_v47 = vsub.f32 %v2058_v36, %v6852_v25  ;;  %v2030_v58 = vld [vmem:[%s5316_s27 + $0xd0] sm:$0xff] }
 0x285   : > { %9407 = vst [vmem:[#allocation25_spill] sm:$0xff] %v6852_v25 }
 0x286   : > { %v1805_v19 = vpop.f32.mrf.mxu1 }
 0x287   : > { %v6843_v21 = vpop.f32.mrf.mxu2  ;;  %2600 = vmatmul.f32.gmra.mxu3 %v2152_v0  ;;  %v1691_v24 = vpop.f32.mrf.mxu0  ;;  %v2060_v0 = vmul.f32 %v2028_v17, %v1379_v12  ;;  %v9411_v12 = vld [vmem:[#allocation19_spill] sm:$0xff] }
 0x288   : > { %v1692_v22 = vadd.f32 %v1691_v24, %v6691_v33  ;;  %v2217_v33 = vsub.f32 %v6841_v34, %v9095_v63  ;;  %v1383_v56 = vadd.f32 %v9411_v12, %v1301_v37 }
 0x289   : > { %2400 = vmatmul.f32.gmra.mxu1 %v6827_v45 }
 0x28a   : > { %v6854_v31 = vpop.f32.mrf.mxu3  ;;  %v6856_v35 = vadd.f32 %v1799_v30, %v1692_v22  ;;  %v2218_v22 = vand.u32 4294901760, %v2217_v33  ;;  %v2062_v40 = vmul.f32 %v2030_v58, %v1383_v56 }
 0x28b   : > { %2211 = vmatmul.f32.gmra.mxu0 %v2210_v16  ;;  %v9097_v16 = vand.u32 4294901760, %v6865_v47 }
 0x28c   : > { %9408 = vst [vmem:[#allocation43_spill] sm:$0xff] %v6856_v35  ;;  %2479 = vmatmul.f32.gmra.mxu2 %v6618_v42  ;;  %v6872_v42 = vand.u32 4294901760, %v2060_v0  ;;  %v9413_v35 = vld [vmem:[#allocation56_spill] sm:$0xff] }
 0x28d   : > { %v1305_v37 = vadd.f32 %v6568_v39, %v9413_v35  ;;  %v2225_v33 = vsub.f32 %v6865_v47, %v9097_v16  ;;  %v6899_v35 = vand.u32 4294901760, %v2062_v40 }
 0x28e   : > { %v1811_v18 = vpop.f32.mrf.mxu1  ;;  %9410 = vst [vmem:[#allocation29_spill] sm:$0xff] %v6872_v42 }
 0x28f   : > { %v6867_v24 = vpop.f32.mrf.mxu2  ;;  %2606 = vmatmul.f32.gmra.mxu3 %v2160_v53  ;;  %v6884_v53 = vsub.f32 %v2060_v0, %v6872_v42  ;;  %v1387_v0 = vadd.f32 %v6531_v14, %v1305_v37  ;;  %v2226_v39 = vand.u32 4294901760, %v2225_v33  ;;  %9415 = vst [vmem:[#allocation45_spill] sm:$0xff] %v6899_v35  ;;  %v9418_v14 = vld [vmem:[#allocation36_spill] sm:$0xff]  ;;  %v6913_v33 = vsub.f32 %v2062_v40, %v6899_v35 }
 0x290   : > { %v1696_v30 = vpop.f32.mrf.mxu0 }
 0x291   : > { %2404 = vmatmul.f32.gmra.mxu1 %v6852_v25  ;;  %v1697_v17 = vadd.f32 %v1696_v30, %v6712_v6  ;;  %v2087_v25 = vld [vmem:[%s9038_s3 + $0x98] sm:$0xff]  ;;  %v9461_v20 = vand.u32 4294901760, %v6913_v33 }
 0x292   : > { %v6878_v36 = vpop.f32.mrf.mxu3 }
 0x293   : > { %2219 = vmatmul.f32.gmra.mxu0 %v2218_v22  ;;  %v6880_v63 = vadd.f32 %v1805_v19, %v1697_v17  ;;  %v9414_v19 = vand.u32 4294901760, %v6704_v50  ;;  %v2032_v17 = vld [vmem:[%s5316_s27 + $0xe0] sm:$0xff] }
 0x294   : > { %2484 = vmatmul.f32.gmra.mxu2 %v6651_v46  ;;  %v9098_v46 = vand.u32 4294901760, %v6884_v53  ;;  %v2064_v16 = vmul.f32 %v2032_v17, %v1387_v0  ;;  %v9099_v17 = vand.u32 4294901760, %v6913_v33 }
 0x295   : > { %9412 = vst [vmem:[#allocation44_spill] sm:$0xff] %v6880_v63 }
 0x296   : > { %v1817_v6 = vpop.f32.mrf.mxu1 }
 0x297   : > { %v6891_v30 = vpop.f32.mrf.mxu2  ;;  %2612 = vmatmul.f32.gmra.mxu3 %v9414_v19  ;;  %v2233_v19 = vsub.f32 %v6884_v53, %v9098_v46 }
 0x298   : > { %v1701_v12 = vpop.f32.mrf.mxu0 }
 0x299   : > { %2408 = vmatmul.f32.gmra.mxu1 %v6872_v42  ;;  %v1702_v56 = vadd.f32 %v1701_v12, %v6733_v62  ;;  %v1309_v62 = vadd.f32 %v6597_v38, %v9418_v14  ;;  %v6923_v38 = vand.u32 4294901760, %v2064_v16  ;;  %v2034_v14 = vld [vmem:[%s5316_s27 + $0xf0] sm:$0xff] }
 0x29a   : > { %v6902_v22 = vpop.f32.mrf.mxu3 }
 0x29b   : > { %9416 = vst [vmem:[#allocation49_spill] sm:$0xff] %v6902_v22  ;;  %2227 = vmatmul.f32.gmra.mxu0 %v2226_v39  ;;  %v6904_v58 = vadd.f32 %v1811_v18, %v1702_v56  ;;  %v9419_v18 = vand.u32 4294901760, %v6730_v51  ;;  %v2234_v39 = vand.u32 4294901760, %v2233_v19  ;;  %v2099_v19 = vld [vmem:[%s9038_s3 + $0xf8] sm:$0xff] }
 0x29c   : > { %2489 = vmatmul.f32.gmra.mxu2 %v6684_v55  ;;  %v1391_v55 = vadd.f32 %v6555_v9, %v1309_v62  ;;  %9420 = vst [vmem:[#allocation46_spill] sm:$0xff] %v6923_v38  ;;  %v6938_v62 = vsub.f32 %v2064_v16, %v6923_v38 }
 0x29d   : > { %9417 = vst [vmem:[#allocation35_spill] sm:$0xff] %v6904_v58 }
 0x29e   : > { %v1823_v37 = vpop.f32.mrf.mxu1  ;;  %v9100_v16 = vand.u32 4294901760, %v6938_v62 }
 0x29f   : > { %v6915_v12 = vpop.f32.mrf.mxu2  ;;  %2618 = vmatmul.f32.gmra.mxu3 %v9419_v18  ;;  %v2066_v18 = vmul.f32 %v2034_v14, %v1391_v55 }
 0x2a0   : > { %v1706_v56 = vpop.f32.mrf.mxu0 }
 0x2a1   : > { %2412 = vmatmul.f32.gmra.mxu1 %v6899_v35  ;;  %v1707_v0 = vadd.f32 %v1706_v56, %v6755_v26  ;;  %v2241_v26 = vsub.f32 %v6913_v33, %v9099_v17  ;;  %v6940_v56 = vand.u32 4294901760, %v2099_v19  ;;  %v6953_v17 = vand.u32 4294901760, %v2066_v18  ;;  %v2094_v35 = vld [vmem:[%s9038_s3 + $0xd0] sm:$0xff] }
 0x2a2   : > { %v6926_v40 = vpop.f32.mrf.mxu3 }
 0x2a3   : > { %9421 = vst [vmem:[#allocation34_spill] sm:$0xff] %v6926_v40  ;;  %2235 = vmatmul.f32.gmra.mxu0 %v2234_v39  ;;  %v6928_v46 = vadd.f32 %v1817_v6, %v1707_v0  ;;  %v9424_v6 = vand.u32 4294901760, %v6751_v61  ;;  %2909 = vmatpush.msrb.mxu2 %v6940_v56  ;;  %v2242_v14 = vand.u32 4294901760, %v2241_v26  ;;  %v6970_v58 = vsub.f32 %v2066_v18, %v6953_v17 }
 0x2a4   : > { %2494 = vmatmul.f32.gmra.mxu2 %v6704_v50  ;;  %v6948_v50 = vsub.f32 %v2099_v19, %v6940_v56  ;;  %9425 = vst [vmem:[#allocation38_spill] sm:$0xff] %v6953_v17  ;;  %3360 = vmatpush.msrb.mxu1 %v6940_v56 }
 0x2a5   : > { %9422 = vst [vmem:[#allocation32_spill] sm:$0xff] %v6928_v46 }
 0x2a6   : > { %v1829_v9 = vpop.f32.mrf.mxu1  ;;  %3232 = vmatpush.msrb.mxu0 %v6948_v50  ;;  %v9103_v19 = vand.u32 4294901760, %v6948_v50 }
 0x2a7   : > { %v6942_v39 = vpop.f32.mrf.mxu2  ;;  %2624 = vmatmul.f32.gmra.mxu3 %v9424_v6 }
 0x2a8   : > { %9423 = vst [vmem:[#allocation51_spill] sm:$0xff] %v6942_v39  ;;  %v1711_v55 = vpop.f32.mrf.mxu0 }
 0x2a9   : > { %2416 = vmatmul.f32.gmra.mxu1 %v6923_v38  ;;  %v1712_v0 = vadd.f32 %v1711_v55, %v6775_v11  ;;  %v2098_v11 = vld [vmem:[%s9038_s3 + $0xf0] sm:$0xff]  ;;  %v2249_v55 = vsub.f32 %v6938_v62, %v9100_v16  ;;  %v9104_v38 = vand.u32 4294901760, %v6970_v58 }
 0x2aa   : > { %v6957_v6 = vpop.f32.mrf.mxu3  ;;  %v6972_v63 = vand.u32 4294901760, %v2098_v11 }
 0x2ab   : > { %9426 = vst [vmem:[#allocation48_spill] sm:$0xff] %v6957_v6  ;;  %2243 = vmatmul.f32.gmra.mxu0 %v2242_v14  ;;  %v6959_v46 = vadd.f32 %v1823_v37, %v1712_v0  ;;  %v9429_v0 = vand.u32 4294901760, %v6772_v60 }
 0x2ac   : > { %2499 = vmatmul.f32.gmra.mxu2 %v6730_v51  ;;  %v3072_v51 = vsub.f32 %v6948_v50, %v9103_v19  ;;  %3362 = vmatpush.msrb.mxu1 %v6972_v63 }
 0x2ad   : > { %9427 = vst [vmem:[#allocation37_spill] sm:$0xff] %v6959_v46  ;;  %2911 = vmatpush.msrb.mxu2 %v6972_v63  ;;  %v2250_v46 = vand.u32 4294901760, %v2249_v55 }
 0x2ae   : > { %v1835_v26 = vpop.f32.mrf.mxu1  ;;  %v3073_v16 = vand.u32 4294901760, %v3072_v51  ;;  %v2257_v51 = vsub.f32 %v6970_v58, %v9104_v38 }
 0x2af   : > { %v6977_v37 = vpop.f32.mrf.mxu2  ;;  %2630 = vmatmul.f32.gmra.mxu3 %v9429_v0  ;;  %v6992_v0 = vsub.f32 %v2098_v11, %v6972_v63 }
 0x2b0   : > { %9428 = vst [vmem:[#allocation18_spill] sm:$0xff] %v6977_v37  ;;  %v1716_v14 = vpop.f32.mrf.mxu0  ;;  %3074 = vmatpush.msrb.mxu3 %v3073_v16  ;;  %v2258_v38 = vand.u32 4294901760, %v2257_v51 }
 0x2b1   : > { %2420 = vmatmul.f32.gmra.mxu1 %v6953_v17  ;;  %v1717_v18 = vadd.f32 %v1716_v14, %v6797_v44  ;;  %v2097_v44 = vld [vmem:[%s9038_s3 + $0xe8] sm:$0xff]  ;;  %3235 = vmatpush.msrb.mxu0 %v6992_v0 }
 0x2b2   : > { %v6986_v57 = vpop.f32.mrf.mxu3  ;;  %v7002_v14 = vand.u32 4294901760, %v2097_v44 }
 0x2b3   : > { %9430 = vst [vmem:[#allocation53_spill] sm:$0xff] %v6986_v57  ;;  %2251 = vmatmul.f32.gmra.mxu0 %v2250_v46  ;;  %v6988_v19 = vadd.f32 %v1829_v9, %v1717_v18  ;;  %v9107_v46 = vand.u32 4294901760, %v6992_v0  ;;  %v9434_v9 = vand.u32 4294901760, %v6788_v32 }
 0x2b4   : > { %2504 = vmatmul.f32.gmra.mxu2 %v6751_v61  ;;  %3364 = vmatpush.msrb.mxu1 %v7002_v14 }
 0x2b5   : > { %9431 = vst [vmem:[#allocation13_spill] sm:$0xff] %v6988_v19  ;;  %2913 = vmatpush.msrb.mxu2 %v7002_v14  ;;  %v3078_v11 = vsub.f32 %v6992_v0, %v9107_v46  ;;  %v2096_v46 = vld [vmem:[%s9038_s3 + $0xe0] sm:$0xff] }
 0x2b6   : > { %v6997_v55 = vpop.f32.mrf.mxu1  ;;  %v7030_v51 = vand.u32 4294901760, %v2096_v46 }
 0x2b7   : > { %9432 = vst [vmem:[#allocation20_spill] sm:$0xff] %v6997_v55  ;;  %v7006_v61 = vpop.f32.mrf.mxu2  ;;  %2636 = vmatmul.f32.gmra.mxu3 %v9434_v9  ;;  %v3079_v17 = vand.u32 4294901760, %v3078_v11  ;;  %v7023_v9 = vsub.f32 %v2097_v44, %v7002_v14 }
 0x2b8   : > { %9433 = vst [vmem:[#allocation22_spill] sm:$0xff] %v7006_v61  ;;  %v1721_v16 = vpop.f32.mrf.mxu0  ;;  %2915 = vmatpush.msrb.mxu2 %v7030_v51  ;;  %3366 = vmatpush.msrb.mxu1 %v7030_v51 }
 0x2b9   : > { %2844 = vmatmul.f32.vlgmr.msra.gmra.mxu1 %v6564_v4  ;;  %v1722_v18 = vadd.f32 %v1721_v16, %v6821_v7  ;;  %3080 = vmatpush.msrb.mxu3 %v3079_v17  ;;  %v9108_v16 = vand.u32 4294901760, %v7023_v9 }
 0x2ba   : > { %v7017_v19 = vpop.f32.mrf.mxu3  ;;  %3238 = vmatpush.msrb.mxu0 %v7023_v9 }
 0x2bb   : > { %9435 = vst [vmem:[#allocation55_spill] sm:$0xff] %v7017_v19  ;;  %2259 = vmatmul.f32.gmra.mxu0 %v2258_v38  ;;  %v7019_v57 = vadd.f32 %v1835_v26, %v1722_v18  ;;  %v3084_v26 = vsub.f32 %v7023_v9, %v9108_v16  ;;  %v7051_v18 = vsub.f32 %v2096_v46, %v7030_v51 }
 0x2bc   : > { %2509 = vmatmul.f32.gmra.mxu2 %v6772_v60  ;;  %v9439_v60 = vand.u32 4294901760, %v6817_v28 }
 0x2bd   : > { %9436 = vst [vmem:[#allocation17_spill] sm:$0xff] %v7019_v57  ;;  %v3085_v11 = vand.u32 4294901760, %v3084_v26  ;;  %v9111_v19 = vand.u32 4294901760, %v7051_v18  ;;  %3241 = vmatpush.msrb.mxu0 %v7051_v18 }
 0x2be   : > { %v7028_v7 = vpop.f32.mrf.mxu1 }
 0x2bf   : > { %9437 = vst [vmem:[#allocation24_spill] sm:$0xff] %v7028_v7  ;;  %v7034_v38 = vpop.f32.mrf.mxu2  ;;  %2642 = vmatmul.f32.gmra.mxu3 %v9439_v60  ;;  %v2095_v60 = vld [vmem:[%s9038_s3 + $0xd8] sm:$0xff] }
 0x2c0   : > { %9438 = vst [vmem:[#allocation15_spill] sm:$0xff] %v7034_v38  ;;  %v7039_v17 = vpop.f32.mrf.mxu0  ;;  %3086 = vmatpush.msrb.mxu3 %v3085_v11  ;;  %v7058_v16 = vand.u32 4294901760, %v2095_v60  ;;  %v3090_v11 = vsub.f32 %v7051_v18, %v9111_v19  ;;  %v7089_v19 = vand.u32 4294901760, %v2094_v35 }
 0x2c1   : > { %2848 = vmatmul.f32.gmra.mxu1 %v6601_v8 }
 0x2c2   : > { %v7046_v44 = vpop.f32.mrf.mxu3  ;;  %2917 = vmatpush.msrb.mxu2 %v7058_v16  ;;  %3368 = vmatpush.msrb.mxu1 %v7058_v16  ;;  %v7109_v6 = vsub.f32 %v2094_v35, %v7089_v19 }
 0x2c3   : > { %9440 = vst [vmem:[#allocation42_spill] sm:$0xff] %v7046_v44  ;;  %2747 = vmatmul.f32.vlgmr.msra.gmra.mxu0 %v6564_v4  ;;  %v9443_v4 = vand.u32 4294901760, %v6841_v34 }
 0x2c4   : > { %2514 = vmatmul.f32.gmra.mxu2 %v6788_v32  ;;  %v7068_v32 = vsub.f32 %v2095_v60, %v7058_v16  ;;  %3370 = vmatpush.msrb.mxu1 %v7089_v19  ;;  %v9115_v52 = vand.u32 4294901760, %v7109_v6 }
 0x2c5   : > { %2919 = vmatpush.msrb.mxu2 %v7089_v19 }
 0x2c6   : > { %v7056_v57 = vpop.f32.mrf.mxu1  ;;  %v9112_v44 = vand.u32 4294901760, %v7068_v32  ;;  %3244 = vmatpush.msrb.mxu0 %v7068_v32 }
 0x2c7   : > { %9441 = vst [vmem:[#allocation12_spill] sm:$0xff] %v7056_v57  ;;  %v7062_v26 = vpop.f32.mrf.mxu2  ;;  %2648 = vmatmul.f32.gmra.mxu3 %v9443_v4  ;;  %v9448_v57 = vand.u32 4294901760, %v6865_v47 }
 0x2c8   : > { %9442 = vst [vmem:[#allocation28_spill] sm:$0xff] %v7062_v26  ;;  %v7070_v46 = vpop.f32.mrf.mxu0  ;;  %v3091_v26 = vand.u32 4294901760, %v3090_v11  ;;  %v3096_v60 = vsub.f32 %v7068_v32, %v9112_v44  ;;  %v2091_v11 = vld [vmem:[%s9038_s3 + $0xb8] sm:$0xff]  ;;  %3247 = vmatpush.msrb.mxu0 %v7109_v6 }
 0x2c9   : > { %9444 = vst [vmem:[#allocation26_spill] sm:$0xff] %v7070_v46  ;;  %2852 = vmatmul.f32.gmra.mxu1 %v6633_v54  ;;  %v7179_v46 = vand.u32 4294901760, %v2087_v25 }
 0x2ca   : > { %v7079_v4 = vpop.f32.mrf.mxu3  ;;  %3092 = vmatpush.msrb.mxu3 %v3091_v26  ;;  %v3097_v38 = vand.u32 4294901760, %v3096_v60  ;;  %v7106_v26 = vand.u32 4294901760, %v2091_v11 }
 0x2cb   : > { %9445 = vst [vmem:[#allocation57_spill] sm:$0xff] %v7079_v4  ;;  %2751 = vmatmul.f32.gmra.mxu0 %v6601_v8  ;;  %v2093_v4 = vld [vmem:[%s9038_s3 + $0xc8] sm:$0xff]  ;;  %v2092_v8 = vld [vmem:[%s9038_s3 + $0xc0] sm:$0xff] }
 0x2cc   : > { %2519 = vmatmul.f32.gmra.mxu2 %v6817_v28  ;;  %v7102_v29 = vand.u32 4294901760, %v2093_v4  ;;  %v7104_v28 = vand.u32 4294901760, %v2092_v8  ;;  %v7124_v61 = vsub.f32 %v2091_v11, %v7106_v26  ;;  %3098 = vmatpush.msrb.mxu3 %v3097_v38  ;;  %v3102_v11 = vsub.f32 %v7109_v6, %v9115_v52 }
 0x2ce   : > { %v7100_v44 = vpop.f32.mrf.mxu1  ;;  %v7118_v60 = vsub.f32 %v2093_v4, %v7102_v29  ;;  %2921 = vmatpush.msrb.mxu2 %v7102_v29  ;;  %3372 = vmatpush.msrb.mxu1 %v7102_v29  ;;  %v3103_v52 = vand.u32 4294901760, %v3102_v11 }
 0x2cf   : > { %9446 = vst [vmem:[#allocation14_spill] sm:$0xff] %v7100_v44  ;;  %v7113_v42 = vpop.f32.mrf.mxu2  ;;  %2654 = vmatmul.f32.gmra.mxu3 %v9448_v57  ;;  %v7121_v44 = vsub.f32 %v2092_v8, %v7104_v28 }
 0x2d0   : > { %9447 = vst [vmem:[#allocation31_spill] sm:$0xff] %v7113_v42  ;;  %v7126_v35 = vpop.f32.mrf.mxu0  ;;  %v9116_v42 = vand.u32 4294901760, %v7118_v60  ;;  %2923 = vmatpush.msrb.mxu2 %v7104_v28  ;;  %3374 = vmatpush.msrb.mxu1 %v7104_v28 }
 0x2d1   : > { %9449 = vst [vmem:[#allocation47_spill] sm:$0xff] %v7126_v35  ;;  %2856 = vmatmul.f32.gmra.mxu1 %v6667_v1  ;;  %v9117_v57 = vand.u32 4294901760, %v7121_v44  ;;  %v9451_v35 = vand.u32 4294901760, %v7124_v61  ;;  %3250 = vmatpush.msrb.mxu0 %v7118_v60 }
 0x2d2   : > { %v7135_v8 = vpop.f32.mrf.mxu3  ;;  %v3108_v38 = vsub.f32 %v7118_v60, %v9116_v42  ;;  %v2089_v42 = vld [vmem:[%s9038_s3 + $0xa8] sm:$0xff]  ;;  %2925 = vmatpush.msrb.mxu2 %v7106_v26  ;;  %3104 = vmatpush.msrb.mxu3 %v3103_v52 }
 0x2d3   : > { %9450 = vst [vmem:[#allocation58_spill] sm:$0xff] %v7135_v8  ;;  %2755 = vmatmul.f32.gmra.mxu0 %v6633_v54  ;;  %v3114_v4 = vsub.f32 %v7121_v44, %v9117_v57  ;;  %v2090_v8 = vld [vmem:[%s9038_s3 + $0xb0] sm:$0xff]  ;;  %v3120_v54 = vsub.f32 %v7124_v61, %v9451_v35  ;;  %v2088_v57 = vld [vmem:[%s9038_s3 + $0xa0] sm:$0xff]  ;;  %v7170_v35 = vand.u32 4294901760, %v2089_v42  ;;  %3376 = vmatpush.msrb.mxu1 %v7106_v26 }
 0x2d4   : > { %2524 = vmatmul.f32.gmra.mxu2 %v6841_v34  ;;  %v7156_v40 = vand.u32 4294901760, %v2090_v8  ;;  %v3109_v11 = vand.u32 4294901760, %v3108_v38  ;;  %v7177_v49 = vand.u32 4294901760, %v2088_v57  ;;  %v9455_v38 = vand.u32 4294901760, %v6884_v53  ;;  %3253 = vmatpush.msrb.mxu0 %v7121_v44 }
 0x2d5   : > { %v3115_v7 = vand.u32 4294901760, %v3114_v4  ;;  %v3121_v4 = vand.u32 4294901760, %v3120_v54 }
 0x2d6   : > { %9452 = vst [vmem:[#allocation33_spill] sm:$0xff] %v7156_v40  ;;  %v7168_v34 = vpop.f32.mrf.mxu1  ;;  %v7175_v37 = vsub.f32 %v2090_v8, %v7156_v40  ;;  %2927 = vmatpush.msrb.mxu2 %v7156_v40  ;;  %3110 = vmatpush.msrb.mxu3 %v3109_v11  ;;  %v7195_v45 = vsub.f32 %v2088_v57, %v7177_v49 }
 0x2d7   : > { %9453 = vst [vmem:[#allocation50_spill] sm:$0xff] %v7168_v34  ;;  %v7182_v22 = vpop.f32.mrf.mxu2  ;;  %2660 = vmatmul.f32.gmra.mxu3 %v9455_v38  ;;  %v7187_v34 = vsub.f32 %v2089_v42, %v7170_v35  ;;  %3378 = vmatpush.msrb.mxu1 %v7156_v40 }
 0x2d8   : > { %9454 = vst [vmem:[#allocation59_spill] sm:$0xff] %v7182_v22  ;;  %v7190_v52 = vpop.f32.mrf.mxu0  ;;  %v9122_v8 = vand.u32 4294901760, %v7175_v37  ;;  %v7198_v22 = vsub.f32 %v2087_v25, %v7179_v46  ;;  %2929 = vmatpush.msrb.mxu2 %v7170_v35  ;;  %3116 = vmatpush.msrb.mxu3 %v3115_v7  ;;  %v9124_v11 = vand.u32 4294901760, %v7195_v45  ;;  %v2086_v7 = vld [vmem:[%s9038_s3 + $0x90] sm:$0xff] }
 0x2d9   : > { %9456 = vst [vmem:[#allocation39_spill] sm:$0xff] %v7190_v52  ;;  %2860 = vmatmul.f32.gmra.mxu1 %v6694_v10  ;;  %v9123_v38 = vand.u32 4294901760, %v7187_v34  ;;  %v2084_v52 = vld [vmem:[%s9038_s3 + $0x80] sm:$0xff]  ;;  %3256 = vmatpush.msrb.mxu0 %v7124_v61 }
 0x2da   : > { %v7203_v42 = vpop.f32.mrf.mxu3  ;;  %v3126_v54 = vsub.f32 %v7175_v37, %v9122_v8  ;;  %2931 = vmatpush.msrb.mxu2 %v7177_v49  ;;  %3122 = vmatpush.msrb.mxu3 %v3121_v4  ;;  %v3138_v57 = vsub.f32 %v7195_v45, %v9124_v11  ;;  %v7234_v4 = vand.u32 4294901760, %v2086_v7  ;;  %v7238_v11 = vand.u32 4294901760, %v2084_v52 }
 0x2db   : > { %9457 = vst [vmem:[#allocation52_spill] sm:$0xff] %v7203_v42  ;;  %2759 = vmatmul.f32.gmra.mxu0 %v6667_v1  ;;  %v3132_v25 = vsub.f32 %v7187_v34, %v9123_v38  ;;  %v9458_v1 = vand.u32 4294901760, %v7198_v22  ;;  %v2085_v38 = vld [vmem:[%s9038_s3 + $0x88] sm:$0xff]  ;;  %3380 = vmatpush.msrb.mxu1 %v7170_v35 }
 0x2dc   : > { %2529 = vmatmul.f32.gmra.mxu2 %v6865_v47  ;;  %v3127_v8 = vand.u32 4294901760, %v3126_v54  ;;  %v7236_v54 = vand.u32 4294901760, %v2085_v38  ;;  %v7254_v40 = vsub.f32 %v2084_v52, %v7238_v11  ;;  %3259 = vmatpush.msrb.mxu0 %v7175_v37 }
 0x2dd   : > { %v3144_v42 = vsub.f32 %v7198_v22, %v9458_v1  ;;  %v3133_v47 = vand.u32 4294901760, %v3132_v25  ;;  %2933 = vmatpush.msrb.mxu2 %v7179_v46  ;;  %v3139_v1 = vand.u32 4294901760, %v3138_v57  ;;  %v7248_v25 = vsub.f32 %v2086_v7, %v7234_v4  ;;  %3382 = vmatpush.msrb.mxu1 %v7177_v49 }
 0x2de   : > { %v7232_v55 = vpop.f32.mrf.mxu1  ;;  %3128 = vmatpush.msrb.mxu3 %v3127_v8  ;;  %v9128_v7 = vand.u32 4294901760, %v7254_v40  ;;  %3262 = vmatpush.msrb.mxu0 %v7187_v34 }
 0x2df   : > { %9459 = vst [vmem:[#allocation41_spill] sm:$0xff] %v7232_v55  ;;  %v7243_v39 = vpop.f32.mrf.mxu2  ;;  %2666 = vmatmul.f32.gmra.mxu3 %v9461_v20  ;;  %v7251_v55 = vsub.f32 %v2085_v38, %v7236_v54  ;;  %2935 = vmatpush.msrb.mxu2 %v7234_v4  ;;  %v3145_v57 = vand.u32 4294901760, %v3144_v42 }
 0x2e0   : > { %9460 = vst [vmem:[#allocation54_spill] sm:$0xff] %v7243_v39  ;;  %v7257_v8 = vpop.f32.mrf.mxu0  ;;  %3134 = vmatpush.msrb.mxu3 %v3133_v47  ;;  %v9126_v39 = vand.u32 4294901760, %v7248_v25  ;;  %v3162_v47 = vsub.f32 %v7254_v40, %v9128_v7  ;;  %3384 = vmatpush.msrb.mxu1 %v7179_v46 }
 0x2e1   : > { %2864 = vmatmul.f32.gmra.mxu1 %v6718_v13  ;;  %v9127_v20 = vand.u32 4294901760, %v7251_v55  ;;  %2937 = vmatpush.msrb.mxu2 %v7236_v54 }
 0x2e2   : > { %v7265_v52 = vpop.f32.mrf.mxu3  ;;  %3140 = vmatpush.msrb.mxu3 %v3139_v1  ;;  %v3150_v38 = vsub.f32 %v7248_v25, %v9126_v39  ;;  %v1860_v39 = vadd.f32 %v6843_v21, %v6639_v5  ;;  %3386 = vmatpush.msrb.mxu1 %v7234_v4  ;;  %v3163_v7 = vand.u32 4294901760, %v3162_v47 }
 0x2e3   : > { %9462 = vst [vmem:[#allocation19_spill] sm:$0xff] %v7265_v52  ;;  %2763 = vmatmul.f32.gmra.mxu0 %v6694_v10  ;;  %v3156_v42 = vsub.f32 %v7251_v55, %v9127_v20  ;;  %2939 = vmatpush.msrb.mxu2 %v7238_v11  ;;  %v9463_v52 = vand.u32 4294901760, %v6948_v50  ;;  %v9465_v50 = vand.u32 4294901760, %v6992_v0  ;;  %v9467_v0 = vand.u32 4294901760, %v6970_v58 }
 0x2e4   : > { %2534 = vmatmul.f32.gmra.mxu2 %v6884_v53  ;;  %3146 = vmatpush.msrb.mxu3 %v3145_v57  ;;  %v3151_v10 = vand.u32 4294901760, %v3150_v38  ;;  %v9464_v57 = vand.u32 4294901760, %v6938_v62  ;;  %v1942_v5 = vadd.f32 %v6806_v41, %v1860_v39  ;;  %v9466_v39 = vand.u32 4294901760, %v7023_v9  ;;  %v2007_v9 = vld [vmem:[%s5316_s27 + $0x18] sm:$0xff] }
 0x2e5   : > { %v3157_v20 = vand.u32 4294901760, %v3156_v42  ;;  %3491 = vmatpush.msra.mxu2 %v9463_v52  ;;  %3388 = vmatpush.msrb.mxu1 %v7236_v54  ;;  %v2005_v52 = vld [vmem:[%s5316_s27 + $0x8] sm:$0xff]  ;;  %v1864_v42 = vadd.f32 %v6867_v24, %v6672_v59  ;;  %v9468_v24 = vand.u32 4294901760, %v7051_v18  ;;  %v9470_v18 = vand.u32 4294901760, %v7109_v6 }
 0x2e6   : > { %v7280_v1 = vpop.f32.mrf.mxu1  ;;  %3152 = vmatpush.msrb.mxu3 %v3151_v10  ;;  %3265 = vmatpush.msrb.mxu0 %v7195_v45  ;;  %v2037_v41 = vmul.f32 %v2005_v52, %v1942_v5  ;;  %v9473_v5 = vand.u32 4294901760, %v7124_v61  ;;  %v1872_v61 = vadd.f32 %v6915_v12, %v6721_v23  ;;  %v9476_v12 = vand.u32 4294901760, %v7195_v45  ;;  %v9480_v45 = vld [vmem:[#allocation40_spill] sm:$0xff] }
 0x2e7   : > { %v7288_v53 = vpop.f32.mrf.mxu2  ;;  %2672 = vmatmul.f32.gmra.mxu3 %v9464_v57  ;;  %3495 = vmatpush.msra.mxu2 %v9465_v50  ;;  %v1946_v59 = vadd.f32 %v6830_v15, %v1864_v42 }
 0x2e8   : > { %v7293_v38 = vpop.f32.mrf.mxu0  ;;  %3158 = vmatpush.msrb.mxu3 %v3157_v20  ;;  %3390 = vmatpush.msrb.mxu1 %v7238_v11 }
 0x2e9   : > { %2868 = vmatmul.f32.gmra.mxu1 %v6739_v27  ;;  %3268 = vmatpush.msrb.mxu0 %v7198_v22  ;;  %v2039_v15 = vmul.f32 %v2007_v9, %v1946_v59  ;;  %v9482_v9 = vand.u32 4294901760, %v7248_v25 }
 0x2ea   : > { %v7299_v21 = vpop.f32.mrf.mxu3  ;;  %3164 = vmatpush.msrb.mxu3 %v3163_v7  ;;  %3499 = vmatpush.msra.mxu2 %v9466_v39  ;;  %v9469_v7 = vand.u32 4294901760, %v7068_v32  ;;  %v9478_v39 = vld [vmem:[#allocation33_spill] sm:$0xff] }
 0x2eb   : > { %2767 = vmatmul.f32.gmra.mxu0 %v6718_v13  ;;  %v7358_v6 = vand.u32 4294901760, %v2039_v15 }
 0x2ec   : > { %2539 = vmatmul.f32.gmra.mxu2 %v6913_v33  ;;  %3618 = vmatpush.msra.mxu3 %v6940_v56  ;;  %v7328_v56 = vand.u32 4294901760, %v2037_v41 }
 0x2ed   : > { %3271 = vmatpush.msrb.mxu0 %v7248_v25  ;;  %3503 = vmatpush.msra.mxu2 %v9468_v24  ;;  %v9485_v25 = vld [vmem:[#allocation21_spill] sm:$0xff] }
 0x2ee   : > { %v7309_v47 = vpop.f32.mrf.mxu1  ;;  %3620 = vmatpush.msra.mxu3 %v6972_v63 }
 0x2ef   : > { %v7315_v13 = vpop.f32.mrf.mxu2  ;;  %2678 = vmatmul.f32.gmra.mxu3 %v9467_v0  ;;  %3274 = vmatpush.msrb.mxu0 %v7251_v55  ;;  %v2011_v0 = vld [vmem:[%s5316_s27 + $0x38] sm:$0xff] }
 0x2f0   : > { %v7320_v33 = vpop.f32.mrf.mxu0  ;;  %3622 = vmatpush.msra.mxu3 %v7002_v14  ;;  %3507 = vmatpush.msra.mxu2 %v9469_v7  ;;  %v7345_v14 = vsub.f32 %v2037_v41, %v7328_v56  ;;  %v9483_v7 = vld [vmem:[#allocation20_spill] sm:$0xff] }
 0x2f1   : > { %2872 = vmatmul.f32.gmra.mxu1 %v6761_v43  ;;  %3277 = vmatpush.msrb.mxu0 %v7254_v40 }
 0x2f2   : > { %v7331_v20 = vpop.f32.mrf.mxu3  ;;  %3624 = vmatpush.msra.mxu3 %v7030_v51  ;;  %3511 = vmatpush.msra.mxu2 %v9470_v18  ;;  %v9472_v51 = vand.u32 4294901760, %v7121_v44  ;;  %v7374_v44 = vsub.f32 %v2039_v15, %v7358_v6  ;;  %v9484_v18 = vand.u32 4294901760, %v7251_v55 }
 0x2f3   : > { %2771 = vmatmul.f32.gmra.mxu0 %v6739_v27  ;;  %v1868_v27 = vadd.f32 %v6891_v30, %v6700_v3  ;;  %v9134_v3 = vand.u32 4294901760, %v7345_v14 }
 0x2f4   : > { %2544 = vmatmul.f32.gmra.mxu2 %v6938_v62  ;;  %v9471_v62 = vand.u32 4294901760, %v7118_v60  ;;  %3626 = vmatpush.msra.mxu3 %v7058_v16  ;;  %v2009_v60 = vld [vmem:[%s5316_s27 + $0x28] sm:$0xff]  ;;  %v9132_v23 = vand.u32 4294901760, %v7374_v44 }
 0x2f5   : > { %v1950_v30 = vadd.f32 %v6854_v31, %v1868_v27  ;;  %v9474_v31 = vand.u32 4294901760, %v7175_v37  ;;  %v9475_v37 = vand.u32 4294901760, %v7187_v34 }
 0x2f6   : > { %v7339_v63 = vpop.f32.mrf.mxu1  ;;  %3515 = vmatpush.msra.mxu2 %v9471_v62  ;;  %3628 = vmatpush.msra.mxu3 %v7089_v19  ;;  %v2943_v19 = vsub.f32 %v7345_v14, %v9134_v3 }
 0x2f7   : > { %v7349_v32 = vpop.f32.mrf.mxu2  ;;  %3166 = vmatmul.f32.vlgmr.msrb.gmra.mxu3 %v7328_v56 }
 0x2f8   : > { %v7354_v10 = vpop.f32.mrf.mxu0  ;;  %3519 = vmatpush.msra.mxu2 %v9472_v51  ;;  %3630 = vmatpush.msra.mxu3 %v7102_v29  ;;  %v7386_v29 = vld [vmem:[%s9038_s3 + $0x100] ss:$0 sm:$0xff]  ;;  %v2944_v42 = vand.u32 4294901760, %v2943_v19 }
 0x2f9   : > { %2876 = vmatmul.f32.gmra.mxu1 %v6778_v48  ;;  %v2141_v52 = vadd.f32 %v7386_v29, %v7039_v17  ;;  %v2951_v17 = vsub.f32 %v7374_v44, %v9132_v23  ;;  %v9486_v51 = vld [vmem:[#allocation49_spill] sm:$0xff]  ;;  %v2021_v23 = vld [vmem:[%s5316_s27 + $0x88] sm:$0xff] }
 0x2fa   : > { %v2589_v57 = vpop.f32.mrf.mxu3  ;;  %3523 = vmatpush.msra.mxu2 %v9473_v5  ;;  %3632 = vmatpush.msra.mxu3 %v7104_v28  ;;  %v1954_v28 = vadd.f32 %v6878_v36, %v1872_v61  ;;  %v9481_v36 = vld [vmem:[#allocation51_spill] sm:$0xff]  ;;  %v9487_v5 = vand.u32 4294901760, %v7254_v40 }
 0x2fb   : > { %2775 = vmatmul.f32.gmra.mxu0 %v6761_v43  ;;  %v2041_v43 = vmul.f32 %v2009_v60, %v1950_v30  ;;  %v1876_v59 = vadd.f32 %v9481_v36, %v9480_v45  ;;  %v2952_v60 = vand.u32 4294901760, %v2951_v17  ;;  %v9494_v45 = vld [vmem:[#allocation34_spill] sm:$0xff]  ;;  %v2015_v17 = vld [vmem:[%s5316_s27 + $0x58] sm:$0xff] }
 0x2fc   : > { %2549 = vmatmul.f32.gmra.mxu2 %v6970_v58  ;;  %3634 = vmatpush.msra.mxu3 %v7106_v26  ;;  %v9479_v26 = vand.u32 4294901760, %v7198_v22  ;;  %v2362_v22 = vadd.f32 %v9483_v7, %v2141_v52 }
 0x2fd   : > { %3527 = vmatpush.msra.mxu2 %v9474_v31  ;;  %v7404_v34 = vand.u32 4294901760, %v2041_v43  ;;  %v1958_v30 = vadd.f32 %v9486_v51, %v1876_v59  ;;  %v9488_v31 = vld [vmem:[#allocation26_spill] sm:$0xff] }
 0x2fe   : > { %v7371_v16 = vpop.f32.mrf.mxu1  ;;  %3636 = vmatpush.msra.mxu3 %v9478_v39  ;;  %v2149_v19 = vadd.f32 %v7386_v29, %v9488_v31 }
 0x2ff   : > { %v7389_v58 = vpop.f32.mrf.mxu2  ;;  %3170 = vmatmul.f32.gmra.mxu3 %v7358_v6  ;;  %3531 = vmatpush.msra.mxu2 %v9475_v37  ;;  %9477 = vst [vmem:[#allocation56_spill] sm:$0xff] %v7404_v34  ;;  %v7423_v15 = vsub.f32 %v2041_v43, %v7404_v34 }
 0x300   : > { %v7394_v50 = vpop.f32.mrf.mxu0  ;;  %3638 = vmatpush.msra.mxu3 %v7170_v35 }
 0x301   : > { %2880 = vmatmul.f32.gmra.mxu1 %v6803_v2  ;;  %3535 = vmatpush.msra.mxu2 %v9476_v12  ;;  %v9131_v55 = vand.u32 4294901760, %v7423_v15  ;;  %v9491_v12 = vld [vmem:[#allocation18_spill] sm:$0xff] }
 0x302   : > { %v2595_v41 = vpop.f32.mrf.mxu3  ;;  %3640 = vmatpush.msra.mxu3 %v7177_v49  ;;  %v2013_v49 = vld [vmem:[%s5316_s27 + $0x48] sm:$0xff] }
 0x303   : > { %2779 = vmatmul.f32.gmra.mxu0 %v6778_v48  ;;  %3539 = vmatpush.msra.mxu2 %v9479_v26  ;;  %v2043_v48 = vmul.f32 %v2011_v0, %v1954_v28  ;;  %v2045_v40 = vmul.f32 %v2013_v49, %v1958_v30  ;;  %v9493_v26 = vld [vmem:[#allocation25_spill] sm:$0xff]  ;;  %v9497_v30 = vld [vmem:[#allocation16_spill] sm:$0xff] }
 0x304   : > { %2945 = vmatmul.f32.vlgmr.msrb.gmra.mxu2 %v2944_v42  ;;  %3642 = vmatpush.msra.mxu3 %v7179_v46  ;;  %v9490_v46 = vld [vmem:[#allocation23_spill] sm:$0xff]  ;;  %v9492_v42 = vld [vmem:[#allocation24_spill] sm:$0xff] }
 0x305   : > { %3543 = vmatpush.msra.mxu2 %v9482_v9  ;;  %v7440_v61 = vand.u32 4294901760, %v2043_v48  ;;  %v1880_v28 = vadd.f32 %v9491_v12, %v9490_v46  ;;  %v2366_v39 = vadd.f32 %v9492_v42, %v2149_v19  ;;  %v7464_v59 = vand.u32 4294901760, %v2045_v40  ;;  %v9496_v9 = vld [vmem:[#allocation47_spill] sm:$0xff]  ;;  %v9499_v49 = vld [vmem:[#allocation12_spill] sm:$0xff]  ;;  %v9500_v12 = vld [vmem:[#allocation29_spill] sm:$0xff] }
 0x306   : > { %v7414_v24 = vpop.f32.mrf.mxu1  ;;  %3644 = vmatpush.msra.mxu3 %v7234_v4  ;;  %v2157_v7 = vadd.f32 %v7386_v29, %v9496_v9  ;;  %v9502_v42 = vld [vmem:[#allocation48_spill] sm:$0xff] }
 0x307   : > { %v2475_v35 = vpop.f32.mrf.mxu2  ;;  %3174 = vmatmul.f32.gmra.mxu3 %v7404_v34  ;;  %3547 = vmatpush.msra.mxu2 %v9484_v18  ;;  %9489 = vst [vmem:[#allocation36_spill] sm:$0xff] %v7440_v61  ;;  %v7456_v4 = vsub.f32 %v2043_v48, %v7440_v61  ;;  %v1962_v36 = vadd.f32 %v9494_v45, %v1880_v28 }
 0x308   : > { %v2476_v27 = vadd.f32 %v2475_v35, %v2362_v22  ;;  %v7429_v62 = vpop.f32.mrf.mxu0  ;;  %3646 = vmatpush.msra.mxu3 %v7236_v54  ;;  %9495 = vst [vmem:[#allocation33_spill] sm:$0xff] %v7464_v59  ;;  %v7476_v51 = vsub.f32 %v2045_v40, %v7464_v59  ;;  %v2370_v31 = vadd.f32 %v9499_v49, %v2157_v7 }
 0x309   : > { %2884 = vmatmul.f32.gmra.mxu1 %v9485_v25  ;;  %3551 = vmatpush.msra.mxu2 %v9487_v5  ;;  %v2047_v18 = vmul.f32 %v2015_v17, %v1962_v36  ;;  %v2017_v17 = vld [vmem:[%s5316_s27 + $0x68] sm:$0xff] }
 0x30a   : > { %v2601_v43 = vpop.f32.mrf.mxu3  ;;  %v7442_v37 = vadd.f32 %v2589_v57, %v2476_v27  ;;  %v2959_v57 = vsub.f32 %v7423_v15, %v9131_v55  ;;  %3648 = vmatpush.msra.mxu3 %v7238_v11  ;;  %v9130_v11 = vand.u32 4294901760, %v7456_v4  ;;  %v9129_v40 = vand.u32 4294901760, %v7476_v51 }
 0x30b   : > { %2783 = vmatmul.f32.gmra.mxu0 %v6803_v2  ;;  %v7489_v28 = vand.u32 4294901760, %v2047_v18 }
 0x30c   : > { %2953 = vmatmul.f32.gmra.mxu2 %v2952_v60  ;;  %v2960_v48 = vand.u32 4294901760, %v2959_v57  ;;  %v9498_v60 = vld [vmem:[#allocation22_spill] sm:$0xff]  ;;  %v9503_v57 = vld [vmem:[#allocation39_spill] sm:$0xff]  ;;  %v2975_v7 = vsub.f32 %v7476_v51, %v9129_v40 }
 0x30d   : > { %v1884_v5 = vadd.f32 %v9498_v60, %v9497_v30  ;;  %9501 = vst [vmem:[#allocation40_spill] sm:$0xff] %v7489_v28  ;;  %v9504_v60 = vld [vmem:[#allocation27_spill] sm:$0xff] }
 0x30e   : > { %v7449_v52 = vpop.f32.mrf.mxu1 }
 0x30f   : > { %v2480_v2 = vpop.f32.mrf.mxu2  ;;  %3178 = vmatmul.f32.gmra.mxu3 %v7440_v61  ;;  %v9527_v61 = vld [vmem:[#allocation54_spill] sm:$0xff] }
 0x310   : > { %v2481_v54 = vadd.f32 %v2480_v2, %v2366_v39  ;;  %v7460_v0 = vpop.f32.mrf.mxu0  ;;  %v1966_v39 = vadd.f32 %v9502_v42, %v1884_v5  ;;  %v2165_v2 = vadd.f32 %v7386_v29, %v9503_v57  ;;  %v9505_v5 = vld [vmem:[#allocation15_spill] sm:$0xff]  ;;  %v2976_v42 = vand.u32 4294901760, %v2975_v7 }
 0x311   : > { %2888 = vmatmul.f32.gmra.mxu1 %v9493_v26  ;;  %v1888_v49 = vadd.f32 %v9505_v5, %v9504_v60  ;;  %v2019_v5 = vld [vmem:[%s5316_s27 + $0x78] sm:$0xff] }
 0x312   : > { %v2607_v22 = vpop.f32.mrf.mxu3  ;;  %v7470_v35 = vadd.f32 %v2595_v41, %v2481_v54  ;;  %v2967_v41 = vsub.f32 %v7456_v4, %v9130_v11  ;;  %v2049_v30 = vmul.f32 %v2017_v17, %v1966_v39  ;;  %v2173_v39 = vadd.f32 %v7386_v29, %v7257_v8  ;;  %v9513_v11 = vld [vmem:[#allocation46_spill] sm:$0xff] }
 0x313   : > { %2787 = vmatmul.f32.gmra.mxu0 %v9485_v25 }
 0x314   : > { %2961 = vmatmul.f32.gmra.mxu2 %v2960_v48  ;;  %v2968_v54 = vand.u32 4294901760, %v2967_v41  ;;  %v7504_v48 = vsub.f32 %v2047_v18, %v7489_v28  ;;  %v9508_v18 = vld [vmem:[#allocation53_spill] sm:$0xff]  ;;  %v7517_v60 = vand.u32 4294901760, %v2049_v30 }
 0x316   : > { %v7473_v27 = vpop.f32.mrf.mxu1  ;;  %v9133_v57 = vand.u32 4294901760, %v7504_v48  ;;  %9509 = vst [vmem:[#allocation51_spill] sm:$0xff] %v7517_v60 }
 0x317   : > { %v2485_v19 = vpop.f32.mrf.mxu2  ;;  %3182 = vmatmul.f32.gmra.mxu3 %v7464_v59 }
 0x318   : > { %v2486_v25 = vadd.f32 %v2485_v19, %v2370_v31  ;;  %v7485_v46 = vpop.f32.mrf.mxu0 }
 0x319   : > { %2892 = vmatmul.f32.gmra.mxu1 %v9500_v12 }
 0x31a   : > { %v2613_v45 = vpop.f32.mrf.mxu3  ;;  %v7494_v36 = vadd.f32 %v2601_v43, %v2486_v25  ;;  %v9506_v43 = vld [vmem:[#allocation14_spill] sm:$0xff]  ;;  %v9507_v25 = vld [vmem:[#allocation45_spill] sm:$0xff] }
 0x31b   : > { %2791 = vmatmul.f32.gmra.mxu0 %v9493_v26  ;;  %v2374_v31 = vadd.f32 %v9506_v43, %v2165_v2  ;;  %v9510_v43 = vld [vmem:[#allocation30_spill] sm:$0xff] }
 0x31c   : > { %2969 = vmatmul.f32.gmra.mxu2 %v2968_v54  ;;  %v1970_v54 = vadd.f32 %v9508_v18, %v1888_v49  ;;  %v2983_v49 = vsub.f32 %v7504_v48, %v9133_v57  ;;  %v9512_v18 = vld [vmem:[#allocation50_spill] sm:$0xff]  ;;  %v9517_v57 = vld [vmem:[#allocation31_spill] sm:$0xff] }
 0x31d   : > { %v2378_v40 = vadd.f32 %v9512_v18, %v2173_v39 }
 0x31e   : > { %v7498_v9 = vpop.f32.mrf.mxu1  ;;  %v2051_v8 = vmul.f32 %v2019_v5, %v1970_v54  ;;  %v2984_v55 = vand.u32 4294901760, %v2983_v49  ;;  %v2181_v54 = vadd.f32 %v7386_v29, %v7293_v38 }
 0x31f   : > { %v2490_v41 = vpop.f32.mrf.mxu2  ;;  %3186 = vmatmul.f32.gmra.mxu3 %v7489_v28 }
 0x320   : > { %v2491_v26 = vadd.f32 %v2490_v41, %v2374_v31  ;;  %v7510_v19 = vpop.f32.mrf.mxu0  ;;  %v9511_v31 = vld [vmem:[#allocation28_spill] sm:$0xff] }
 0x321   : > { %2896 = vmatmul.f32.gmra.mxu1 %v9507_v25  ;;  %v1892_v7 = vadd.f32 %v9511_v31, %v9510_v43  ;;  %v9514_v43 = vld [vmem:[#allocation55_spill] sm:$0xff] }
 0x322   : > { %v2619_v17 = vpop.f32.mrf.mxu3  ;;  %v7519_v2 = vadd.f32 %v2607_v22, %v2491_v26  ;;  %v7532_v22 = vsub.f32 %v2049_v30, %v7517_v60  ;;  %v7543_v30 = vand.u32 4294901760, %v2051_v8 }
 0x323   : > { %2795 = vmatmul.f32.gmra.mxu0 %v9500_v12  ;;  %v1974_v31 = vadd.f32 %v9514_v43, %v1892_v7  ;;  %v9518_v43 = vld [vmem:[#allocation41_spill] sm:$0xff] }
 0x324   : > { %2977 = vmatmul.f32.gmra.mxu2 %v2976_v42  ;;  %v9137_v39 = vand.u32 4294901760, %v7532_v22  ;;  %9515 = vst [vmem:[#allocation20_spill] sm:$0xff] %v7543_v30  ;;  %v2382_v3 = vadd.f32 %v9518_v43, %v2181_v54  ;;  %v2023_v54 = vld [vmem:[%s5316_s27 + $0x98] sm:$0xff] }
 0x326   : > { %v7525_v41 = vpop.f32.mrf.mxu1  ;;  %v2991_v38 = vsub.f32 %v7532_v22, %v9137_v39 }
 0x327   : > { %v2495_v26 = vpop.f32.mrf.mxu2  ;;  %3190 = vmatmul.f32.gmra.mxu3 %v7517_v60  ;;  %v7557_v60 = vsub.f32 %v2051_v8, %v7543_v30 }
 0x328   : > { %v2496_v12 = vadd.f32 %v2495_v26, %v2378_v40  ;;  %v7535_v42 = vpop.f32.mrf.mxu0  ;;  %v2053_v40 = vmul.f32 %v2021_v23, %v1974_v31  ;;  %v9516_v26 = vld [vmem:[#allocation43_spill] sm:$0xff]  ;;  %v9519_v23 = vld [vmem:[#allocation38_spill] sm:$0xff]  ;;  %v2992_v43 = vand.u32 4294901760, %v2991_v38 }
 0x329   : > { %2900 = vmatmul.f32.gmra.mxu1 %v9513_v11  ;;  %v1896_v7 = vadd.f32 %v9517_v57, %v9516_v26  ;;  %v9520_v57 = vld [vmem:[#allocation42_spill] sm:$0xff]  ;;  %v2189_v26 = vadd.f32 %v7386_v29, %v7320_v33  ;;  %v9144_v8 = vand.u32 4294901760, %v7557_v60 }
 0x32a   : > { %v2625_v5 = vpop.f32.mrf.mxu3  ;;  %v7545_v18 = vadd.f32 %v2613_v45, %v2496_v12  ;;  %v7564_v31 = vand.u32 4294901760, %v2053_v40 }
 0x32b   : > { %2799 = vmatmul.f32.gmra.mxu0 %v9507_v25  ;;  %v1978_v12 = vadd.f32 %v9520_v57, %v1896_v7  ;;  %v9522_v7 = vld [vmem:[#allocation44_spill] sm:$0xff]  ;;  %v9523_v57 = vld [vmem:[#allocation59_spill] sm:$0xff]  ;;  %v2386_v33 = vadd.f32 %v7280_v1, %v2189_v26  ;;  %v2999_v38 = vsub.f32 %v7557_v60, %v9144_v8  ;;  %v2197_v1 = vadd.f32 %v7386_v29, %v7354_v10 }
 0x32c   : > { %2985 = vmatmul.f32.gmra.mxu2 %v2984_v55  ;;  %9521 = vst [vmem:[#allocation21_spill] sm:$0xff] %v7564_v31  ;;  %v1900_v59 = vadd.f32 %v9523_v57, %v9522_v7 }
 0x32d   : > { %v3000_v26 = vand.u32 4294901760, %v2999_v38 }
 0x32e   : > { %v7550_v49 = vpop.f32.mrf.mxu1 }
 0x32f   : > { %v2500_v45 = vpop.f32.mrf.mxu2  ;;  %3194 = vmatmul.f32.gmra.mxu3 %v7543_v30  ;;  %v7574_v30 = vsub.f32 %v2053_v40, %v7564_v31 }
 0x330   : > { %v2501_v25 = vadd.f32 %v2500_v45, %v2382_v3  ;;  %v7560_v55 = vpop.f32.mrf.mxu0  ;;  %v2055_v3 = vmul.f32 %v2023_v54, %v1978_v12  ;;  %v9524_v12 = vand.u32 4294901760, %v7345_v14 }
 0x331   : > { %2904 = vmatmul.f32.gmra.mxu1 %v9519_v23  ;;  %v9149_v40 = vand.u32 4294901760, %v7574_v30 }
 0x332   : > { %v2631_v39 = vpop.f32.mrf.mxu3  ;;  %v7570_v28 = vadd.f32 %v2619_v17, %v2501_v25  ;;  %v7588_v54 = vand.u32 4294901760, %v2055_v3 }
 0x333   : > { %2803 = vmatmul.f32.gmra.mxu0 %v9513_v11 }
 0x334   : > { %2993 = vmatmul.f32.gmra.mxu2 %v2992_v43  ;;  %v9525_v43 = vld [vmem:[#allocation57_spill] sm:$0xff] }
 0x335   : > { %v1982_v7 = vadd.f32 %v9525_v43, %v1900_v59  ;;  %v9526_v43 = vld [vmem:[#allocation35_spill] sm:$0xff] }
 0x336   : > { %v2845_v45 = vpop.f32.mrf.mxu1  ;;  %v1904_v10 = vadd.f32 %v9527_v61, %v9526_v43  ;;  %v2205_v61 = vadd.f32 %v7386_v29, %v7394_v50 }
 0x337   : > { %v2505_v17 = vpop.f32.mrf.mxu2  ;;  %3198 = vmatmul.f32.gmra.mxu3 %v7564_v31  ;;  %v2025_v31 = vld [vmem:[%s5316_s27 + $0xa8] sm:$0xff] }
 0x338   : > { %v2506_v11 = vadd.f32 %v2505_v17, %v2386_v33  ;;  %v7583_v25 = vpop.f32.mrf.mxu0  ;;  %v3007_v17 = vsub.f32 %v7574_v30, %v9149_v40  ;;  %v2057_v59 = vmul.f32 %v2025_v31, %v1982_v7  ;;  %v9529_v31 = vld [vmem:[#allocation58_spill] sm:$0xff] }
 0x339   : > { %3394 = vmatmul.f32.vlgmr.msrb.gmra.mxu1 %v9524_v12  ;;  %v7601_v12 = vsub.f32 %v2055_v3, %v7588_v54  ;;  %v1986_v7 = vadd.f32 %v9529_v31, %v1904_v10 }
 0x33a   : > { %v2637_v57 = vpop.f32.mrf.mxu3  ;;  %v7593_v8 = vadd.f32 %v2625_v5, %v2506_v11  ;;  %v2390_v5 = vadd.f32 %v7309_v47, %v2197_v1  ;;  %v3008_v34 = vand.u32 4294901760, %v3007_v17  ;;  %v7614_v47 = vand.u32 4294901760, %v2057_v59 }
 0x33b   : > { %2807 = vmatmul.f32.gmra.mxu0 %v9519_v23  ;;  %v9152_v3 = vand.u32 4294901760, %v7601_v12 }
 0x33c   : > { %3001 = vmatmul.f32.gmra.mxu2 %v3000_v26  ;;  %v9528_v26 = vand.u32 4294901760, %v7374_v44 }
 0x33d   : > { %v3015_v50 = vsub.f32 %v7601_v12, %v9152_v3  ;;  %v2029_v3 = vld [vmem:[%s5316_s27 + $0xc8] sm:$0xff] }
 0x33e   : > { %v2849_v33 = vpop.f32.mrf.mxu1 }
 0x33f   : > { %v2510_v38 = vpop.f32.mrf.mxu2  ;;  %3202 = vmatmul.f32.gmra.mxu3 %v7588_v54 }
 0x340   : > { %v2511_v23 = vadd.f32 %v2510_v38, %v2390_v5  ;;  %v2748_v11 = vpop.f32.mrf.mxu0  ;;  %v2027_v5 = vld [vmem:[%s5316_s27 + $0xb8] sm:$0xff] }
 0x341   : > { %3400 = vmatmul.f32.gmra.mxu1 %v9528_v26  ;;  %v2749_v40 = vadd.f32 %v2748_v11, %v7442_v37  ;;  %v9530_v37 = vld [vmem:[#allocation32_spill] sm:$0xff]  ;;  %v2059_v10 = vmul.f32 %v2027_v5, %v1986_v7  ;;  %v2394_v26 = vadd.f32 %v7339_v63, %v2205_v61  ;;  %v2213_v63 = vadd.f32 %v7386_v29, %v7429_v62 }
 0x342   : > { %v2643_v43 = vpop.f32.mrf.mxu3  ;;  %v7616_v1 = vadd.f32 %v2631_v39, %v2511_v23  ;;  %v1908_v17 = vadd.f32 %v7288_v53, %v9530_v37  ;;  %v7629_v39 = vsub.f32 %v2057_v59, %v7614_v47  ;;  %v9532_v53 = vld [vmem:[#allocation52_spill] sm:$0xff]  ;;  %v3016_v37 = vand.u32 4294901760, %v3015_v50 }
 0x343   : > { %3280 = vmatmul.f32.vlgmr.msrb.gmra.mxu0 %v7345_v14  ;;  %v7620_v38 = vadd.f32 %v2845_v45, %v2749_v40  ;;  %v7640_v61 = vand.u32 4294901760, %v2059_v10  ;;  %v2398_v62 = vadd.f32 %v7371_v16, %v2213_v63 }
 0x344   : > { %3009 = vmatmul.f32.gmra.mxu2 %v3008_v34  ;;  %v9531_v34 = vand.u32 4294901760, %v7423_v15  ;;  %v1990_v40 = vadd.f32 %v9532_v53, %v1908_v17  ;;  %v3022_v59 = vand.u32 4294901760, %v7629_v39 }
 0x346   : > { %v2853_v11 = vpop.f32.mrf.mxu1  ;;  %v2061_v17 = vmul.f32 %v2029_v3, %v1990_v40  ;;  %v9534_v3 = vand.u32 4294901760, %v7456_v4  ;;  %v2031_v40 = vld [vmem:[%s5316_s27 + $0xd8] sm:$0xff] }
 0x347   : > { %v2515_v23 = vpop.f32.mrf.mxu2  ;;  %3206 = vmatmul.f32.gmra.mxu3 %v7614_v47 }
 0x348   : > { %v2516_v14 = vadd.f32 %v2515_v23, %v2394_v26  ;;  %v2752_v45 = vpop.f32.mrf.mxu0  ;;  %v7661_v16 = vand.u32 4294901760, %v2061_v17 }
 0x349   : > { %3406 = vmatmul.f32.gmra.mxu1 %v9531_v34  ;;  %v2753_v31 = vadd.f32 %v2752_v45, %v7470_v35  ;;  %v9533_v35 = vld [vmem:[#allocation37_spill] sm:$0xff]  ;;  %v3023_v45 = vsub.f32 %v7629_v39, %v3022_v59  ;;  %v9535_v34 = vld [vmem:[#allocation19_spill] sm:$0xff] }
 0x34a   : > { %v2649_v7 = vpop.f32.mrf.mxu3  ;;  %v7642_v5 = vadd.f32 %v2637_v57, %v2516_v14  ;;  %v1912_v50 = vadd.f32 %v7315_v13, %v9533_v35  ;;  %v7654_v57 = vsub.f32 %v2059_v10, %v7640_v61 }
 0x34b   : > { %3285 = vmatmul.f32.gmra.mxu0 %v7374_v44  ;;  %v7645_v26 = vadd.f32 %v2849_v33, %v2753_v31  ;;  %v2221_v31 = vadd.f32 %v7386_v29, %v7460_v0  ;;  %v3024_v10 = vand.u32 4294901760, %v3023_v45 }
 0x34c   : > { %3017 = vmatmul.f32.gmra.mxu2 %v3016_v37  ;;  %v1994_v13 = vadd.f32 %v9535_v34, %v1912_v50  ;;  %v3030_v63 = vand.u32 4294901760, %v7654_v57 }
 0x34d   : > { %v2402_v0 = vadd.f32 %v7414_v24, %v2221_v31 }
 0x34e   : > { %v2857_v23 = vpop.f32.mrf.mxu1  ;;  %v2063_v50 = vmul.f32 %v2031_v40, %v1994_v13  ;;  %v2229_v13 = vadd.f32 %v7386_v29, %v7485_v46  ;;  %v9538_v46 = vld [vmem:[#allocation17_spill] sm:$0xff] }
 0x34f   : > { %v2520_v14 = vpop.f32.mrf.mxu2  ;;  %3210 = vmatmul.f32.gmra.mxu3 %v7640_v61 }
 0x350   : > { %v2521_v44 = vadd.f32 %v2520_v14, %v2398_v62  ;;  %v2756_v33 = vpop.f32.mrf.mxu0 }
 0x351   : > { %3412 = vmatmul.f32.gmra.mxu1 %v9534_v3  ;;  %v2757_v53 = vadd.f32 %v2756_v33, %v7494_v36  ;;  %v7673_v36 = vsub.f32 %v2061_v17, %v7661_v16  ;;  %v9536_v33 = vld [vmem:[#allocation13_spill] sm:$0xff] }
 0x352   : > { %v2655_v37 = vpop.f32.mrf.mxu3  ;;  %v7667_v35 = vadd.f32 %v2643_v43, %v2521_v44  ;;  %v1916_v3 = vadd.f32 %v7349_v32, %v9536_v33  ;;  %v3031_v43 = vsub.f32 %v7654_v57, %v3030_v63  ;;  %v9537_v44 = vand.u32 4294901760, %v7476_v51 }
 0x353   : > { %3290 = vmatmul.f32.gmra.mxu0 %v7423_v15  ;;  %v7670_v62 = vadd.f32 %v2853_v11, %v2757_v53  ;;  %v3038_v34 = vand.u32 4294901760, %v7673_v36  ;;  %v7686_v32 = vand.u32 4294901760, %v2063_v50 }
 0x354   : > { %3025 = vmatmul.f32.gmra.mxu2 %v3024_v10  ;;  %v1998_v24 = vadd.f32 %v7299_v21, %v1916_v3  ;;  %v3032_v53 = vand.u32 4294901760, %v3031_v43  ;;  %v2033_v10 = vld [vmem:[%s5316_s27 + $0xe8] sm:$0xff]  ;;  %v2406_v43 = vadd.f32 %v7449_v52, %v2229_v13 }
 0x355   : > { %v7701_v21 = vsub.f32 %v2063_v50, %v7686_v32 }
 0x356   : > { %v2861_v14 = vpop.f32.mrf.mxu1  ;;  %v2065_v3 = vmul.f32 %v2033_v10, %v1998_v24 }
 0x357   : > { %v2525_v45 = vpop.f32.mrf.mxu2  ;;  %3214 = vmatmul.f32.gmra.mxu3 %v7661_v16  ;;  %v3046_v50 = vand.u32 4294901760, %v7701_v21 }
 0x358   : > { %v2526_v15 = vadd.f32 %v2525_v45, %v2402_v0  ;;  %v2760_v11 = vpop.f32.mrf.mxu0  ;;  %v3039_v0 = vsub.f32 %v7673_v36, %v3038_v34  ;;  %v7714_v52 = vand.u32 4294901760, %v2065_v3 }
 0x359   : > { %3418 = vmatmul.f32.gmra.mxu1 %v9537_v44  ;;  %v2761_v17 = vadd.f32 %v2760_v11, %v7519_v2 }
 0x35a   : > { %v2661_v40 = vpop.f32.mrf.mxu3  ;;  %v7691_v31 = vadd.f32 %v2649_v7, %v2526_v15  ;;  %v1920_v7 = vadd.f32 %v7389_v58, %v9538_v46  ;;  %v9539_v15 = vand.u32 4294901760, %v7504_v48  ;;  %v3040_v44 = vand.u32 4294901760, %v3039_v0 }
 0x35b   : > { %3295 = vmatmul.f32.gmra.mxu0 %v7456_v4  ;;  %v7695_v33 = vadd.f32 %v2857_v23, %v2761_v17  ;;  %v2237_v58 = vadd.f32 %v7386_v29, %v7510_v19  ;;  %v3047_v0 = vsub.f32 %v7701_v21, %v3046_v50  ;;  %v7727_v19 = vsub.f32 %v2065_v3, %v7714_v52 }
 0x35c   : > { %3033 = vmatmul.f32.gmra.mxu2 %v3032_v53  ;;  %v2002_v17 = vadd.f32 %v7331_v20, %v1920_v7  ;;  %v2035_v53 = vld [vmem:[%s5316_s27 + $0xf8] sm:$0xff] }
 0x35d   : > { %v2410_v46 = vadd.f32 %v7473_v27, %v2237_v58  ;;  %v3054_v27 = vand.u32 4294901760, %v7727_v19 }
 0x35e   : > { %v2865_v2 = vpop.f32.mrf.mxu1  ;;  %v2067_v20 = vmul.f32 %v2035_v53, %v2002_v17 }
 0x35f   : > { %v2530_v45 = vpop.f32.mrf.mxu2  ;;  %3218 = vmatmul.f32.gmra.mxu3 %v7686_v32 }
 0x360   : > { %v2531_v4 = vadd.f32 %v2530_v45, %v2406_v43  ;;  %v2764_v23 = vpop.f32.mrf.mxu0  ;;  %v3048_v45 = vand.u32 4294901760, %v3047_v0 }
 0x361   : > { %3424 = vmatmul.f32.gmra.mxu1 %v9539_v15  ;;  %v2765_v11 = vadd.f32 %v2764_v23, %v7545_v18  ;;  %v7736_v15 = vand.u32 4294901760, %v2067_v20 }
 0x362   : > { %v2667_v24 = vpop.f32.mrf.mxu3  ;;  %v7716_v13 = vadd.f32 %v2655_v37, %v2531_v4  ;;  %v2245_v4 = vadd.f32 %v7386_v29, %v7535_v42 }
 0x363   : > { %3300 = vmatmul.f32.gmra.mxu0 %v7476_v51  ;;  %v7720_v10 = vadd.f32 %v2861_v14, %v2765_v11  ;;  %v9540_v51 = vand.u32 4294901760, %v7532_v22  ;;  %v7748_v42 = vsub.f32 %v2067_v20, %v7736_v15 }
 0x364   : > { %3041 = vmatmul.f32.gmra.mxu2 %v3040_v44  ;;  %v2414_v17 = vadd.f32 %v7498_v9, %v2245_v4  ;;  %v2253_v9 = vadd.f32 %v7386_v29, %v7560_v55 }
 0x366   : > { %v2869_v18 = vpop.f32.mrf.mxu1 }
 0x367   : > { %v2535_v7 = vpop.f32.mrf.mxu2  ;;  %3222 = vmatmul.f32.gmra.mxu3 %v7714_v52 }
 0x368   : > { %v2536_v37 = vadd.f32 %v2535_v7, %v2410_v46  ;;  %v2768_v43 = vpop.f32.mrf.mxu0  ;;  %v3062_v7 = vand.u32 4294901760, %v7748_v42 }
 0x369   : > { %3430 = vmatmul.f32.gmra.mxu1 %v9540_v51  ;;  %v2769_v14 = vadd.f32 %v2768_v43, %v7570_v28  ;;  %v3055_v28 = vsub.f32 %v7727_v19, %v3054_v27  ;;  %v2418_v51 = vadd.f32 %v7525_v41, %v2253_v9 }
 0x36a   : > { %v2673_v23 = vpop.f32.mrf.mxu3  ;;  %v7738_v3 = vadd.f32 %v2661_v40, %v2536_v37 }
 0x36b   : > { %3305 = vmatmul.f32.gmra.mxu0 %v7504_v48  ;;  %v7741_v11 = vadd.f32 %v2865_v2, %v2769_v14  ;;  %v9541_v48 = vand.u32 4294901760, %v7557_v60  ;;  %v3056_v0 = vand.u32 4294901760, %v3055_v28 }
 0x36c   : > { %3049 = vmatmul.f32.gmra.mxu2 %v3048_v45 }
 0x36e   : > { %v2873_v44 = vpop.f32.mrf.mxu1 }
 0x36f   : > { %v2540_v58 = vpop.f32.mrf.mxu2  ;;  %3226 = vmatmul.f32.gmra.mxu3 %v7736_v15 }
 0x370   : > { %v2541_v40 = vadd.f32 %v2540_v58, %v2414_v17  ;;  %v2772_v53 = vpop.f32.mrf.mxu0 }
 0x371   : > { %3436 = vmatmul.f32.gmra.mxu1 %v9541_v48  ;;  %v2773_v2 = vadd.f32 %v2772_v53, %v7593_v8  ;;  %v3063_v8 = vsub.f32 %v7748_v42, %v3062_v7 }
 0x372   : > { %v2679_v46 = vpop.f32.mrf.mxu3  ;;  %v7757_v37 = vadd.f32 %v2667_v24, %v2541_v40  ;;  %v9542_v24 = vand.u32 4294901760, %v7574_v30 }
 0x373   : > { %3310 = vmatmul.f32.gmra.mxu0 %v7532_v22  ;;  %v7760_v20 = vadd.f32 %v2869_v18, %v2773_v2  ;;  %v2261_v18 = vadd.f32 %v7386_v29, %v7583_v25  ;;  %v3064_v4 = vand.u32 4294901760, %v3063_v8  ;;  %v9543_v29 = vand.u32 4294901760, %v7601_v12  ;;  %v9544_v2 = vld [vmem:[#allocation56_spill] sm:$0xff] }
 0x374   : > { %3057 = vmatmul.f32.gmra.mxu2 %v3056_v0 }
 0x375   : > { %v2422_v40 = vadd.f32 %v7550_v49, %v2261_v18 }
 0x376   : > { %v7762_v43 = vpop.f32.mrf.mxu1 }
 0x377   : > { %v2545_v55 = vpop.f32.mrf.mxu2  ;;  %3650 = vmatmul.f32.vlgmr.msra.gmra.mxu3 %v7328_v56 }
 0x378   : > { %v2546_v14 = vadd.f32 %v2545_v55, %v2418_v51  ;;  %v2776_v45 = vpop.f32.mrf.mxu0 }
 0x379   : > { %3442 = vmatmul.f32.gmra.mxu1 %v9542_v24  ;;  %v2777_v22 = vadd.f32 %v2776_v45, %v7616_v1  ;;  %v9546_v24 = vld [vmem:[#allocation33_spill] sm:$0xff] }
 0x37a   : > { %v3167_v17 = vpop.f32.mrf.mxu3  ;;  %v7774_v41 = vadd.f32 %v2673_v23, %v2546_v14 }
 0x37b   : > { %3315 = vmatmul.f32.gmra.mxu0 %v7557_v60  ;;  %v7777_v28 = vadd.f32 %v2873_v44, %v2777_v22 }
 0x37c   : > { %3065 = vmatmul.f32.gmra.mxu2 %v3064_v4 }
 0x37e   : > { %v7779_v58 = vpop.f32.mrf.mxu1 }
 0x37f   : > { %v2550_v53 = vpop.f32.mrf.mxu2  ;;  %3654 = vmatmul.f32.gmra.mxu3 %v7358_v6 }
 0x380   : > { %v2551_v1 = vadd.f32 %v2550_v53, %v2422_v40  ;;  %v7783_v48 = vpop.f32.mrf.mxu0  ;;  %v9547_v40 = vld [vmem:[#allocation40_spill] sm:$0xff] }
 0x381   : > { %3448 = vmatmul.f32.gmra.mxu1 %v9543_v29 }
 0x382   : > { %v3171_v25 = vpop.f32.mrf.mxu3  ;;  %v7787_v23 = vadd.f32 %v2679_v46, %v2551_v1  ;;  %v9545_v46 = vld [vmem:[#allocation36_spill] sm:$0xff] }
 0x383   : > { %3320 = vmatmul.f32.gmra.mxu0 %v7574_v30 }
 0x384   : > { %3553 = vmatmul.f32.vlgmr.msra.gmra.mxu2 %v7328_v56 }
 0x386   : > { %v2885_v60 = vpop.f32.mrf.mxu1 }
 0x387   : > { %v2946_v44 = vpop.f32.mrf.mxu2  ;;  %3658 = vmatmul.f32.gmra.mxu3 %v9544_v2 }
 0x388   : > { %v2947_v49 = vadd.f32 %v2946_v44, %v7620_v38  ;;  %v7793_v9 = vpop.f32.mrf.mxu0 }
 0x389   : > { %3454 = vmatmul.f32.gmra.mxu1 %v3022_v59 }
 0x38a   : > { %v3175_v0 = vpop.f32.mrf.mxu3  ;;  %v7797_v51 = vadd.f32 %v3167_v17, %v2947_v49 }
 0x38b   : > { %3325 = vmatmul.f32.gmra.mxu0 %v7601_v12 }
 0x38c   : > { %3557 = vmatmul.f32.gmra.mxu2 %v7358_v6 }
 0x38e   : > { %v2889_v30 = vpop.f32.mrf.mxu1 }
 0x38f   : > { %v2954_v56 = vpop.f32.mrf.mxu2  ;;  %3662 = vmatmul.f32.gmra.mxu3 %v9545_v46 }
 0x390   : > { %v2955_v8 = vadd.f32 %v2954_v56, %v7645_v26  ;;  %v2788_v55 = vpop.f32.mrf.mxu0 }
 0x391   : > { %3460 = vmatmul.f32.gmra.mxu1 %v3030_v63  ;;  %v2789_v38 = vadd.f32 %v2788_v55, %v7691_v31 }
 0x392   : > { %v3179_v59 = vpop.f32.mrf.mxu3  ;;  %v7806_v14 = vadd.f32 %v3171_v25, %v2955_v8 }
 0x393   : > { %3330 = vmatmul.f32.gmra.mxu0 %v7629_v39  ;;  %v7809_v12 = vadd.f32 %v2885_v60, %v2789_v38  ;;  %v9548_v60 = vld [vmem:[#allocation51_spill] sm:$0xff]  ;;  %v9550_v38 = vld [vmem:[#allocation21_spill] sm:$0xff] }
 0x394   : > { %3561 = vmatmul.f32.gmra.mxu2 %v9544_v2 }
 0x396   : > { %v2893_v6 = vpop.f32.mrf.mxu1 }
 0x397   : > { %v2962_v45 = vpop.f32.mrf.mxu2  ;;  %3666 = vmatmul.f32.gmra.mxu3 %v9546_v24 }
 0x398   : > { %v2963_v26 = vadd.f32 %v2962_v45, %v7670_v62  ;;  %v2792_v22 = vpop.f32.mrf.mxu0 }
 0x399   : > { %3466 = vmatmul.f32.gmra.mxu1 %v3038_v34  ;;  %v2793_v63 = vadd.f32 %v2792_v22, %v7716_v13 }
 0x39a   : > { %v3183_v31 = vpop.f32.mrf.mxu3  ;;  %v7817_v18 = vadd.f32 %v3175_v0, %v2963_v26 }
 0x39b   : > { %3335 = vmatmul.f32.gmra.mxu0 %v7654_v57  ;;  %v7820_v39 = vadd.f32 %v2889_v30, %v2793_v63  ;;  %v9549_v30 = vld [vmem:[#allocation20_spill] sm:$0xff] }
 0x39c   : > { %3565 = vmatmul.f32.gmra.mxu2 %v9545_v46 }
 0x39e   : > { %v2897_v4 = vpop.f32.mrf.mxu1 }
 0x39f   : > { %v2970_v17 = vpop.f32.mrf.mxu2  ;;  %3670 = vmatmul.f32.gmra.mxu3 %v9547_v40 }
 0x3a0   : > { %v2971_v62 = vadd.f32 %v2970_v17, %v7695_v33  ;;  %v2796_v53 = vpop.f32.mrf.mxu0 }
 0x3a1   : > { %3472 = vmatmul.f32.gmra.mxu1 %v3046_v50  ;;  %v2797_v34 = vadd.f32 %v2796_v53, %v7738_v3 }
 0x3a2   : > { %v3187_v13 = vpop.f32.mrf.mxu3  ;;  %v7828_v1 = vadd.f32 %v3179_v59, %v2971_v62 }
 0x3a3   : > { %3340 = vmatmul.f32.gmra.mxu0 %v7673_v36  ;;  %v7831_v57 = vadd.f32 %v2893_v6, %v2797_v34 }
 0x3a4   : > { %3569 = vmatmul.f32.gmra.mxu2 %v9546_v24 }
 0x3a6   : > { %v2901_v29 = vpop.f32.mrf.mxu1 }
 0x3a7   : > { %v2978_v25 = vpop.f32.mrf.mxu2  ;;  %3674 = vmatmul.f32.gmra.mxu3 %v9548_v60 }
 0x3a8   : > { %v2979_v33 = vadd.f32 %v2978_v25, %v7720_v10  ;;  %v2800_v44 = vpop.f32.mrf.mxu0 }
 0x3a9   : > { %3478 = vmatmul.f32.gmra.mxu1 %v3054_v27  ;;  %v2801_v50 = vadd.f32 %v2800_v44, %v7757_v37 }
 0x3aa   : > { %v3191_v3 = vpop.f32.mrf.mxu3  ;;  %v7839_v2 = vadd.f32 %v3183_v31, %v2979_v33 }
 0x3ab   : > { %3345 = vmatmul.f32.gmra.mxu0 %v7701_v21  ;;  %v7842_v36 = vadd.f32 %v2897_v4, %v2801_v50 }
 0x3ac   : > { %3573 = vmatmul.f32.gmra.mxu2 %v9547_v40 }
 0x3ae   : > { %v2905_v49 = vpop.f32.mrf.mxu1 }
 0x3af   : > { %v2986_v0 = vpop.f32.mrf.mxu2  ;;  %3678 = vmatmul.f32.gmra.mxu3 %v9549_v30 }
 0x3b0   : > { %v2987_v10 = vadd.f32 %v2986_v0, %v7741_v11  ;;  %v2804_v56 = vpop.f32.mrf.mxu0 }
 0x3b1   : > { %3484 = vmatmul.f32.gmra.mxu1 %v3062_v7  ;;  %v2805_v27 = vadd.f32 %v2804_v56, %v7774_v41 }
 0x3b2   : > { %v3195_v37 = vpop.f32.mrf.mxu3  ;;  %v7850_v46 = vadd.f32 %v3187_v13, %v2987_v10 }
 0x3b3   : > { %3350 = vmatmul.f32.gmra.mxu0 %v7727_v19  ;;  %v7853_v21 = vadd.f32 %v2901_v29, %v2805_v27 }
 0x3b4   : > { %3577 = vmatmul.f32.gmra.mxu2 %v9548_v60 }
 0x3b6   : > { %v3395_v8 = vpop.f32.mrf.mxu1 }
 0x3b7   : > { %v2994_v55 = vpop.f32.mrf.mxu2  ;;  %3682 = vmatmul.f32.gmra.mxu3 %v9550_v38 }
 0x3b8   : > { %v2995_v11 = vadd.f32 %v2994_v55, %v7760_v20  ;;  %v2808_v59 = vpop.f32.mrf.mxu0 }
 0x3b9   : > { %v2809_v7 = vadd.f32 %v2808_v59, %v7787_v23 }
 0x3ba   : > { %v7859_v6 = vpop.f32.mrf.mxu3  ;;  %v7861_v41 = vadd.f32 %v3191_v3, %v2995_v11 }
 0x3bb   : > { %3355 = vmatmul.f32.gmra.mxu0 %v7748_v42  ;;  %v7864_v19 = vadd.f32 %v2905_v49, %v2809_v7 }
 0x3bc   : > { %3581 = vmatmul.f32.gmra.mxu2 %v9549_v30 }
 0x3be   : > { %v3401_v45 = vpop.f32.mrf.mxu1 }
 0x3bf   : > { %v3002_v24 = vpop.f32.mrf.mxu2  ;;  %3686 = vmatmul.f32.gmra.mxu3 %v7588_v54 }
 0x3c0   : > { %v3003_v26 = vadd.f32 %v3002_v24, %v7777_v28  ;;  %v3281_v20 = vpop.f32.mrf.mxu0  ;;  %v2785_v28 = vadd.f32 %v7793_v9, %v7667_v35 }
 0x3c1   : > { %v3282_v22 = vadd.f32 %v3281_v20, %v7797_v51 }
 0x3c2   : > { %v3203_v23 = vpop.f32.mrf.mxu3  ;;  %v7870_v63 = vadd.f32 %v3195_v37, %v3003_v26  ;;  %v2882_v34 = vadd.f32 %v7779_v58, %v2785_v28 }
 0x3c3   : > { %v7872_v31 = vadd.f32 %v3395_v8, %v3282_v22 }
 0x3c4   : > { %3585 = vmatmul.f32.gmra.mxu2 %v9550_v38 }
 0x3c6   : > { %v3407_v42 = vpop.f32.mrf.mxu1 }
 0x3c7   : > { %v7875_v4 = vpop.f32.mrf.mxu2  ;;  %3690 = vmatmul.f32.gmra.mxu3 %v7614_v47 }
 0x3c8   : > { %v3286_v17 = vpop.f32.mrf.mxu0 }
 0x3c9   : > { %v3287_v40 = vadd.f32 %v3286_v17, %v7806_v14 }
 0x3ca   : > { %v3207_v62 = vpop.f32.mrf.mxu3 }
 0x3cb   : > { %v7881_v51 = vadd.f32 %v3401_v45, %v3287_v40 }
 0x3cc   : > { %3589 = vmatmul.f32.gmra.mxu2 %v7588_v54 }
 0x3ce   : > { %v3413_v53 = vpop.f32.mrf.mxu1 }
 0x3cf   : > { %v3018_v13 = vpop.f32.mrf.mxu2  ;;  %3694 = vmatmul.f32.gmra.mxu3 %v7640_v61 }
 0x3d0   : > { %v3019_v29 = vadd.f32 %v3018_v13, %v2882_v34  ;;  %v3291_v25 = vpop.f32.mrf.mxu0 }
 0x3d1   : > { %v3292_v60 = vadd.f32 %v3291_v25, %v7817_v18 }
 0x3d2   : > { %v3211_v33 = vpop.f32.mrf.mxu3  ;;  %v7887_v14 = vadd.f32 %v3203_v23, %v3019_v29 }
 0x3d3   : > { %v7889_v44 = vadd.f32 %v3407_v42, %v3292_v60 }
 0x3d4   : > { %3593 = vmatmul.f32.gmra.mxu2 %v7614_v47 }
 0x3d6   : > { %v3419_v9 = vpop.f32.mrf.mxu1 }
 0x3d7   : > { %v3026_v35 = vpop.f32.mrf.mxu2  ;;  %3698 = vmatmul.f32.gmra.mxu3 %v7661_v16 }
 0x3d8   : > { %v3027_v54 = vadd.f32 %v3026_v35, %v7809_v12  ;;  %v3296_v58 = vpop.f32.mrf.mxu0 }
 0x3d9   : > { %v3297_v50 = vadd.f32 %v3296_v58, %v7828_v1 }
 0x3da   : > { %v3215_v3 = vpop.f32.mrf.mxu3  ;;  %v7895_v49 = vadd.f32 %v3207_v62, %v3027_v54 }
 0x3db   : > { %v7897_v18 = vadd.f32 %v3413_v53, %v3297_v50 }
 0x3dc   : > { %3597 = vmatmul.f32.gmra.mxu2 %v7640_v61 }
 0x3de   : > { %v3425_v56 = vpop.f32.mrf.mxu1 }
 0x3df   : > { %v3034_v0 = vpop.f32.mrf.mxu2  ;;  %3702 = vmatmul.f32.gmra.mxu3 %v7686_v32 }
 0x3e0   : > { %v3035_v47 = vadd.f32 %v3034_v0, %v7820_v39  ;;  %v3301_v30 = vpop.f32.mrf.mxu0 }
 0x3e1   : > { %v3302_v10 = vadd.f32 %v3301_v30, %v7839_v2 }
 0x3e2   : > { %v3219_v12 = vpop.f32.mrf.mxu3  ;;  %v7903_v27 = vadd.f32 %v3211_v33, %v3035_v47 }
 0x3e3   : > { %v3420_v1 = vadd.f32 %v3419_v9, %v3302_v10 }
 0x3e4   : > { %3601 = vmatmul.f32.gmra.mxu2 %v7661_v16 }
 0x3e6   : > { %v3431_v39 = vpop.f32.mrf.mxu1 }
 0x3e7   : > { %v3042_v37 = vpop.f32.mrf.mxu2  ;;  %3706 = vmatmul.f32.gmra.mxu3 %v7714_v52 }
 0x3e8   : > { %v3043_v61 = vadd.f32 %v3042_v37, %v7831_v57  ;;  %v3306_v8 = vpop.f32.mrf.mxu0 }
 0x3e9   : > { %v3307_v55 = vadd.f32 %v3306_v8, %v7850_v46  ;;  %v2781_v46 = vadd.f32 %v7783_v48, %v7642_v5 }
 0x3ea   : > { %v7909_v38 = vadd.f32 %v3215_v3, %v3043_v61  ;;  %v3223_v2 = vpop.f32.mrf.mxu3 }
 0x3eb   : > { %v3426_v11 = vadd.f32 %v3425_v56, %v3307_v55  ;;  %v2878_v42 = vadd.f32 %v7762_v43, %v2781_v46 }
 0x3ec   : > { %3605 = vmatmul.f32.gmra.mxu2 %v7686_v32 }
 0x3ee   : > { %v3437_v26 = vpop.f32.mrf.mxu1 }
 0x3ef   : > { %v3050_v59 = vpop.f32.mrf.mxu2  ;;  %3710 = vmatmul.f32.gmra.mxu3 %v7736_v15 }
 0x3f0   : > { %v3051_v16 = vadd.f32 %v3050_v59, %v7842_v36  ;;  %v3311_v7 = vpop.f32.mrf.mxu0 }
 0x3f1   : > { %v3312_v45 = vadd.f32 %v3311_v7, %v7861_v41  ;;  %v3011_v41 = vadd.f32 %v7875_v4, %v2878_v42 }
 0x3f2   : > { %v7915_v24 = vadd.f32 %v3219_v12, %v3051_v16  ;;  %v3227_v20 = vpop.f32.mrf.mxu3 }
 0x3f3   : > { %v3432_v57 = vadd.f32 %v3431_v39, %v3312_v45  ;;  %v3200_v5 = vadd.f32 %v7859_v6, %v3011_v41 }
 0x3f4   : > { %3609 = vmatmul.f32.gmra.mxu2 %v7714_v52 }
 0x3f6   : > { %v3443_v52 = vpop.f32.mrf.mxu1 }
 0x3f7   : > { %v3058_v32 = vpop.f32.mrf.mxu2 }
 0x3f8   : > { %v3059_v22 = vadd.f32 %v3058_v32, %v7853_v21  ;;  %v3316_v23 = vpop.f32.mrf.mxu0 }
 0x3f9   : > { %v3317_v36 = vadd.f32 %v3316_v23, %v7870_v63 }
 0x3fa   : > { %v7923_v17 = vadd.f32 %v3223_v2, %v3059_v22  ;;  %v3651_v62 = vpop.f32.mrf.mxu3 }
 0x3fb   : > { %v3438_v40 = vadd.f32 %v3437_v26, %v3317_v36 }
 0x3fc   : > { %3613 = vmatmul.f32.gmra.mxu2 %v7736_v15 }
 0x3fe   : > { %v3449_v25 = vpop.f32.mrf.mxu1 }
 0x3ff   : > { %v3066_v28 = vpop.f32.mrf.mxu2 }
 0x400   : > { %v3067_v48 = vadd.f32 %v3066_v28, %v7864_v19  ;;  %v3321_v21 = vpop.f32.mrf.mxu0 }
 0x401   : > { %v3322_v53 = vadd.f32 %v3321_v21, %v3200_v5 }
 0x402   : > { %v7929_v34 = vadd.f32 %v3227_v20, %v3067_v48  ;;  %v3655_v60 = vpop.f32.mrf.mxu3 }
 0x403   : > { %v3444_v43 = vadd.f32 %v3443_v52, %v3322_v53 }
 0x407   : > { %v3554_v63 = vpop.f32.mrf.mxu2 }
 0x408   : > { %v3555_v13 = vadd.f32 %v3554_v63, %v7872_v31  ;;  %v3326_v29 = vpop.f32.mrf.mxu0 }
 0x409   : > { %v3327_v4 = vadd.f32 %v3326_v29, %v7887_v14 }
 0x40a   : > { %v7933_v15 = vadd.f32 %v3651_v62, %v3555_v13  ;;  %v3659_v9 = vpop.f32.mrf.mxu3 }
 0x40b   : > { %v3450_v33 = vadd.f32 %v3449_v25, %v3327_v4 }
 0x40c   : > { %9551 = vst [vmem:[#allocation49_spill] sm:$0xff] %v7933_v15  ;;  %v7949_v2 = vmul.f32 0.70710677, %v7933_v15 }
 0x40e   : > { %9557 = vst [vmem:[#allocation34_spill] sm:$0xff] %v7949_v2 }
 0x40f   : > { %v3558_v6 = vpop.f32.mrf.mxu2 }
 0x410   : > { %v3559_v19 = vadd.f32 %v3558_v6, %v7881_v51  ;;  %v7983_v4 = vpop.f32.mrf.mxu0 }
 0x412   : > { %v7936_v35 = vadd.f32 %v3655_v60, %v3559_v19  ;;  %v3663_v31 = vpop.f32.mrf.mxu3 }
 0x414   : > { %9552 = vst [vmem:[#allocation26_spill] sm:$0xff] %v7936_v35 }
 0x417   : > { %v3562_v54 = vpop.f32.mrf.mxu2 }
 0x418   : > { %v3563_v58 = vadd.f32 %v3562_v54, %v7889_v44 }
 0x41a   : > { %v7939_v50 = vadd.f32 %v3659_v9, %v3563_v58  ;;  %v3667_v30 = vpop.f32.mrf.mxu3 }
 0x41c   : > { %9553 = vst [vmem:[#allocation23_spill] sm:$0xff] %v7939_v50  ;;  %v7972_v5 = vmul.f32 0.70710677, %v7939_v50 }
 0x41e   : > { %9562 = vst [vmem:[#allocation29_spill] sm:$0xff] %v7972_v5  ;;  %v3826_v53 = vmul.f32 %v7972_v5, %v7972_v5 }
 0x41f   : > { %v3566_v3 = vpop.f32.mrf.mxu2 }
 0x420   : > { %v3567_v14 = vadd.f32 %v3566_v3, %v7897_v18  ;;  %v7952_v18 = vmul.f32 0.70710677, %v7936_v35 }
 0x422   : > { %v7942_v0 = vadd.f32 %v3663_v31, %v3567_v14  ;;  %v3671_v12 = vpop.f32.mrf.mxu3  ;;  %9558 = vst [vmem:[#allocation47_spill] sm:$0xff] %v7952_v18  ;;  %v3786_v45 = vmul.f32 %v7952_v18, %v7952_v18 }
 0x424   : > { %9554 = vst [vmem:[#allocation18_spill] sm:$0xff] %v7942_v0  ;;  %v7964_v20 = vmin.f32 %v3786_v45, 16.0  ;;  %v7976_v62 = vmul.f32 0.70710677, %v7942_v0 }
 0x426   : > { %v3799_v22 = vmul.f32 3.8918573e-05, %v7964_v20  ;;  %9563 = vst [vmem:[#allocation48_spill] sm:$0xff] %v7976_v62  ;;  %v3866_v25 = vmul.f32 %v7976_v62, %v7976_v62  ;;  %v3788_v19 = vmul.f32 2.1237322e-06, %v7964_v20 }
 0x427   : > { %v3570_v47 = vpop.f32.mrf.mxu2 }
 0x428   : > { %v3571_v10 = vadd.f32 %v3570_v47, %v3420_v1  ;;  %v3746_v1 = vmul.f32 %v7949_v2, %v7949_v2  ;;  %v3800_v41 = vadd.f32 0.001143296, %v3799_v22  ;;  %v7992_v54 = vmin.f32 %v3866_v25, 16.0 }
 0x42a   : > { %v7944_v56 = vadd.f32 %v3667_v30, %v3571_v10  ;;  %v3675_v44 = vpop.f32.mrf.mxu3  ;;  %v7962_v26 = vmin.f32 %v3746_v1, 16.0  ;;  %v3801_v48 = vmul.f32 %v3800_v41, %v7964_v20  ;;  %v3789_v30 = vadd.f32 0.00028619796, %v3788_v19 }
 0x42c   : > { %9555 = vst [vmem:[#allocation24_spill] sm:$0xff] %v7944_v56  ;;  %v3759_v32 = vmul.f32 3.8918573e-05, %v7962_v26  ;;  %v3748_v13 = vmul.f32 2.1237322e-06, %v7962_v26 }
 0x42d   : > { %v3802_v29 = vadd.f32 0.014752088, %v3801_v48  ;;  %v7996_v3 = vmul.f32 0.70710677, %v7944_v56 }
 0x42e   : > { %v3760_v42 = vadd.f32 0.001143296, %v3759_v32  ;;  %v3749_v6 = vadd.f32 0.00028619796, %v3748_v13 }
 0x42f   : > { %v3574_v51 = vpop.f32.mrf.mxu2  ;;  %v3803_v9 = vmul.f32 %v3802_v29, %v7964_v20  ;;  %9565 = vst [vmem:[#allocation27_spill] sm:$0xff] %v7996_v3 }
 0x430   : > { %v3575_v37 = vadd.f32 %v3574_v51, %v3426_v11  ;;  %v3761_v28 = vmul.f32 %v3760_v42, %v7962_v26  ;;  %v3750_v47 = vmul.f32 %v3749_v6, %v7962_v26  ;;  %v3879_v51 = vmul.f32 3.8918573e-05, %v7992_v54 }
 0x431   : > { %v3804_v10 = vadd.f32 0.112945676, %v3803_v9 }
 0x432   : > { %v7946_v8 = vadd.f32 %v3671_v12, %v3575_v37  ;;  %v3679_v16 = vpop.f32.mrf.mxu3  ;;  %v3762_v21 = vadd.f32 0.014752088, %v3761_v28  ;;  %v3751_v1 = vadd.f32 0.0036580483, %v3750_v47  ;;  %v3868_v28 = vmul.f32 2.1237322e-06, %v7992_v54 }
 0x434   : > { %9556 = vst [vmem:[#allocation25_spill] sm:$0xff] %v7946_v8  ;;  %v3763_v60 = vmul.f32 %v3762_v21, %v7962_v26  ;;  %v3752_v42 = vmul.f32 %v3751_v1, %v7962_v26  ;;  %v3869_v19 = vadd.f32 0.00028619796, %v3868_v28 }
 0x436   : > { %v3764_v58 = vadd.f32 0.112945676, %v3763_v60  ;;  %v3753_v25 = vadd.f32 0.05243302, %v3752_v42 }
 0x437   : > { %v3578_v61 = vpop.f32.mrf.mxu2 }
 0x438   : > { %v3579_v39 = vadd.f32 %v3578_v61, %v3432_v57  ;;  %v3765_v12 = vmul.f32 %v3764_v58, %v7962_v26  ;;  %v3906_v61 = vmul.f32 %v7996_v3, %v7996_v3 }
 0x43a   : > { %v7954_v59 = vadd.f32 %v3675_v44, %v3579_v39  ;;  %v3683_v23 = vpop.f32.mrf.mxu3  ;;  %v8005_v39 = vmul.f32 0.70710677, %v7946_v8  ;;  %v3766_v45 = vadd.f32 0.4994258, %v3765_v12  ;;  %v8010_v32 = vmin.f32 %v3906_v61, 16.0 }
 0x43b   : > { %v3754_v12 = vmul.f32 %v3753_v25, %v7962_v26 }
 0x43c   : > { %9559 = vst [vmem:[#allocation16_spill] sm:$0xff] %v7954_v59  ;;  %v3767_v21 = vmul.f32 %v3766_v45, %v7962_v26 }
 0x43d   : > { %9566 = vst [vmem:[#allocation15_spill] sm:$0xff] %v8005_v39  ;;  %v3755_v42 = vadd.f32 0.18741608, %v3754_v12 }
 0x43f   : > { %v3582_v55 = vpop.f32.mrf.mxu2 }
 0x440   : > { %v3583_v7 = vadd.f32 %v3582_v55, %v3438_v40  ;;  %v3336_v55 = vpop.f32.mrf.mxu0 }
 0x442   : > { %v7960_v46 = vadd.f32 %v3679_v16, %v3583_v7  ;;  %v3790_v16 = vmul.f32 %v3789_v30, %v7964_v20  ;;  %v3805_v7 = vmul.f32 %v3804_v10, %v7964_v20 }
 0x444   : > { %9560 = vst [vmem:[#allocation22_spill] sm:$0xff] %v7960_v46  ;;  %v3791_v41 = vadd.f32 0.0036580483, %v3790_v16 }
 0x446   : > { %v3792_v60 = vmul.f32 %v3791_v41, %v7964_v20 }
 0x447   : > { %v3586_v11 = vpop.f32.mrf.mxu2 }
 0x448   : > { %v3587_v57 = vadd.f32 %v3586_v11, %v3444_v43  ;;  %v3687_v43 = vpop.f32.mrf.mxu3  ;;  %v3880_v11 = vadd.f32 0.001143296, %v3879_v51 }
 0x44a   : > { %v7968_v40 = vadd.f32 %v3683_v23, %v3587_v57  ;;  %v3946_v23 = vmul.f32 %v8005_v39, %v8005_v39  ;;  %v3881_v48 = vmul.f32 %v3880_v11, %v7992_v54 }
 0x44c   : > { %9561 = vst [vmem:[#allocation12_spill] sm:$0xff] %v7968_v40  ;;  %v8020_v29 = vmin.f32 %v3946_v23, 16.0  ;;  %v3882_v58 = vadd.f32 0.014752088, %v3881_v48  ;;  %v8041_v23 = vmul.f32 0.70710677, %v7954_v59  ;;  %v3332_v48 = vadd.f32 %v7983_v4, %v7895_v49 }
 0x44e   : > { %v3959_v51 = vmul.f32 3.8918573e-05, %v8020_v29  ;;  %v3883_v1 = vmul.f32 %v3882_v58, %v7992_v54  ;;  %9569 = vst [vmem:[#allocation53_spill] sm:$0xff] %v8041_v23 }
 0x44f   : > { %v3590_v36 = vpop.f32.mrf.mxu2 }
 0x450   : > { %v3591_v52 = vadd.f32 %v3590_v36, %v3450_v33  ;;  %v7988_v33 = vmin.f32 %v3826_v53, 16.0  ;;  %v3455_v36 = vpop.f32.mrf.mxu1  ;;  %v8038_v45 = vpop.f32.mrf.mxu3  ;;  %v3884_v28 = vadd.f32 0.112945676, %v3883_v1 }
 0x452   : > { %v7980_v63 = vadd.f32 %v3687_v43, %v3591_v52  ;;  %v3828_v31 = vmul.f32 2.1237322e-06, %v7988_v33  ;;  %v3839_v14 = vmul.f32 3.8918573e-05, %v7988_v33  ;;  %v3806_v52 = vadd.f32 0.4994258, %v3805_v7 }
 0x453   : > { %v3919_v43 = vmul.f32 3.8918573e-05, %v8010_v32 }
 0x454   : > { %9564 = vst [vmem:[#allocation39_spill] sm:$0xff] %v7980_v63  ;;  %v3829_v37 = vadd.f32 0.00028619796, %v3828_v31  ;;  %v3840_v44 = vadd.f32 0.001143296, %v3839_v14  ;;  %v3807_v6 = vmul.f32 %v3806_v52, %v7964_v20  ;;  %v3341_v31 = vpop.f32.mrf.mxu0  ;;  %v8026_v14 = vadd.f32 1.0, %v3767_v21 }
 0x455   : > { %v3920_v30 = vadd.f32 0.001143296, %v3919_v43 }
 0x456   : > { %v3830_v57 = vmul.f32 %v3829_v37, %v7988_v33  ;;  %v3841_v22 = vmul.f32 %v3840_v44, %v7988_v33  ;;  %9567 = vst [vmem:[#allocation14_spill] sm:$0xff] %v8026_v14  ;;  %v3793_v37 = vadd.f32 0.05243302, %v3792_v60  ;;  %v8032_v61 = vadd.f32 1.0, %v3807_v6 }
 0x457   : > { %v8024_v9 = vpop.f32.mrf.mxu2  ;;  %v3870_v44 = vmul.f32 %v3869_v19, %v7992_v54  ;;  %5015 = vrcp.f32 %v8026_v14  ;;  %v3921_v11 = vmul.f32 %v3920_v30, %v8010_v32  ;;  %v3986_v19 = vmul.f32 %v8041_v23, %v8041_v23 }
 0x458   : > { %v3831_v53 = vadd.f32 0.0036580483, %v3830_v57  ;;  %v3842_v13 = vadd.f32 0.014752088, %v3841_v22  ;;  %9568 = vst [vmem:[#allocation45_spill] sm:$0xff] %v8032_v61  ;;  %v3461_v16 = vpop.f32.mrf.mxu1  ;;  %v3794_v41 = vmul.f32 %v3793_v37, %v7964_v20  ;;  %5017 = vrcp.f32 %v8032_v61 }
 0x459   : > { %v3960_v22 = vadd.f32 0.001143296, %v3959_v51  ;;  %v3871_v52 = vadd.f32 0.0036580483, %v3870_v44  ;;  %v3922_v43 = vadd.f32 0.014752088, %v3921_v11  ;;  %v3456_v37 = vadd.f32 %v3455_v36, %v3332_v48 }
 0x45a   : > { %v3832_v47 = vmul.f32 %v3831_v53, %v7988_v33  ;;  %v3843_v10 = vmul.f32 %v3842_v13, %v7988_v33  ;;  %v3337_v53 = vadd.f32 %v3336_v55, %v7903_v27  ;;  %v3795_v49 = vadd.f32 0.18741608, %v3794_v41  ;;  %v3695_v41 = vpop.f32.mrf.mxu3 }
 0x45b   : > { %v3961_v6 = vmul.f32 %v3960_v22, %v8020_v29  ;;  %v3872_v4 = vmul.f32 %v3871_v52, %v7992_v54  ;;  %v3885_v27 = vmul.f32 %v3884_v28, %v7992_v54  ;;  %v3342_v55 = vadd.f32 %v3341_v31, %v7909_v38 }
 0x45c   : > { %v3833_v7 = vadd.f32 0.05243302, %v3832_v47  ;;  %v3844_v57 = vadd.f32 0.112945676, %v3843_v10  ;;  %v3346_v60 = vpop.f32.mrf.mxu0  ;;  %v3756_v47 = vmul.f32 %v3755_v42, %v7962_v26  ;;  %v3908_v30 = vmul.f32 2.1237322e-06, %v8010_v32 }
 0x45d   : > { %v8055_v58 = vpop.eup %5015  ;;  %v3923_v12 = vmul.f32 %v3922_v43, %v8010_v32  ;;  %v3462_v44 = vadd.f32 %v3461_v16, %v3337_v53  ;;  %v8067_v11 = vmin.f32 %v3986_v19, 16.0  ;;  %v3796_v38 = vmul.f32 %v3795_v49, %v7964_v20 }
 0x45e   : > { %v3834_v21 = vmul.f32 %v3833_v7, %v7988_v33  ;;  %v3845_v25 = vmul.f32 %v3844_v57, %v7988_v33  ;;  %9570 = vst [vmem:[#allocation30_spill] sm:$0xff] %v8055_v58  ;;  %v8062_v10 = vpop.eup %5017  ;;  %v3770_v1 = vmul.f32 %v8055_v58, %v8026_v14  ;;  %v3962_v7 = vadd.f32 0.014752088, %v3961_v6 }
 0x45f   : > { %v8049_v13 = vpop.f32.mrf.mxu2  ;;  %9571 = vst [vmem:[#allocation28_spill] sm:$0xff] %v8062_v10  ;;  %v8069_v57 = vadd.f32 1.1283791, %v3756_v47  ;;  %v3873_v22 = vadd.f32 0.05243302, %v3872_v4  ;;  %v3810_v36 = vmul.f32 %v8062_v10, %v8032_v61  ;;  %v3347_v4 = vadd.f32 %v3346_v60, %v7915_v24 }
 0x460   : > { %v3835_v51 = vadd.f32 0.18741608, %v3834_v21  ;;  %v3846_v26 = vadd.f32 0.4994258, %v3845_v25  ;;  %v3467_v31 = vpop.f32.mrf.mxu1  ;;  %v8073_v42 = vmul.f32 0.70710677, %v7960_v46  ;;  %v3963_v6 = vmul.f32 %v3962_v7, %v8020_v29 }
 0x461   : > { %9572 = vst [vmem:[#allocation50_spill] sm:$0xff] %v8069_v57  ;;  %v3886_v16 = vadd.f32 0.4994258, %v3885_v27  ;;  %v3909_v52 = vadd.f32 0.00028619796, %v3908_v30  ;;  %v3468_v28 = vadd.f32 %v3467_v31, %v3342_v55  ;;  %v3771_v20 = vsub.f32 1.0, %v3770_v1 }
 0x462   : > { %9573 = vst [vmem:[#allocation46_spill] sm:$0xff] %v8073_v42  ;;  %v3836_v21 = vmul.f32 %v3835_v51, %v7988_v33  ;;  %v3924_v53 = vadd.f32 0.112945676, %v3923_v12  ;;  %v3948_v43 = vmul.f32 2.1237322e-06, %v8020_v29  ;;  %v3847_v25 = vmul.f32 %v3846_v26, %v7988_v33 }
 0x463   : > { %v3999_v19 = vmul.f32 3.8918573e-05, %v8067_v11  ;;  %v8083_v47 = vadd.f32 1.1283791, %v3796_v38  ;;  %v3874_v49 = vmul.f32 %v3873_v22, %v7992_v54  ;;  %v4026_v27 = vmul.f32 %v8073_v42, %v8073_v42 }
 0x464   : > { %v3811_v30 = vsub.f32 1.0, %v3810_v36  ;;  %v3887_v12 = vmul.f32 %v3886_v16, %v7992_v54  ;;  %v3910_v33 = vmul.f32 %v3909_v52, %v8010_v32  ;;  %v3351_v1 = vpop.f32.mrf.mxu0  ;;  %v8093_v7 = vadd.f32 1.1283791, %v3836_v21 }
 0x465   : > { %9574 = vst [vmem:[#allocation55_spill] sm:$0xff] %v8083_v47  ;;  %v3925_v38 = vmul.f32 %v3924_v53, %v8010_v32  ;;  %v3949_v31 = vadd.f32 0.00028619796, %v3948_v43  ;;  %v8097_v24 = vmul.f32 %v8055_v58, %v3771_v20  ;;  %v8099_v60 = vadd.f32 1.0, %v3847_v25 }
 0x466   : > { %9575 = vst [vmem:[#allocation43_spill] sm:$0xff] %v8093_v7  ;;  %v3964_v22 = vadd.f32 0.112945676, %v3963_v6  ;;  %v4000_v36 = vadd.f32 0.001143296, %v3999_v19  ;;  %v8102_v16 = vadd.f32 %v3351_v1, %v7923_v17  ;;  %v8104_v52 = vmin.f32 %v4026_v27, 16.0 }
 0x467   : > { %v3602_v55 = vpop.f32.mrf.mxu2  ;;  %9576 = vst [vmem:[#allocation31_spill] sm:$0xff] %v8097_v24  ;;  %v3875_v48 = vadd.f32 0.18741608, %v3874_v49  ;;  %v8107_v51 = vmul.f32 0.70710677, %v7968_v40  ;;  %v8110_v21 = vmul.f32 %v8062_v10, %v3811_v30  ;;  %v8112_v53 = vadd.f32 1.0, %v3887_v12  ;;  %v3699_v49 = vpop.f32.mrf.mxu3 }
 0x468   : > { %9577 = vst [vmem:[#allocation41_spill] sm:$0xff] %v8099_v60  ;;  %v3911_v43 = vadd.f32 0.0036580483, %v3910_v33  ;;  %v3595_v20 = vadd.f32 %v8024_v9, %v3456_v37  ;;  %v3926_v25 = vadd.f32 0.4994258, %v3925_v38  ;;  %v3950_v6 = vmul.f32 %v3949_v31, %v8020_v29  ;;  %v3473_v31 = vpop.f32.mrf.mxu1 }
 0x469   : > { %9578 = vst [vmem:[#allocation38_spill] sm:$0xff] %v8107_v51  ;;  %v3988_v19 = vmul.f32 2.1237322e-06, %v8067_v11  ;;  %v3599_v17 = vadd.f32 %v8049_v13, %v3462_v44  ;;  %5019 = vrcp.f32 %v8099_v60  ;;  %v3965_v30 = vmul.f32 %v3964_v22, %v8020_v29 }
 0x46a   : > { %9579 = vst [vmem:[#allocation42_spill] sm:$0xff] %v8110_v21  ;;  %v4001_v12 = vmul.f32 %v4000_v36, %v8067_v11  ;;  %v3876_v33 = vmul.f32 %v3875_v48, %v7992_v54  ;;  %v4039_v9 = vmul.f32 3.8918573e-05, %v8104_v52  ;;  %v4066_v37 = vmul.f32 %v8107_v51, %v8107_v51 }
 0x46b   : > { %9580 = vst [vmem:[#allocation44_spill] sm:$0xff] %v8112_v53  ;;  %v8127_v1 = vmul.f32 0.70710677, %v7980_v63  ;;  %5021 = vrcp.f32 %v8112_v53  ;;  %v3912_v13 = vmul.f32 %v3911_v43, %v8010_v32  ;;  %v8132_v44 = vadd.f32 %v8038_v45, %v3595_v20 }
 0x46c   : > { %v3603_v38 = vadd.f32 %v3602_v55, %v3468_v28  ;;  %v3927_v22 = vmul.f32 %v3926_v25, %v8010_v32  ;;  %v3951_v54 = vadd.f32 0.0036580483, %v3950_v6  ;;  %v3989_v48 = vadd.f32 0.00028619796, %v3988_v19  ;;  %v3356_v20 = vpop.f32.mrf.mxu0 }
 0x46d   : > { %9581 = vst [vmem:[#allocation59_spill] sm:$0xff] %v8127_v1  ;;  %v8135_v36 = vadd.f32 %v3695_v41, %v3599_v17  ;;  %v3966_v27 = vadd.f32 0.4994258, %v3965_v30  ;;  %v4002_v15 = vadd.f32 0.014752088, %v4001_v12  ;;  %v3474_v50 = vadd.f32 %v3473_v31, %v3347_v4 }
 0x46e   : > { %9582 = vst [vmem:[#allocation57_spill] sm:$0xff] %v8132_v44  ;;  %v4028_v35 = vmul.f32 2.1237322e-06, %v8104_v52  ;;  %v4040_v43 = vadd.f32 0.001143296, %v4039_v9  ;;  %v8139_v57 = vmin.f32 %v4066_v37, 16.0  ;;  %v4106_v45 = vmul.f32 %v8127_v1, %v8127_v1 }
 0x46f   : > { %9583 = vst [vmem:[#allocation35_spill] sm:$0xff] %v8135_v36  ;;  %v3606_v26 = vpop.f32.mrf.mxu2  ;;  %v8143_v28 = vpop.eup %5019  ;;  %v3913_v55 = vadd.f32 0.05243302, %v3912_v13  ;;  %v8146_v41 = vmul.f32 0.70710677, %v8132_v44  ;;  %v8148_v25 = vadd.f32 %v3699_v49, %v3603_v38  ;;  %v8152_v4 = vadd.f32 1.0, %v3927_v22 }
 0x470   : > { %9584 = vst [vmem:[#allocation54_spill] sm:$0xff] %v8143_v28  ;;  %v3607_v6 = vadd.f32 %v3606_v26, %v3474_v50  ;;  %v8150_v19 = vadd.f32 1.1283791, %v3876_v33  ;;  %v3990_v17 = vmul.f32 %v3989_v48, %v8067_v11  ;;  %v8156_v30 = vmul.f32 0.70710677, %v8135_v36  ;;  %v3703_v31 = vpop.f32.mrf.mxu3 }
 0x471   : > { %9585 = vst [vmem:[#allocation58_spill] sm:$0xff] %v8148_v25  ;;  %v8158_v12 = vpop.eup %5021  ;;  %v3952_v9 = vmul.f32 %v3951_v54, %v8020_v29  ;;  %v3967_v37 = vmul.f32 %v3966_v27, %v8020_v29  ;;  %v4003_v13 = vmul.f32 %v4002_v15, %v8067_v11  ;;  %v4029_v49 = vadd.f32 0.00028619796, %v4028_v35 }
 0x472   : > { %9586 = vst [vmem:[#allocation32_spill] sm:$0xff] %v8150_v19  ;;  %v8164_v50 = vadd.f32 %v3356_v20, %v7929_v34  ;;  %v4041_v26 = vmul.f32 %v4040_v43, %v8104_v52  ;;  %v4079_v33 = vmul.f32 3.8918573e-05, %v8139_v57  ;;  %v8168_v38 = vmin.f32 %v4106_v45, 16.0 }
 0x473   : > { %9587 = vst [vmem:[#allocation52_spill] sm:$0xff] %v8152_v4  ;;  %v3914_v22 = vmul.f32 %v3913_v55, %v8010_v32  ;;  %v4146_v54 = vmul.f32 %v8146_v41, %v8146_v41  ;;  %v8174_v27 = vmul.f32 0.70710677, %v8148_v25  ;;  %v8176_v15 = vadd.f32 %v3703_v31, %v3607_v6 }
 0x474   : > { %9588 = vst [vmem:[#allocation37_spill] sm:$0xff] %v8158_v12  ;;  %v3890_v34 = vmul.f32 %v8158_v12, %v8112_v53  ;;  %5023 = vrcp.f32 %v8152_v4  ;;  %v3991_v35 = vadd.f32 0.0036580483, %v3990_v17  ;;  %v4186_v48 = vmul.f32 %v8156_v30, %v8156_v30 }
 0x475   : > { %v3953_v43 = vadd.f32 0.05243302, %v3952_v9  ;;  %v8183_v45 = vadd.f32 1.0, %v3967_v37  ;;  %v4004_v55 = vadd.f32 0.112945676, %v4003_v13  ;;  %v4030_v20 = vmul.f32 %v4029_v49, %v8104_v52 }
 0x476   : > { %v3850_v0 = vmul.f32 %v8143_v28, %v8099_v60  ;;  %v4042_v6 = vadd.f32 0.014752088, %v4041_v26  ;;  %v4080_v31 = vadd.f32 0.001143296, %v4079_v33  ;;  %v4119_v2 = vmul.f32 3.8918573e-05, %v8168_v38 }
 0x477   : > { %v8190_v8 = vmin.f32 %v4146_v54, 16.0  ;;  %v4226_v17 = vmul.f32 %v8174_v27, %v8174_v27  ;;  %v8195_v9 = vmul.f32 0.70710677, %v8176_v15  ;;  %v3891_v37 = vsub.f32 1.0, %v3890_v34 }
 0x478   : > { %v3915_v13 = vadd.f32 0.18741608, %v3914_v22  ;;  %v3992_v49 = vmul.f32 %v3991_v35, %v8067_v11  ;;  %v8198_v47 = vmin.f32 %v4186_v48, 16.0  ;;  %v3954_v26 = vmul.f32 %v3953_v43, %v8020_v29 }
 0x479   : > { %5025 = vrcp.f32 %v8183_v45  ;;  %v4031_v33 = vadd.f32 0.0036580483, %v4030_v20  ;;  %v4266_v54 = vmul.f32 %v8195_v9, %v8195_v9  ;;  %v4005_v18 = vmul.f32 %v4004_v55, %v8067_v11 }
 0x47a   : > { %v8204_v56 = vpop.eup %5023  ;;  %v4043_v59 = vmul.f32 %v4042_v6, %v8104_v52  ;;  %v4081_v22 = vmul.f32 %v4080_v31, %v8139_v57  ;;  %v4120_v34 = vadd.f32 0.001143296, %v4119_v2  ;;  %v3851_v35 = vsub.f32 1.0, %v3850_v0 }
 0x47b   : > { %9589 = vst [vmem:[#allocation19_spill] sm:$0xff] %v8204_v56  ;;  %v4159_v48 = vmul.f32 3.8918573e-05, %v8190_v8  ;;  %v8210_v7 = vmin.f32 %v4226_v17, 16.0  ;;  %v8212_v43 = vmin.f32 %v4266_v54, 16.0  ;;  %v3916_v5 = vmul.f32 %v3915_v13, %v8010_v32 }
 0x47c   : > { %v3993_v24 = vadd.f32 0.05243302, %v3992_v49  ;;  %v4199_v46 = vmul.f32 3.8918573e-05, %v8198_v47  ;;  %v3892_v55 = vmul.f32 %v8158_v12, %v3891_v37  ;;  %v3930_v6 = vmul.f32 %v8204_v56, %v8152_v4 }
 0x47d   : > { %v3955_v2 = vadd.f32 0.18741608, %v3954_v26  ;;  %v4032_v0 = vmul.f32 %v4031_v33, %v8104_v52  ;;  %v4006_v31 = vadd.f32 0.4994258, %v4005_v18  ;;  %v4044_v17 = vadd.f32 0.112945676, %v4043_v59 }
 0x47e   : > { %v4082_v19 = vadd.f32 0.014752088, %v4081_v22  ;;  %v4121_v54 = vmul.f32 %v4120_v34, %v8168_v38  ;;  %v8225_v32 = vmul.f32 %v8143_v28, %v3851_v35  ;;  %v4160_v13 = vadd.f32 0.001143296, %v4159_v48 }
 0x47f   : > { %v8222_v62 = vpop.eup %5025  ;;  %v4239_v49 = vmul.f32 3.8918573e-05, %v8210_v7  ;;  %v4279_v37 = vmul.f32 3.8918573e-05, %v8212_v43  ;;  %v8229_v20 = vadd.f32 1.1283791, %v3916_v5  ;;  %v3994_v26 = vmul.f32 %v3993_v24, %v8067_v11 }
 0x480   : > { %9590 = vst [vmem:[#allocation13_spill] sm:$0xff] %v8225_v32  ;;  %v4068_v18 = vmul.f32 2.1237322e-06, %v8139_v57  ;;  %v4200_v59 = vadd.f32 0.001143296, %v4199_v46  ;;  %v3931_v33 = vsub.f32 1.0, %v3930_v6  ;;  %v3956_v22 = vmul.f32 %v3955_v2, %v8020_v29 }
 0x481   : > { %9591 = vst [vmem:[#allocation17_spill] sm:$0xff] %v8229_v20  ;;  %v4033_v34 = vadd.f32 0.05243302, %v4032_v0  ;;  %v4280_v21 = vadd.f32 0.001143296, %v4279_v37  ;;  %v8235_v35 = vadd.f32 %v8158_v12, %v3892_v55  ;;  %v3970_v48 = vmul.f32 %v8222_v62, %v8183_v45 }
 0x482   : > { %v4083_v14 = vmul.f32 %v4082_v19, %v8139_v57  ;;  %v4122_v5 = vadd.f32 0.014752088, %v4121_v54  ;;  %v4007_v58 = vmul.f32 %v4006_v31, %v8067_v11  ;;  %v4045_v24 = vmul.f32 %v4044_v17, %v8104_v52 }
 0x483   : > { %9592 = vst [vmem:[#allocation56_spill] sm:$0xff] %v8235_v35  ;;  %v4161_v46 = vmul.f32 %v4160_v13, %v8190_v8  ;;  %v4240_v6 = vadd.f32 0.001143296, %v4239_v49  ;;  %v3995_v2 = vadd.f32 0.18741608, %v3994_v26  ;;  %v4201_v55 = vmul.f32 %v4200_v59, %v8198_v47 }
 0x484   : > { %v4069_v0 = vadd.f32 0.00028619796, %v4068_v18  ;;  %v3932_v37 = vmul.f32 %v8204_v56, %v3931_v33  ;;  %v8246_v35 = vadd.f32 1.1283791, %v3956_v22  ;;  %v4034_v19 = vmul.f32 %v4033_v34, %v8104_v52 }
 0x485   : > { %v4281_v54 = vmul.f32 %v4280_v21, %v8212_v43  ;;  %v3971_v31 = vsub.f32 1.0, %v3970_v48  ;;  %v4084_v40 = vadd.f32 0.112945676, %v4083_v14  ;;  %v4123_v13 = vmul.f32 %v4122_v5, %v8168_v38  ;;  %v3479_v48 = vpop.f32.mrf.mxu1 }
 0x486   : > { %9593 = vst [vmem:[#allocation36_spill] sm:$0xff] %v8246_v35  ;;  %v8252_v49 = vadd.f32 1.0, %v4007_v58  ;;  %v4046_v26 = vadd.f32 0.4994258, %v4045_v24  ;;  %v4162_v18 = vadd.f32 0.014752088, %v4161_v46  ;;  %v4241_v59 = vmul.f32 %v4240_v6, %v8210_v7 }
 0x487   : > { %v3996_v22 = vmul.f32 %v3995_v2, %v8067_v11  ;;  %v4070_v34 = vmul.f32 %v4069_v0, %v8139_v57  ;;  %v4202_v29 = vadd.f32 0.014752088, %v4201_v55  ;;  %v8259_v21 = vadd.f32 %v8204_v56, %v3932_v37  ;;  %v3610_v55 = vpop.f32.mrf.mxu2 }
 0x488   : > { %v4035_v14 = vadd.f32 0.18741608, %v4034_v19  ;;  %v4108_v5 = vmul.f32 2.1237322e-06, %v8168_v38  ;;  %v4282_v58 = vadd.f32 0.014752088, %v4281_v54  ;;  %v3972_v24 = vmul.f32 %v8222_v62, %v3971_v31 }
 0x489   : > { %9594 = vst [vmem:[#allocation33_spill] sm:$0xff] %v8259_v21  ;;  %v4085_v46 = vmul.f32 %v4084_v40, %v8139_v57  ;;  %v4124_v6 = vadd.f32 0.112945676, %v4123_v13  ;;  %v3480_v17 = vadd.f32 %v3479_v48, %v8102_v16  ;;  %5027 = vrcp.f32 %v8252_v49  ;;  %v3707_v48 = vpop.f32.mrf.mxu3 }
 0x48a   : > { %v4047_v11 = vmul.f32 %v4046_v26, %v8104_v52  ;;  %v4163_v2 = vmul.f32 %v4162_v18, %v8190_v8  ;;  %v4242_v0 = vadd.f32 0.014752088, %v4241_v59  ;;  %v8268_v37 = vadd.f32 1.1283791, %v3996_v22 }
 0x48b   : > { %v4071_v19 = vadd.f32 0.0036580483, %v4070_v34  ;;  %v4203_v54 = vmul.f32 %v4202_v29, %v8198_v47  ;;  %v3611_v33 = vadd.f32 %v3610_v55, %v3480_v17  ;;  %v4036_v31 = vmul.f32 %v4035_v14, %v8104_v52 }
 0x48c   : > { %9595 = vst [vmem:[#allocation40_spill] sm:$0xff] %v8268_v37  ;;  %v4109_v40 = vadd.f32 0.00028619796, %v4108_v5  ;;  %v4148_v13 = vmul.f32 2.1237322e-06, %v8190_v8  ;;  %v4283_v16 = vmul.f32 %v4282_v58, %v8212_v43  ;;  %v8275_v26 = vadd.f32 %v8222_v62, %v3972_v24 }
 0x48d   : > { %v4086_v18 = vadd.f32 0.4994258, %v4085_v46  ;;  %v4125_v59 = vmul.f32 %v4124_v6, %v8168_v38  ;;  %v8278_v22 = vadd.f32 %v3707_v48, %v3611_v33  ;;  %v8281_v29 = vadd.f32 1.0, %v4047_v11 }
 0x48e   : > { %9596 = vst [vmem:[#allocation51_spill] sm:$0xff] %v8275_v26  ;;  %v4164_v17 = vadd.f32 0.112945676, %v4163_v2  ;;  %v4243_v52 = vmul.f32 %v4242_v0, %v8210_v7  ;;  %v4072_v5 = vmul.f32 %v4071_v19, %v8139_v57  ;;  %v4204_v58 = vadd.f32 0.112945676, %v4203_v54 }
 0x48f   : > { %v8287_v24 = vmul.f32 0.70710677, %v8278_v22  ;;  %v8289_v46 = vpop.eup %5027  ;;  %v8291_v6 = vadd.f32 1.1283791, %v4036_v31  ;;  %v4110_v33 = vmul.f32 %v4109_v40, %v8168_v38  ;;  %v4149_v55 = vadd.f32 0.00028619796, %v4148_v13  ;;  %v3614_v35 = vpop.f32.mrf.mxu2 }
 0x490   : > { %v4284_v11 = vadd.f32 0.112945676, %v4283_v16  ;;  %v4087_v2 = vmul.f32 %v4086_v18, %v8139_v57  ;;  %v4126_v48 = vadd.f32 0.4994258, %v4125_v59  ;;  %v4188_v0 = vmul.f32 2.1237322e-06, %v8198_v47 }
 0x491   : > { %9597 = vst [vmem:[#allocation20_spill] sm:$0xff] %v8291_v6  ;;  %v4306_v19 = vmul.f32 %v8287_v24, %v8287_v24  ;;  %5029 = vrcp.f32 %v8281_v29  ;;  %v4165_v34 = vmul.f32 %v4164_v17, %v8190_v8  ;;  %v4244_v31 = vadd.f32 0.112945676, %v4243_v52 }
 0x492   : > { %v8303_v40 = vmul.f32 %v8289_v46, %v8252_v49  ;;  %v4073_v16 = vadd.f32 0.05243302, %v4072_v5  ;;  %v4205_v18 = vmul.f32 %v4204_v58, %v8198_v47  ;;  %v4111_v59 = vadd.f32 0.0036580483, %v4110_v33 }
 0x493   : > { %v4150_v14 = vmul.f32 %v4149_v55, %v8190_v8  ;;  %v4285_v20 = vmul.f32 %v4284_v11, %v8212_v43  ;;  %v8309_v3 = vmin.f32 %v4306_v19, 16.0  ;;  %v8311_v54 = vadd.f32 1.0, %v4087_v2 }
 0x494   : > { %v4127_v17 = vmul.f32 %v4126_v48, %v8168_v38  ;;  %v4189_v52 = vadd.f32 0.00028619796, %v4188_v0  ;;  %v4228_v32 = vmul.f32 2.1237322e-06, %v8210_v7  ;;  %v4166_v61 = vadd.f32 0.4994258, %v4165_v34  ;;  %v3485_v48 = vpop.f32.mrf.mxu1 }
 0x495   : > { %v4245_v13 = vmul.f32 %v4244_v31, %v8210_v7  ;;  %v4308_v5 = vmul.f32 2.1237322e-06, %v8309_v3  ;;  %v4319_v58 = vmul.f32 3.8918573e-05, %v8309_v3  ;;  %v4074_v55 = vmul.f32 %v4073_v16, %v8139_v57 }
 0x496   : > { %v4206_v11 = vadd.f32 0.4994258, %v4205_v18  ;;  %v4268_v2 = vmul.f32 2.1237322e-06, %v8212_v43  ;;  %v4112_v0 = vmul.f32 %v4111_v59, %v8168_v38  ;;  %v4151_v21 = vadd.f32 0.0036580483, %v4150_v14 }
 0x497   : > { %v8321_v19 = vpop.eup %5029  ;;  %v4286_v34 = vadd.f32 0.4994258, %v4285_v20  ;;  %v4320_v10 = vadd.f32 0.001143296, %v4319_v58  ;;  %5031 = vrcp.f32 %v8311_v54  ;;  %v8325_v31 = vadd.f32 1.0, %v4127_v17 }
 0x498   : > { %v4309_v63 = vadd.f32 0.00028619796, %v4308_v5  ;;  %v3486_v33 = vadd.f32 %v3485_v48, %v8164_v50  ;;  %v4167_v16 = vmul.f32 %v4166_v61, %v8190_v8  ;;  %v4190_v18 = vmul.f32 %v4189_v52, %v8198_v47  ;;  %v3711_v48 = vpop.f32.mrf.mxu3 }
 0x499   : > { %v4229_v39 = vadd.f32 0.00028619796, %v4228_v32  ;;  %v4246_v60 = vadd.f32 0.4994258, %v4245_v13  ;;  %v4207_v28 = vmul.f32 %v4206_v11, %v8198_v47  ;;  %v4269_v59 = vadd.f32 0.00028619796, %v4268_v2 }
 0x49a   : > { %v4321_v20 = vmul.f32 %v4320_v10, %v8309_v3  ;;  %v3615_v14 = vadd.f32 %v3614_v35, %v3486_v33  ;;  %v4050_v17 = vmul.f32 %v8321_v19, %v8281_v29  ;;  %v4113_v58 = vadd.f32 0.05243302, %v4112_v0 }
 0x49b   : > { %v4152_v5 = vmul.f32 %v4151_v21, %v8190_v8  ;;  %v4287_v50 = vmul.f32 %v4286_v34, %v8212_v43  ;;  %5033 = vrcp.f32 %v8325_v31  ;;  %v4310_v61 = vmul.f32 %v4309_v63, %v8309_v3 }
 0x49c   : > { %v4322_v32 = vadd.f32 0.014752088, %v4321_v20  ;;  %v8338_v13 = vadd.f32 %v3711_v48, %v3615_v14  ;;  %v8340_v52 = vadd.f32 1.0, %v4167_v16  ;;  %v4191_v10 = vadd.f32 0.0036580483, %v4190_v18 }
 0x49d   : > { %v4230_v35 = vmul.f32 %v4229_v39, %v8210_v7  ;;  %v4247_v33 = vmul.f32 %v4246_v60, %v8210_v7  ;;  %v8344_v11 = vpop.eup %5031  ;;  %v8346_v21 = vadd.f32 1.0, %v4207_v28  ;;  %v4270_v2 = vmul.f32 %v4269_v59, %v8212_v43 }
 0x49e   : > { %v4323_v0 = vmul.f32 %v4322_v32, %v8309_v3  ;;  %v8351_v63 = vmul.f32 0.70710677, %v8338_v13  ;;  %v4051_v34 = vsub.f32 1.0, %v4050_v17  ;;  %v4075_v20 = vadd.f32 0.18741608, %v4074_v55 }
 0x49f   : > { %v4153_v16 = vadd.f32 0.05243302, %v4152_v5  ;;  %v8353_v14 = vadd.f32 1.0, %v4287_v50  ;;  %v4114_v39 = vmul.f32 %v4113_v58, %v8168_v38  ;;  %v4311_v18 = vadd.f32 0.0036580483, %v4310_v61 }
 0x4a0   : > { %v4324_v60 = vadd.f32 0.112945676, %v4323_v0  ;;  %v4346_v28 = vmul.f32 %v8351_v63, %v8351_v63  ;;  %5035 = vrcp.f32 %v8340_v52  ;;  %v4192_v59 = vmul.f32 %v4191_v10, %v8198_v47 }
 0x4a1   : > { %v4231_v48 = vadd.f32 0.0036580483, %v4230_v35  ;;  %v8360_v32 = vadd.f32 1.0, %v4247_v33  ;;  %v8362_v44 = vpop.eup %5033  ;;  %5037 = vrcp.f32 %v8346_v21  ;;  %v4271_v55 = vadd.f32 0.0036580483, %v4270_v2 }
 0x4a2   : > { %v4325_v17 = vmul.f32 %v4324_v60, %v8309_v3  ;;  %v8366_v58 = vmin.f32 %v4346_v28, 16.0  ;;  %v4052_v5 = vmul.f32 %v8321_v19, %v4051_v34  ;;  %v4090_v50 = vmul.f32 %v8344_v11, %v8311_v54 }
 0x4a3   : > { %v4154_v61 = vmul.f32 %v4153_v16, %v8190_v8  ;;  %5039 = vrcp.f32 %v8353_v14  ;;  %v4312_v10 = vmul.f32 %v4311_v18, %v8309_v3  ;;  %v4130_v0 = vmul.f32 %v8362_v44, %v8325_v31 }
 0x4a4   : > { %v4326_v35 = vadd.f32 0.4994258, %v4325_v17  ;;  %v4348_v33 = vmul.f32 2.1237322e-06, %v8366_v58  ;;  %v4359_v2 = vmul.f32 3.8918573e-05, %v8366_v58  ;;  %v4232_v34 = vmul.f32 %v4231_v48, %v8210_v7 }
 0x4a5   : > { %v4193_v60 = vadd.f32 0.05243302, %v4192_v59  ;;  %5041 = vrcp.f32 %v8360_v32  ;;  %v4272_v28 = vmul.f32 %v4271_v55, %v8212_v43  ;;  %v9598_v17 = vand.u32 2147483648, %v8281_v29 }
 0x4a6   : > { %v4327_v16 = vmul.f32 %v4326_v35, %v8309_v3  ;;  %v4349_v37 = vadd.f32 0.00028619796, %v4348_v33  ;;  %v4360_v23 = vadd.f32 0.001143296, %v4359_v2  ;;  %v8382_v18 = vpop.eup %5035  ;;  %v4091_v53 = vsub.f32 1.0, %v4090_v50 }
 0x4a7   : > { %v8386_v26 = vor.u32 1.1754944e-38, %v9598_v17  ;;  %v4115_v12 = vadd.f32 0.18741608, %v4114_v39  ;;  %v4155_v36 = vadd.f32 0.18741608, %v4154_v61  ;;  %v8388_v59 = vpop.eup %5037  ;;  %v9600_v2 = vsub.f32 1.0, %v8303_v40 }
 0x4a8   : > { %v4313_v48 = vadd.f32 0.05243302, %v4312_v10  ;;  %v8390_v51 = vadd.f32 1.0, %v4327_v16  ;;  %v4350_v55 = vmul.f32 %v4349_v37, %v8366_v58  ;;  %v4361_v35 = vmul.f32 %v4360_v23, %v8366_v58 }
 0x4a9   : > { %9599 = vst [vmem:[#allocation21_spill] sm:$0xff] %v8386_v26  ;;  %v8394_v33 = vpop.eup %5039  ;;  %v8399_v6 = vmul.f32 %v8289_v46, %v9600_v2  ;;  %v8402_v50 = vadd.f32 %v8321_v19, %v4052_v5  ;;  %v8405_v39 = vmul.f32 %v4075_v20, %v8139_v57  ;;  %v4131_v61 = vsub.f32 1.0, %v4130_v0 }
 0x4aa   : > { %v4194_v10 = vmul.f32 %v4193_v60, %v8198_v47  ;;  %v4233_v16 = vadd.f32 0.05243302, %v4232_v34  ;;  %v4273_v37 = vadd.f32 0.05243302, %v4272_v28  ;;  %5043 = vrcp.f32 %v8390_v51 }
 0x4ab   : > { %9601 = vst [vmem:[#allocation60_spill] sm:$0xff] %v8402_v50  ;;  %v8409_v23 = vpop.eup %5041  ;;  %v4092_v40 = vmul.f32 %v8344_v11, %v4091_v53  ;;  %v8414_v2 = vmul.f32 %v4115_v12, %v8168_v38  ;;  %v4362_v5 = vadd.f32 0.014752088, %v4361_v35  ;;  %v4156_v57 = vmul.f32 %v4155_v36, %v8190_v8 }
 0x4ac   : > { %9602 = vst [vmem:[#allocation61_spill] sm:$0xff] %v8405_v39  ;;  %v4290_v20 = vmul.f32 %v8394_v33, %v8353_v14  ;;  %v4314_v0 = vmul.f32 %v4313_v48, %v8309_v3  ;;  %v4351_v60 = vadd.f32 0.0036580483, %v4350_v55  ;;  %v4132_v34 = vmul.f32 %v8362_v44, %v4131_v61 }
 0x4ad   : > { %v4363_v17 = vmul.f32 %v4362_v5, %v8366_v58  ;;  %v4195_v26 = vadd.f32 0.18741608, %v4194_v10  ;;  %v4210_v12 = vmul.f32 %v8388_v59, %v8346_v21  ;;  %v4234_v8 = vmul.f32 %v4233_v16, %v8210_v7 }
 0x4ae   : > { %v4274_v36 = vmul.f32 %v4273_v37, %v8212_v43  ;;  %v8429_v38 = vadd.f32 %v8344_v11, %v4092_v40  ;;  %v8433_v48 = vmul.f32 %v8382_v18, %v8340_v52  ;;  %v4250_v55 = vmul.f32 %v8409_v23, %v8360_v32 }
 0x4af   : > { %v4364_v35 = vadd.f32 0.112945676, %v4363_v17  ;;  %v8437_v10 = vadd.f32 1.1283791, %v4156_v57  ;;  %v4291_v5 = vsub.f32 1.0, %v4290_v20  ;;  %v4352_v16 = vmul.f32 %v4351_v60, %v8366_v58 }
 0x4b0   : > { %v5044_v61 = vpop.eup %5043  ;;  %v4315_v28 = vadd.f32 0.18741608, %v4314_v0  ;;  %v8441_v37 = vadd.f32 %v8362_v44, %v4132_v34  ;;  %v8447_v4 = vmul.f32 %v4195_v26, %v8198_v47  ;;  %v4211_v17 = vsub.f32 1.0, %v4210_v12 }
 0x4b1   : > { %v4330_v53 = vmul.f32 %v5044_v61, %v8390_v51  ;;  %v4365_v42 = vmul.f32 %v4364_v35, %v8366_v58  ;;  %v4235_v25 = vadd.f32 0.18741608, %v4234_v8  ;;  %v4275_v57 = vadd.f32 0.18741608, %v4274_v36 }
 0x4b2   : > { %v4171_v20 = vsub.f32 1.0, %v8433_v48  ;;  %v4251_v0 = vsub.f32 1.0, %v4250_v55  ;;  %v4218_v34 = vand.u32 2147483647, %v8346_v21  ;;  %v4292_v56 = vmul.f32 %v8394_v33, %v4291_v5 }
 0x4b3   : > { %v4331_v50 = vsub.f32 1.0, %v4330_v53  ;;  %v4366_v60 = vadd.f32 0.4994258, %v4365_v42  ;;  %v4316_v40 = vmul.f32 %v4315_v28, %v8309_v3  ;;  %v4353_v1 = vadd.f32 0.05243302, %v4352_v16 }
 0x4b4   : > { %vm4335_vm0 = vweird.f32 %v5044_v61  ;;  %v4340_v47 = vand.u32 2147483648, %v8390_v51  ;;  %v4212_v12 = vmul.f32 %v8388_v59, %v4211_v17  ;;  %v4236_v8 = vmul.f32 %v4235_v25, %v8210_v7 }
 0x4b5   : > { %v4332_v39 = vmul.f32 %v5044_v61, %v4331_v50  ;;  %v4367_v26 = vmul.f32 %v4366_v60, %v8366_v58  ;;  %v4276_v53 = vmul.f32 %v4275_v57, %v8212_v43  ;;  %v4338_v42 = vand.u32 2147483647, %v8390_v51 }
 0x4b6   : > { %v4252_v36 = vmul.f32 %v8409_v23, %v4251_v0  ;;  %vm4334_vm6 = vweird.f32 %v8390_v51  ;;  %v4293_v50 = vadd.f32 %v8394_v33, %v4292_v56  ;;  %vm4295_vm7 = vweird.f32 %v8394_v33 }
 0x4b7   : > { %v4333_v48 = vadd.f32 %v5044_v61, %v4332_v39  ;;  %v8461_v3 = vadd.f32 1.0, %v4367_v26  ;;  %v4317_v28 = vadd.f32 1.1283791, %v4316_v40  ;;  %vm8465_vm8 = vmor %vm4334_vm6, %vm4335_vm0  ;;  %v4354_v7 = vmul.f32 %v4353_v1, %v8366_v58 }
 0x4b8   : > { %vm4135_vm9 = vweird.f32 %v8362_v44  ;;  %v4300_v25 = vand.u32 2147483648, %v8353_v14  ;;  %v4341_v43 = vor.u32 1.1754944e-38, %v4340_v47  ;;  %vm4215_vm10 = vweird.f32 %v8388_v59 }
 0x4b9   : > { %v4337_v51 = vsel %vm8465_vm8, %v5044_v61, %v4333_v48  ;;  %5045 = vrcp.f32 %v8461_v3  ;;  %vm4294_vm11 = vweird.f32 %v8353_v14  ;;  %v4298_v56 = vand.u32 2147483647, %v8353_v14 }
 0x4ba   : > { %vm4339_vm12 = vcmp.eq.f32.partialorder %v4338_v42, 8.507059e+37  ;;  %vm4134_vm13 = vweird.f32 %v8325_v31  ;;  %vm4175_vm14 = vweird.f32 %v8382_v18  ;;  %v4253_v1 = vadd.f32 %v8409_v23, %v4252_v36  ;;  %vm8485_vm1 = vmor %vm4294_vm11, %vm4295_vm7 }
 0x4bb   : > { %vm4255_vm15 = vweird.f32 %v8409_v23  ;;  %v4260_v39 = vand.u32 2147483648, %v8360_v32  ;;  %v4342_v61 = vsel %vm4339_vm12, %v4341_v43, %v4337_v51  ;;  %v4277_v5 = vadd.f32 1.1283791, %v4276_v53 }
 0x4bc   : > { %v4297_v14 = vsel %vm8485_vm1, %v8394_v33, %v4293_v50  ;;  %v4318_v16 = vmul.f32 %v4317_v28, %v8287_v24  ;;  %v4355_v40 = vadd.f32 0.18741608, %v4354_v7  ;;  %vm4174_vm2 = vweird.f32 %v8340_v52 }
 0x4bd   : > { %v4213_v17 = vadd.f32 %v8388_v59, %v4212_v12  ;;  %vm4254_vm3 = vweird.f32 %v8360_v32  ;;  %v4258_v57 = vand.u32 2147483647, %v8360_v32  ;;  %v4301_v0 = vor.u32 1.1754944e-38, %v4300_v25 }
 0x4be   : > { %vm4214_vm4 = vweird.f32 %v8346_v21  ;;  %v4220_v60 = vand.u32 2147483648, %v8346_v21  ;;  %vm8501_vm5 = vmor %vm4254_vm3, %vm4255_vm15  ;;  %vm4299_vm0 = vcmp.eq.f32.partialorder %v4298_v56, 8.507059e+37  ;;  %v4343_v24 = vmul.f32 %v4342_v61, %v4318_v16 }
 0x4bf   : > { %v5046_v47 = vpop.eup %5045  ;;  %v4172_v26 = vmul.f32 %v8382_v18, %v4171_v20  ;;  %v4237_v12 = vadd.f32 1.1283791, %v4236_v8  ;;  %v4257_v32 = vsel %vm8501_vm5, %v8409_v23, %v4253_v1  ;;  %v4302_v53 = vsel %vm4299_vm0, %v4301_v0, %v4297_v14  ;;  %vm8512_vm7 = vmor %vm4214_vm4, %vm4215_vm10 }
 0x4c0   : > { %vm4095_vm6 = vweird.f32 %v8344_v11  ;;  %v4261_v36 = vor.u32 1.1754944e-38, %v4260_v39  ;;  %v4278_v48 = vmul.f32 %v4277_v5, %v8195_v9  ;;  %v4356_v50 = vmul.f32 %v4355_v40, %v8366_v58  ;;  %vm8538_vm15 = vmor %vm4134_vm13, %vm4135_vm9 }
 0x4c1   : > { %v4370_v20 = vmul.f32 %v5046_v47, %v8461_v3  ;;  %v4197_v8 = vadd.f32 1.1283791, %v8447_v4  ;;  %v4217_v23 = vsel %vm8512_vm7, %v8388_v59, %v4213_v17  ;;  %vm8525_vm8 = vcmp.eq.f32.partialorder %v4218_v34, 8.507059e+37  ;;  %vm8555_vm13 = vmor %vm4174_vm2, %vm4175_vm14 }
 0x4c2   : > { %vm4259_vm10 = vcmp.eq.f32.partialorder %v4258_v57, 8.507059e+37  ;;  %vm4094_vm11 = vweird.f32 %v8311_v54  ;;  %v4303_v55 = vmul.f32 %v4302_v53, %v4278_v48  ;;  %v4911_v58 = vclamps-f32 %v4343_v24, 1.0 }
 0x4c3   : > { %v4262_v9 = vsel %vm4259_vm10, %v4261_v36, %v4257_v32  ;;  %v4371_v7 = vsub.f32 1.0, %v4370_v20  ;;  %v4173_v25 = vadd.f32 %v8382_v18, %v4172_v26  ;;  %v4221_v4 = vor.u32 1.1754944e-38, %v4220_v60 }
 0x4c4   : > { %v4238_v51 = vmul.f32 %v4237_v12, %v8174_v27  ;;  %v4380_v59 = vand.u32 2147483648, %v8461_v3  ;;  %vm4055_vm12 = vweird.f32 %v8321_v19  ;;  %v4357_v34 = vadd.f32 1.1283791, %v4356_v50 }
 0x4c5   : > { %v4372_v43 = vmul.f32 %v5046_v47, %v4371_v7  ;;  %vm4375_vm1 = vweird.f32 %v5046_v47  ;;  %v4378_v56 = vand.u32 2147483647, %v8461_v3  ;;  %v4137_v27 = vsel %vm8538_vm15, %v8362_v44, %v8441_v37  ;;  %v9625_v7 = vld [vmem:[#allocation59_spill] sm:$0xff] }
 0x4c6   : > { %v4178_v1 = vand.u32 2147483647, %v8340_v52  ;;  %v4222_v39 = vsel %vm8525_vm8, %v4221_v4, %v4217_v23  ;;  %v4263_v35 = vmul.f32 %v4262_v9, %v4238_v51  ;;  %vm4054_vm9 = vweird.f32 %v8281_v29  ;;  %vm8576_vm8 = vmor %vm4094_vm11, %vm4095_vm6  ;;  %v9627_v4 = vld [vmem:[#allocation60_spill] sm:$0xff] }
 0x4c7   : > { %v4910_v5 = vclamps-f32 %v4303_v55, 1.0  ;;  %v4400_v14 = vadd.f32 1.0, %v4911_v58  ;;  %v4373_v16 = vadd.f32 %v5046_v47, %v4372_v43  ;;  %vm4374_vm3 = vweird.f32 %v8461_v3  ;;  %vm8603_vm11 = vmor %vm4054_vm9, %vm4055_vm12 }
 0x4c8   : > { %v4177_v44 = vsel %vm8555_vm13, %v8382_v18, %v4173_v25  ;;  %v9617_v37 = vand.u32 2147483648, %v8340_v52  ;;  %v4198_v17 = vmul.f32 %v4197_v8, %v8156_v30  ;;  %vm4376_vm4 = vmor %vm4374_vm3, %vm4375_vm1  ;;  %v4381_v57 = vor.u32 1.1754944e-38, %v4380_v59  ;;  %v9629_v59 = vld [vmem:[#allocation58_spill] sm:$0xff] }
 0x4c9   : > { %vm4015_vm14 = vweird.f32 %v8289_v46  ;;  %v3728_v0 = vmul.f32 0.5, %v8278_v22  ;;  %v4358_v60 = vmul.f32 %v4357_v34, %v8351_v63  ;;  %v4377_v33 = vsel %vm4376_vm4, %v5046_v47, %v4373_v16  ;;  %v9634_v16 = vld [vmem:[#allocation20_spill] sm:$0xff] }
 0x4ca   : > { %v4181_v40 = vor.u32 1.1754944e-38, %v9617_v37  ;;  %vm4379_vm2 = vcmp.eq.f32.partialorder %v4378_v56, 8.507059e+37  ;;  %vm4179_vm5 = vcmp.eq.f32.partialorder %v4178_v1, 8.507059e+37  ;;  %v4223_v3 = vmul.f32 %v4222_v39, %v4198_v17  ;;  %v9630_v39 = vld [vmem:[#allocation52_spill] sm:$0xff] }
 0x4cb   : > { %v4909_v24 = vclamps-f32 %v4263_v35, 1.0  ;;  %v4382_v18 = vsel %vm4379_vm2, %v4381_v57, %v4377_v33  ;;  %vm4014_vm0 = vweird.f32 %v8252_v49  ;;  %v4399_v26 = vadd.f32 1.0, %v4910_v5  ;;  %v9637_v57 = vld [vmem:[#allocation35_spill] sm:$0xff] }
 0x4cc   : > { %v4182_v52 = vsel %vm4179_vm5, %v4181_v40, %v4177_v44  ;;  %v4416_v30 = vmul.f32 %v4400_v14, %v3728_v0  ;;  %v4383_v12 = vmul.f32 %v4382_v18, %v4358_v60  ;;  %vm3975_vm7 = vweird.f32 %v8222_v62  ;;  %vm8629_vm9 = vmor %vm4014_vm0, %vm4015_vm14  ;;  %v9636_v40 = vld [vmem:[#allocation38_spill] sm:$0xff]  ;;  %v9638_v60 = vld [vmem:[#allocation37_spill] sm:$0xff] }
 0x4cd   : > { %v4100_v63 = vand.u32 2147483648, %v8311_v54  ;;  %v4117_v47 = vadd.f32 1.1283791, %v8414_v2  ;;  %v9620_v32 = vand.u32 2147483648, %v8325_v31  ;;  %v4158_v42 = vmul.f32 %v8437_v10, %v8146_v41  ;;  %v9640_v18 = vld [vmem:[#allocation21_spill] sm:$0xff] }
 0x4ce   : > { %v4097_v36 = vsel %vm8576_vm8, %v8344_v11, %v8429_v38  ;;  %v9621_v48 = vand.u32 2147483647, %v8325_v31  ;;  %v3727_v50 = vmul.f32 0.5, %v8176_v15  ;;  %v4912_v20 = vclamps-f32 %v4383_v12, 1.0  ;;  %v9624_v31 = vld [vmem:[#allocation61_spill] sm:$0xff] }
 0x4cf   : > { %v4141_v53 = vor.u32 1.1754944e-38, %v9620_v32  ;;  %vm3974_vm10 = vweird.f32 %v8183_v45  ;;  %v4183_v8 = vmul.f32 %v4182_v52, %v4158_v42  ;;  %v4908_v23 = vclamps-f32 %v4223_v3, 1.0 }
 0x4d0   : > { %vm4139_vm6 = vcmp.eq.f32.partialorder %v9621_v48, 8.507059e+37  ;;  %v4398_v28 = vadd.f32 1.0, %v4909_v24  ;;  %v4415_v9 = vmul.f32 %v4399_v26, %v3727_v50  ;;  %v3729_v41 = vmul.f32 0.5, %v8338_v13  ;;  %v9626_v13 = vld [vmem:[#allocation19_spill] sm:$0xff]  ;;  %vm8656_vm14 = vmor %vm3974_vm10, %vm3975_vm7  ;;  %v9645_v50 = vld [vmem:[#allocation53_spill] sm:$0xff] }
 0x4d1   : > { %v4142_v2 = vsel %vm4139_vm6, %v4141_v53, %v4137_v27  ;;  %v4401_v10 = vadd.f32 1.0, %v4912_v20  ;;  %v8595_v55 = vand.u32 4294901760, %v4416_v30  ;;  %v4013_v11 = vadd.f32 %v8289_v46, %v8399_v6  ;;  %v9646_v20 = vld [vmem:[#allocation40_spill] sm:$0xff] }
 0x4d2   : > { %v4077_v38 = vadd.f32 1.1283791, %v9624_v31  ;;  %v4101_v58 = vor.u32 1.1754944e-38, %v4100_v63  ;;  %v4118_v25 = vmul.f32 %v4117_v47, %v9625_v7  ;;  %vm3935_vm15 = vweird.f32 %v9626_v13  ;;  %v9641_v63 = vld [vmem:[#allocation44_spill] sm:$0xff]  ;;  %v9651_v7 = vld [vmem:[#allocation41_spill] sm:$0xff] }
 0x4d3   : > { %v4057_v6 = vsel %vm8603_vm11, %v8321_v19, %v9627_v4  ;;  %v9628_v51 = vand.u32 2147483647, %v8311_v54  ;;  %v3726_v21 = vmul.f32 0.5, %v9629_v59  ;;  %v4417_v34 = vmul.f32 %v4401_v10, %v3729_v41  ;;  %v9633_v19 = vld [vmem:[#allocation46_spill] sm:$0xff]  ;;  %v9658_v54 = vld [vmem:[#allocation28_spill] sm:$0xff] }
 0x4d4   : > { %v4143_v56 = vmul.f32 %v4142_v2, %v4118_v25  ;;  %v4907_v27 = vclamps-f32 %v4183_v8, 1.0  ;;  %v4397_v1 = vadd.f32 1.0, %v4908_v23  ;;  %vm3934_vm12 = vweird.f32 %v9630_v39  ;;  %v9648_v23 = vld [vmem:[#allocation57_spill] sm:$0xff]  ;;  %v9649_v41 = vld [vmem:[#allocation54_spill] sm:$0xff] }
 0x4d5   : > { %vm4099_vm1 = vcmp.eq.f32.partialorder %v9628_v51, 8.507059e+37  ;;  %v4414_v35 = vmul.f32 %v4398_v28, %v3726_v21  ;;  %v8618_v61 = vand.u32 4294901760, %v4417_v34  ;;  %v8621_v5 = vsub.f32 %v4416_v30, %v8595_v55  ;;  %vm8700_vm7 = vmor %vm3934_vm12, %vm3935_vm15  ;;  %v9672_v59 = vld [vmem:[#allocation42_spill] sm:$0xff] }
 0x4d6   : > { %v4102_v43 = vsel %vm4099_vm1, %v4101_v58, %v4097_v36  ;;  %v8623_v14 = vand.u32 4294901760, %v4415_v9  ;;  %v4038_v44 = vmul.f32 %v9634_v16, %v9633_v19  ;;  %v9635_v37 = vand.u32 2147483647, %v8281_v29  ;;  %v9644_v36 = vld [vmem:[#allocation51_spill] sm:$0xff]  ;;  %v9659_v19 = vld [vmem:[#allocation33_spill] sm:$0xff] }
 0x4d7   : > { %v4078_v17 = vmul.f32 %v4077_v38, %v9636_v40  ;;  %v3725_v0 = vmul.f32 0.5, %v9637_v57  ;;  %vm3895_vm3 = vweird.f32 %v9638_v60  ;;  %v4017_v33 = vsel %vm8629_vm9, %v8289_v46, %v4013_v11  ;;  %4426 = vmatpush.xpose.msra.mxu0 %v8618_v61  ;;  %4622 = vmatpush.xpose.msrb.mxu3 %v8618_v61  ;;  %v9666_v46 = vld [vmem:[#allocation17_spill] sm:$0xff] }
 0x4d8   : > { %vm4059_vm13 = vcmp.eq.f32.partialorder %v9635_v37, 8.507059e+37  ;;  %v9639_v3 = vand.u32 2147483648, %v8252_v49  ;;  %v8649_v29 = vsub.f32 %v4417_v34, %v8618_v61  ;;  %v4906_v30 = vclamps-f32 %v4143_v56, 1.0  ;;  %v9654_v34 = vld [vmem:[#allocation15_spill] sm:$0xff] }
 0x4d9   : > { %v4062_v52 = vsel %vm4059_vm13, %v9640_v18, %v4057_v6  ;;  %v4103_v26 = vmul.f32 %v4102_v43, %v4078_v17  ;;  %v4396_v12 = vadd.f32 1.0, %v4907_v27  ;;  %v4413_v22 = vmul.f32 %v4397_v1, %v3725_v0  ;;  %v9655_v43 = vld [vmem:[#allocation36_spill] sm:$0xff]  ;;  %v9657_v1 = vld [vmem:[#allocation39_spill] sm:$0xff] }
 0x4da   : > { %v4021_v24 = vor.u32 1.1754944e-38, %v9639_v3  ;;  %vm3894_vm4 = vweird.f32 %v9641_v63  ;;  %4569 = vmatpush.xpose.msrb.mxu2 %v8649_v29  ;;  %v4468_v47 = vand.u32 4294901760, %v8649_v29  ;;  %v8663_v32 = vsub.f32 %v4415_v9, %v8623_v14  ;;  %v9661_v3 = vld [vmem:[#allocation45_spill] sm:$0xff] }
 0x4db   : > { %v8665_v53 = vand.u32 4294901760, %v4414_v35  ;;  %v4474_v42 = vand.u32 4294901760, %v8621_v5  ;;  %v3977_v48 = vsel %vm8656_vm14, %v8222_v62, %v9644_v36  ;;  %v3998_v2 = vmul.f32 %v9646_v20, %v9645_v50  ;;  %4428 = vmatpush.xpose.msra.mxu0 %v8595_v55  ;;  %4624 = vmatpush.xpose.msrb.mxu3 %v8595_v55  ;;  %vm8736_vm11 = vmor %vm3894_vm4, %vm3895_vm3  ;;  %v9668_v50 = vld [vmem:[#allocation30_spill] sm:$0xff]  ;;  %v9669_v20 = vld [vmem:[#allocation56_spill] sm:$0xff] }
 0x4dc   : > { %v9647_v8 = vand.u32 2147483647, %v8252_v49  ;;  %v3724_v28 = vmul.f32 0.5, %v9648_v23  ;;  %vm3855_vm5 = vweird.f32 %v9649_v41  ;;  %v9650_v9 = vand.u32 2147483648, %v8183_v45 }
 0x4dd   : > { %v4063_v15 = vmul.f32 %v4062_v52, %v4038_v44  ;;  %v4469_v62 = vsub.f32 %v8649_v29, %v4468_v47  ;;  %v4905_v31 = vclamps-f32 %v4103_v26, 1.0  ;;  %v4395_v49 = vadd.f32 1.0, %v4906_v30  ;;  %v9662_v52 = vld [vmem:[#allocation13_spill] sm:$0xff] }
 0x4de   : > { %vm4019_vm2 = vcmp.eq.f32.partialorder %v9647_v8, 8.507059e+37  ;;  %v3981_v10 = vor.u32 1.1754944e-38, %v9650_v9  ;;  %v4412_v38 = vmul.f32 %v4396_v12, %v3724_v28  ;;  %v8685_v58 = vand.u32 4294901760, %v4413_v22  ;;  %4572 = vmatpush.xpose.msrb.mxu2 %v8621_v5  ;;  %v9665_v12 = vld [vmem:[#allocation27_spill] sm:$0xff]  ;;  %v4419_v29 = vld [vmem:[%s9039_s4 + $0x1] sm:$0x1] }
 0x4df   : > { %v4022_v11 = vsel %vm4019_vm2, %v4021_v24, %v4017_v33  ;;  %vm3854_vm0 = vweird.f32 %v9651_v7  ;;  %v4470_v25 = vand.u32 4294901760, %v4469_v62  ;;  %v4475_v4 = vsub.f32 %v8621_v5, %v4474_v42  ;;  %4430 = vmatpush.xpose.msra.mxu0 %v8623_v14  ;;  %4626 = vmatpush.xpose.msrb.mxu3 %v8623_v14 }
 0x4e0   : > { %v8693_v6 = vsub.f32 %v4414_v35, %v8665_v53  ;;  %v4480_v51 = vand.u32 4294901760, %v8663_v32  ;;  %v3938_v21 = vand.u32 2147483647, %v9630_v39  ;;  %v3958_v56 = vmul.f32 %v9655_v43, %v9654_v34  ;;  %vm8769_vm9 = vmor %vm3854_vm0, %vm3855_vm5  ;;  %v9675_v43 = vld [vmem:[#allocation48_spill] sm:$0xff] }
 0x4e1   : > { %v9656_v27 = vand.u32 2147483647, %v8183_v45  ;;  %v3723_v35 = vmul.f32 0.5, %v9657_v1  ;;  %vm3815_vm6 = vweird.f32 %v9658_v54  ;;  %v3937_v16 = vsel %vm8700_vm7, %v9626_v13, %v9659_v19  ;;  %4471 = vmatpush.xpose.msra.mxu1 %v4470_v25 }
 0x4e2   : > { %v9660_v44 = vand.u32 2147483648, %v9630_v39  ;;  %v4023_v17 = vmul.f32 %v4022_v11, %v3998_v2  ;;  %v4904_v57 = vclamps-f32 %v4063_v15, 1.0  ;;  %v4394_v45 = vadd.f32 1.0, %v4905_v31  ;;  %4575 = vmatpush.xpose.msrb.mxu2 %v8663_v32  ;;  %v9671_v31 = vld [vmem:[#allocation14_spill] sm:$0xff] }
 0x4e3   : > { %vm3979_vm8 = vcmp.eq.f32.partialorder %v9656_v27, 8.507059e+37  ;;  %v4411_v0 = vmul.f32 %v4395_v49, %v3723_v35  ;;  %v8719_v33 = vand.u32 4294901760, %v4412_v38  ;;  %vm3814_vm10 = vweird.f32 %v9661_v3  ;;  %4432 = vmatpush.xpose.msra.mxu0 %v8665_v53  ;;  %4628 = vmatpush.xpose.msrb.mxu3 %v8665_v53 }
 0x4e4   : > { %v3941_v37 = vor.u32 1.1754944e-38, %v9660_v44  ;;  %v3982_v40 = vsel %vm3979_vm8, %v3981_v10, %v3977_v48  ;;  %v4476_v13 = vand.u32 4294901760, %v4475_v4  ;;  %v4481_v39 = vsub.f32 %v8663_v32, %v4480_v51  ;;  %v9667_v48 = vld [vmem:[#allocation12_spill] sm:$0xff]  ;;  %vm8801_vm3 = vmor %vm3814_vm10, %vm3815_vm6 }
 0x4e5   : > { %v8727_v24 = vsub.f32 %v4413_v22, %v8685_v58  ;;  %v4486_v18 = vand.u32 4294901760, %v8693_v6  ;;  %v3853_v26 = vadd.f32 %v9649_v41, %v9662_v52  ;;  %v3918_v36 = vmul.f32 %v9666_v46, %v9665_v12  ;;  %v9683_v46 = vld [vmem:[#allocation29_spill] sm:$0xff] }
 0x4e6   : > { %vm3939_vm15 = vcmp.eq.f32.partialorder %v3938_v21, 8.507059e+37  ;;  %v3722_v22 = vmul.f32 0.5, %v9667_v48  ;;  %vm3775_vm1 = vweird.f32 %v9668_v50  ;;  %v3897_v2 = vsel %vm8736_vm11, %v9638_v60, %v9669_v20  ;;  %4477 = vmatpush.xpose.msra.mxu1 %v4476_v13  ;;  %4578 = vmatpush.xpose.msrb.mxu2 %v8693_v6 }
 0x4e7   : > { %v9670_v8 = vand.u32 2147483648, %v9641_v63  ;;  %v3942_v28 = vsel %vm3939_vm15, %v3941_v37, %v3937_v16  ;;  %v3983_v9 = vmul.f32 %v3982_v40, %v3958_v56  ;;  %v4903_v10 = vclamps-f32 %v4023_v17, 1.0  ;;  %v9676_v56 = vld [vmem:[#allocation32_spill] sm:$0xff]  ;;  %4434 = vmatpush.xpose.msra.mxu0 %v8685_v58  ;;  %4630 = vmatpush.xpose.msrb.mxu3 %v8685_v58 }
 0x4e8   : > { %v4393_v11 = vadd.f32 1.0, %v4904_v57  ;;  %v4410_v15 = vmul.f32 %v4394_v45, %v3722_v22  ;;  %v8752_v62 = vand.u32 4294901760, %v4411_v0  ;;  %vm3774_vm12 = vweird.f32 %v9671_v31 }
 0x4e9   : > { %v3901_v23 = vor.u32 1.1754944e-38, %v9670_v8  ;;  %v4482_v60 = vand.u32 4294901760, %v4481_v39  ;;  %v4487_v49 = vsub.f32 %v8693_v6, %v4486_v18  ;;  %v8760_v25 = vsub.f32 %v4412_v38, %v8719_v33  ;;  %v9678_v38 = vld [vmem:[#allocation22_spill] sm:$0xff]  ;;  %vm8831_vm14 = vmor %vm3774_vm12, %vm3775_vm1 }
 0x4ea   : > { %v4492_v4 = vand.u32 4294901760, %v8727_v24  ;;  %v3813_v21 = vadd.f32 %v9658_v54, %v9672_v59  ;;  %v3878_v27 = vmul.f32 %v9676_v56, %v9675_v43  ;;  %v9677_v1 = vand.u32 2147483647, %v9641_v63  ;;  %4581 = vmatpush.xpose.msrb.mxu2 %v8727_v24  ;;  %v9690_v56 = vld [vmem:[#allocation47_spill] sm:$0xff] }
 0x4eb   : > { %v3721_v35 = vmul.f32 0.5, %v9678_v38  ;;  %v3857_v19 = vsel %vm8769_vm9, %v9649_v41, %v3853_v26  ;;  %v9679_v16 = vand.u32 2147483648, %v9651_v7  ;;  %v3943_v40 = vmul.f32 %v3942_v28, %v3918_v36  ;;  %4483 = vmatpush.xpose.msra.mxu1 %v4482_v60  ;;  %v9680_v26 = vld [vmem:[#allocation31_spill] sm:$0xff]  ;;  %4436 = vmatpush.xpose.msra.mxu0 %v8719_v33 }
 0x4ec   : > { %vm3899_vm13 = vcmp.eq.f32.partialorder %v9677_v1, 8.507059e+37  ;;  %v4902_v17 = vclamps-f32 %v3983_v9, 1.0  ;;  %v4392_v57 = vadd.f32 1.0, %v4903_v10  ;;  %v8785_v63 = vand.u32 4294901760, %v4410_v15  ;;  %v9684_v36 = vld [vmem:[#allocation43_spill] sm:$0xff]  ;;  %4632 = vmatpush.xpose.msrb.mxu3 %v8719_v33 }
 0x4ed   : > { %v3861_v44 = vor.u32 1.1754944e-38, %v9679_v16  ;;  %v3902_v37 = vsel %vm3899_vm13, %v3901_v23, %v3897_v2  ;;  %v4409_v45 = vmul.f32 %v4393_v11, %v3721_v35  ;;  %v4488_v13 = vand.u32 4294901760, %v4487_v49 }
 0x4ee   : > { %v4493_v41 = vsub.f32 %v8727_v24, %v4492_v4  ;;  %v8792_v39 = vsub.f32 %v4411_v0, %v8752_v62  ;;  %v4498_v52 = vand.u32 4294901760, %v8760_v25  ;;  %v3773_v30 = vadd.f32 %v9668_v50, %v9680_v26  ;;  %v9686_v0 = vld [vmem:[#allocation16_spill] sm:$0xff]  ;;  %4584 = vmatpush.xpose.msrb.mxu2 %v8760_v25 }
 0x4ef   : > { %v3838_v48 = vmul.f32 %v9684_v36, %v9683_v46  ;;  %v9685_v22 = vand.u32 2147483647, %v9651_v7  ;;  %v3720_v20 = vmul.f32 0.5, %v9686_v0  ;;  %v3817_v2 = vsel %vm8801_vm3, %v9658_v54, %v3813_v21  ;;  %4489 = vmatpush.xpose.msra.mxu1 %v4488_v13  ;;  %4438 = vmatpush.xpose.msra.mxu0 %v8752_v62  ;;  %v9696_v46 = vld [vmem:[#allocation34_spill] sm:$0xff] }
 0x4f0   : > { %v9687_v8 = vand.u32 2147483648, %v9661_v3  ;;  %v3903_v9 = vmul.f32 %v3902_v37, %v3878_v27  ;;  %v4901_v10 = vclamps-f32 %v3943_v40, 1.0  ;;  %v4391_v11 = vadd.f32 1.0, %v4902_v17  ;;  %v9691_v27 = vld [vmem:[#allocation55_spill] sm:$0xff]  ;;  %4634 = vmatpush.xpose.msrb.mxu3 %v8752_v62  ;;  %v9697_v36 = vld [vmem:[#allocation50_spill] sm:$0xff] }
 0x4f1   : > { %vm3859_vm4 = vcmp.eq.f32.partialorder %v9685_v22, 8.507059e+37  ;;  %v4408_v60 = vmul.f32 %v4392_v57, %v3720_v20  ;;  %v8817_v7 = vand.u32 4294901760, %v4409_v45  ;;  %v4494_v49 = vand.u32 4294901760, %v4493_v41 }
 0x4f2   : > { %v3821_v23 = vor.u32 1.1754944e-38, %v9687_v8  ;;  %v3862_v28 = vsel %vm3859_vm4, %v3861_v44, %v3857_v19  ;;  %v4499_v54 = vsub.f32 %v8760_v25, %v4498_v52  ;;  %v8824_v59 = vsub.f32 %v4410_v15, %v8785_v63  ;;  %v9693_v15 = vld [vmem:[#allocation25_spill] sm:$0xff]  ;;  %4587 = vmatpush.xpose.msrb.mxu2 %v8792_v39 }
 0x4f3   : > { %v4504_v21 = vand.u32 4294901760, %v8792_v39  ;;  %v3778_v43 = vand.u32 2147483647, %v9671_v31  ;;  %v3798_v1 = vmul.f32 %v9691_v27, %v9690_v56  ;;  %v9692_v38 = vand.u32 2147483647, %v9661_v3  ;;  %4495 = vmatpush.xpose.msra.mxu1 %v4494_v49  ;;  %4440 = vmatpush.xpose.msra.mxu0 %v8785_v63 }
 0x4f4   : > { %v3719_v35 = vmul.f32 0.5, %v9693_v15  ;;  %v3777_v19 = vsel %vm8831_vm14, %v9668_v50, %v3773_v30  ;;  %v9694_v16 = vand.u32 2147483648, %v9671_v31  ;;  %v3863_v40 = vmul.f32 %v3862_v28, %v3838_v48  ;;  %v9695_v30 = vld [vmem:[#allocation24_spill] sm:$0xff]  ;;  %4636 = vmatpush.xpose.msrb.mxu3 %v8785_v63 }
 0x4f5   : > { %vm3819_vm2 = vcmp.eq.f32.partialorder %v9692_v38, 8.507059e+37  ;;  %v4900_v17 = vclamps-f32 %v3903_v9, 1.0  ;;  %v4390_v57 = vadd.f32 1.0, %v4901_v10  ;;  %v8848_v3 = vand.u32 4294901760, %v4408_v60 }
 0x4f6   : > { %v3781_v44 = vor.u32 1.1754944e-38, %v9694_v16  ;;  %v3822_v37 = vsel %vm3819_vm2, %v3821_v23, %v3817_v2  ;;  %v4407_v13 = vmul.f32 %v4391_v11, %v3719_v35  ;;  %v4500_v41 = vand.u32 4294901760, %v4499_v54  ;;  %4590 = vmatpush.xpose.msrb.mxu2 %v8824_v59  ;;  %v9698_v11 = vld [vmem:[#allocation18_spill] sm:$0xff]  ;;  %v9699_v35 = vld [vmem:[#allocation23_spill] sm:$0xff] }
 0x4f7   : > { %v4505_v50 = vsub.f32 %v8792_v39, %v4504_v21  ;;  %v8855_v31 = vsub.f32 %v4409_v45, %v8817_v7  ;;  %v4510_v26 = vand.u32 4294901760, %v8824_v59  ;;  %vm3779_vm5 = vcmp.eq.f32.partialorder %v3778_v43, 8.507059e+37  ;;  %4442 = vmatpush.xpose.msra.mxu0 %v8817_v7 }
 0x4f8   : > { %v3718_v12 = vmul.f32 0.5, %v9695_v30  ;;  %v3758_v48 = vmul.f32 %v9697_v36, %v9696_v46  ;;  %v3782_v22 = vsel %vm3779_vm5, %v3781_v44, %v3777_v19  ;;  %v3823_v0 = vmul.f32 %v3822_v37, %v3798_v1  ;;  %4501 = vmatpush.xpose.msra.mxu1 %v4500_v41  ;;  %4638 = vmatpush.xpose.msrb.mxu3 %v8817_v7 }
 0x4f9   : > { %v4899_v20 = vclamps-f32 %v3863_v40, 1.0  ;;  %v4389_v2 = vadd.f32 1.0, %v4900_v17  ;;  %v8863_v45 = vand.u32 4294901760, %v4407_v13  ;;  %v4506_v23 = vand.u32 4294901760, %v4505_v50  ;;  %v9700_v50 = vld [vmem:[#allocation26_spill] sm:$0xff] }
 0x4fa   : > { %v4406_v8 = vmul.f32 %v4390_v57, %v3718_v12  ;;  %v4511_v28 = vsub.f32 %v8824_v59, %v4510_v26  ;;  %v8870_v9 = vsub.f32 %v4408_v60, %v8848_v3  ;;  %v4516_v10 = vand.u32 4294901760, %v8855_v31  ;;  %4593 = vmatpush.xpose.msrb.mxu2 %v8855_v31 }
 0x4fb   : > { %v3717_v49 = vmul.f32 0.5, %v9698_v11  ;;  %v3783_v54 = vmul.f32 %v3782_v22, %v3758_v48  ;;  %v4898_v34 = vclamps-f32 %v3823_v0, 1.0  ;;  %v4388_v43 = vadd.f32 1.0, %v4899_v20  ;;  %4444 = vmatpush.xpose.msra.mxu0 %v8848_v3 }
 0x4fc   : > { %4507 = vmatpush.xpose.msra.mxu1 %v4506_v23  ;;  %v8876_v27 = vand.u32 4294901760, %v4406_v8  ;;  %v4512_v1 = vand.u32 4294901760, %v4511_v28  ;;  %v4517_v60 = vsub.f32 %v8855_v31, %v4516_v10  ;;  %v8883_v38 = vsub.f32 %v4407_v13, %v8863_v45  ;;  %4640 = vmatpush.xpose.msrb.mxu3 %v8848_v3 }
 0x4fd   : > { %v4405_v56 = vmul.f32 %v4389_v2, %v3717_v49  ;;  %v4522_v15 = vand.u32 4294901760, %v8870_v9  ;;  %v3716_v19 = vmul.f32 0.5, %v9699_v35  ;;  %v4897_v16 = vclamps-f32 %v3783_v54, 1.0  ;;  %v9701_v2 = vld [vmem:[#allocation49_spill] sm:$0xff] }
 0x4fe   : > { %v4387_v44 = vadd.f32 1.0, %v4898_v34  ;;  %v8890_v40 = vsub.f32 %v4406_v8, %v8876_v27  ;;  %4596 = vmatpush.xpose.msrb.mxu2 %v8870_v9  ;;  %v4518_v17 = vand.u32 4294901760, %v4517_v60  ;;  %v4528_v41 = vand.u32 4294901760, %v8883_v38 }
 0x4ff   : > { %v4404_v37 = vmul.f32 %v4388_v43, %v3716_v19  ;;  %v4523_v57 = vsub.f32 %v8870_v9, %v4522_v15  ;;  %v8896_v13 = vand.u32 4294901760, %v4405_v56  ;;  %v3715_v30 = vmul.f32 0.5, %v9700_v50  ;;  %4446 = vmatpush.xpose.msra.mxu0 %v8863_v45 }
 0x500   : > { %4513 = vmatpush.xpose.msra.mxu1 %v4512_v1  ;;  %v4386_v12 = vadd.f32 1.0, %v4897_v16  ;;  %4642 = vmatpush.xpose.msrb.mxu3 %v8863_v45  ;;  %v4534_v36 = vand.u32 4294901760, %v8890_v40  ;;  %v4529_v22 = vsub.f32 %v8883_v38, %v4528_v41  ;;  %v3714_v8 = vmul.f32 0.5, %v9701_v2 }
 0x501   : > { %v4403_v46 = vmul.f32 %v4387_v44, %v3715_v30  ;;  %v4524_v48 = vand.u32 4294901760, %v4523_v57  ;;  %v8908_v0 = vsub.f32 %v4405_v56, %v8896_v13  ;;  %v8910_v20 = vand.u32 4294901760, %v4404_v37 }
 0x502   : > { %4599 = vmatpush.xpose.msrb.mxu2 %v8883_v38  ;;  %v4402_v23 = vmul.f32 %v4386_v12, %v3714_v8  ;;  %v4535_v28 = vsub.f32 %v8890_v40, %v4534_v36  ;;  %v4530_v11 = vand.u32 4294901760, %v4529_v22  ;;  %v5184_v5 = vmov 0  }
 0x503   : > { %4448 = vmatpush.xpose.msra.mxu0 %v8876_v27  ;;  %v8920_v49 = vsub.f32 %v4404_v37, %v8910_v20  ;;  %v8922_v54 = vand.u32 4294901760, %v4403_v46  ;;  %v4540_v34 = vand.u32 4294901760, %v8908_v0  ;;  %4980 = vset.pattern.permute.xlu1 %v5184_v5 }
 0x504   : > { %4519 = vmatpush.xpose.msra.mxu1 %v4518_v17  ;;  %4644 = vmatpush.xpose.msrb.mxu3 %v8876_v27  ;;  %v4536_v43 = vand.u32 4294901760, %v4535_v28  ;;  %v8934_v60 = vand.u32 4294901760, %v4402_v23 }
 0x505   : > { %v4541_v56 = vsub.f32 %v8908_v0, %v4540_v34  ;;  %v8932_v1 = vsub.f32 %v4403_v46, %v8922_v54  ;;  %v4546_v35 = vand.u32 4294901760, %v8920_v49  ;;  %4981 = vset.pattern.permute.xlu0 %v5184_v5  ;;  %4422 = vperm.xlu1 %4980, %v4419_v29  }
 0x506   : > { %4602 = vmatpush.xpose.msrb.mxu2 %v8890_v40  ;;  %v4557_v44 = vsub.f32 %v4402_v23, %v8934_v60 }
 0x507   : > { %4450 = vmatpush.xpose.msra.mxu0 %v8896_v13  ;;  %v4542_v19 = vand.u32 4294901760, %v4541_v56  ;;  %v4547_v16 = vsub.f32 %v8920_v49, %v4546_v35  ;;  %v4552_v37 = vand.u32 4294901760, %v8932_v1 }
 0x508   : > { %4525 = vmatpush.xpose.msra.mxu1 %v4524_v48  ;;  %4646 = vmatpush.xpose.msrb.mxu3 %v8896_v13  ;;  %v4558_v50 = vand.u32 4294901760, %v4557_v44 }
 0x509   : > { %v4548_v17 = vand.u32 4294901760, %v4547_v16  ;;  %v4553_v57 = vsub.f32 %v8932_v1, %v4552_v37 }
 0x50a   : > { %4605 = vmatpush.xpose.msrb.mxu2 %v8908_v0  ;;  %v4559_v12 = vsub.f32 %v4557_v44, %v4558_v50 }
 0x50b   : > { %4452 = vmatpush.xpose.msra.mxu0 %v8910_v20  ;;  %v4554_v30 = vand.u32 4294901760, %v4553_v57 }
 0x50c   : > { %4531 = vmatpush.xpose.msra.mxu1 %v4530_v11  ;;  %4648 = vmatpush.xpose.msrb.mxu3 %v8910_v20  ;;  %v4560_v46 = vand.u32 4294901760, %v4559_v12 }
 0x50e   : > { %4608 = vmatpush.xpose.msrb.mxu2 %v8920_v49 }
 0x50f   : > { %4454 = vmatpush.xpose.msra.mxu0 %v8922_v54 }
 0x510   : > { %4537 = vmatpush.xpose.msra.mxu1 %v4536_v43  ;;  %4650 = vmatpush.xpose.msrb.mxu3 %v8922_v54 }
 0x512   : > { %4611 = vmatpush.xpose.msrb.mxu2 %v8932_v1 }
 0x513   : > { %4456 = vmatpush.xpose.msra.mxu0 %v8934_v60 }
 0x514   : > { %4543 = vmatpush.xpose.msra.mxu1 %v4542_v19  ;;  %4652 = vmatpush.xpose.msrb.mxu3 %v8934_v60 }
 0x516   : > { %4614 = vmatpush.xpose.msrb.mxu2 %v4557_v44 }
 0x517   : > { %4663 = vmatpush.xpose.msrb.mxu0 %v4468_v47 }
 0x518   : > { %4549 = vmatpush.xpose.msra.mxu1 %v4548_v17 }
 0x51b   : > { %4667 = vmatpush.xpose.msrb.mxu0 %v4474_v42 }
 0x51c   : > { %4555 = vmatpush.xpose.msra.mxu1 %v4554_v30 }
 0x51f   : > { %4671 = vmatpush.xpose.msrb.mxu0 %v4480_v51 }
 0x520   : > { %4561 = vmatpush.xpose.msra.mxu1 %v4560_v46 }
 0x523   : > { %4675 = vmatpush.xpose.msrb.mxu0 %v4486_v18 }
 0x524   : > { %4730 = vmatpush.xpose.msrb.mxu1 %v8618_v61 }
 0x527   : > { %4679 = vmatpush.xpose.msrb.mxu0 %v4492_v4 }
 0x528   : > { %4732 = vmatpush.xpose.msrb.mxu1 %v8595_v55  ;;  %v4418_v55 = vld [vmem:[%s9039_s4] sm:$0x1] }
 0x529   : > { %v4457_v61 = vand.u32 4294901760, %v4418_v55 }
 0x52b   : > { %4683 = vmatpush.xpose.msrb.mxu0 %v4498_v52  ;;  %4563 = vmatmul.f32.vlgmr.msra.gmra.mxu1 %v4457_v61 }
 0x52c   : > { %4734 = vmatpush.xpose.msrb.mxu1 %v8623_v14  ;;  %v4458_v14 = vsub.f32 %v4418_v55, %v4457_v61 }
 0x52e   : > { %4617 = vmatmul.f32.vlgmr.msrb.gmra.mxu2 %v4458_v14  ;;  %v4459_v47 = vand.u32 4294901760, %v4458_v14 }
 0x52f   : > { %4687 = vmatpush.xpose.msrb.mxu0 %v4504_v21 }
 0x530   : > { %4736 = vmatpush.xpose.msrb.mxu1 %v8665_v53  ;;  %v4460_v32 = vsub.f32 %v4458_v14, %v4459_v47  ;;  %4656 = vmatmul.f32.vlgmr.msrb.gmra.mxu3 %v4459_v47 }
 0x532   : > { %v4461_v53 = vand.u32 4294901760, %v4460_v32 }
 0x533   : > { %4691 = vmatpush.xpose.msrb.mxu0 %v4510_v26 }
 0x534   : > { %4738 = vmatpush.xpose.msrb.mxu1 %v8685_v58  ;;  %4462 = vmatmul.f32.vlgmr.msra.gmra.mxu0 %v4461_v53 }
 0x537   : > { %4695 = vmatpush.xpose.msrb.mxu0 %v4516_v10 }
 0x538   : > { %4740 = vmatpush.xpose.msrb.mxu1 %v8719_v33 }
 0x53b   : > { %4699 = vmatpush.xpose.msrb.mxu0 %v4522_v15 }
 0x53c   : > { %4742 = vmatpush.xpose.msrb.mxu1 %v8752_v62 }
 0x53f   : > { %4703 = vmatpush.xpose.msrb.mxu0 %v4528_v41 }
 0x540   : > { %4744 = vmatpush.xpose.msrb.mxu1 %v8785_v63 }
 0x543   : > { %4707 = vmatpush.xpose.msrb.mxu0 %v4534_v36 }
 0x544   : > { %4746 = vmatpush.xpose.msrb.mxu1 %v8817_v7 }
 0x547   : > { %4711 = vmatpush.xpose.msrb.mxu0 %v4540_v34 }
 0x548   : > { %4748 = vmatpush.xpose.msrb.mxu1 %v8848_v3 }
 0x54b   : > { %4715 = vmatpush.xpose.msrb.mxu0 %v4546_v35 }
 0x54c   : > { %4750 = vmatpush.xpose.msrb.mxu1 %v8863_v45 }
 0x54f   : > { %4719 = vmatpush.xpose.msrb.mxu0 %v4552_v37 }
 0x550   : > { %4752 = vmatpush.xpose.msrb.mxu1 %v8876_v27 }
 0x553   : > { %4723 = vmatpush.xpose.msrb.mxu0 %v4558_v50 }
 0x554   : > { %4754 = vmatpush.xpose.msrb.mxu1 %v8896_v13 }
 0x556   : > { %4725 = vmatmul.f32.vlgmr.msrb.gmra.mxu0 %v4457_v61 }
 0x558   : > { %4756 = vmatpush.xpose.msrb.mxu1 %v8910_v20 }
 0x55c   : > { %4758 = vmatpush.xpose.msrb.mxu1 %v8922_v54 }
 0x560   : > { %4760 = vmatpush.xpose.msrb.mxu1 %v8934_v60 }
 0x563   : > { %4762 = vmatmul.f32.vlgmr.msrb.gmra.mxu1 %v4457_v61 }
 0x577   : > { %v4423_v42 = vpop.permute.xlu1 %4422 }
 0x5a8   : > { %v4564_v51 = vpop.f32.mrf.mxu1 }
 0x5b1   : > { %v4463_v58 = vpop.f32.mrf.mxu0  ;;  %v4618_v24 = vpop.f32.mrf.mxu2 }
 0x5b2   : > { %v4464_v6 = vadd.f32 %v4463_v58, %v4423_v42 }
 0x5b3   : > { %v4657_v62 = vpop.f32.mrf.mxu3 }
 0x5b4   : > { %v4565_v33 = vadd.f32 %v4564_v51, %v4464_v6 }
 0x5b6   : > { %v4619_v18 = vadd.f32 %v4618_v24, %v4565_v33 }
 0x5b8   : > { %v4658_v25 = vadd.f32 %v4657_v62, %v4619_v18 }
 0x5d3   : > { %v4726_v4 = vpop.f32.mrf.mxu0 }
 0x5d4   : > { %v4727_v63 = vadd.f32 %v4726_v4, %v4658_v25 }
 0x5e0   : > { %v4763_v39 = vpop.f32.mrf.mxu1 }
 0x5e1   : > { %v4764_v52 = vadd.f32 %v4763_v39, %v4727_v63 }
 0x5e3   : > { %4766 = vst [vmem:[%s275_s15] sm:$0x1] %v4764_v52 }
 0x5e4   : > { %5135 = shalt.err (!%p5132_p9)
}
 0x5e5   : > { %4925 = dma.vmem_to_hbm [thread:$0]  (%p5267_p11), %s4779_s25, 16, %s4781_s2, %s4768_s7  }
 0x5e6 PF: > { %s4792_s23 = sand.u32 1, %s5166_s18   ;;  %p9702_p10 = scmp.ge.s32.totalorder %s5178_s21, 2 }
 0x5e7   : > { %s4793_s27 = scalar_lea.sflag [#allocation4], %s4792_s23 }
 0x5e8   : > { %p4936_p1 = pnand %p9702_p10, %p5271_p12 }
 0x5ea   : > { %p4937_p2 = pneg %p4936_p1 }
 0x5ec   : > { %5161 = dma.done.wait (%p4937_p2), %s4793_s27, 16  }
 0x5ed   : > { %5163 = vsyncadd (%p4937_p2), %s4793_s27, 4294967280  ;;  %s9703_s28 = sld [smem:[#allocation11_spill]]  ;;  %p19_p3 = scmp.ge.s32.totalorder %s5240_s24, 4  }
 0x5ee   : > { %s9704_s18 = smov %s5170_s19  ;;  %s9705_s19 = smov %s5174_s20 }
 0x5ef   : > { %s9707_s21 = smov %s5240_s24  ;;  %21 = sbr.rel (!%p19_p3) target bundleno = 8 (0x8), region = 92 }
 0x5f3   : > { %s9706_s20 = smov %s9703_s28 }
 0x5f4   :  { %4798 = vsyncpa [#allocation3], 1 }
 0x5f5   :  { %4800 = vsyncpa [#allocation3 + $0x1], 1 }
 0x5f6   :  { %4801 = vsyncpa [#allocation6], 1 }
 0x5f7   :  { %4802 = vsyncpa [#allocation4], 1 }
 0x5f8   :  { %4804 = vsyncpa [#allocation4 + $0x1], 1 }

</bundles_post_ra>
